<compile_context>
chip_gen: v5e
topology: v5e:2x2
jax: 0.10.0
libtpu: 0.0.40
codegen_flags: <defaults>
</compile_context>

<pallas_src>
import functools
import math

import jax
import jax.numpy as jnp
from jax import lax
from jax.experimental import pallas as pl
from jax.experimental.pallas import tpu as pltpu


# ------------------------- in-kernel math helpers ---------------------------

def _mm(x, w, b=None):
    """x @ w (+ b); w stored as (in, out), b as (1, out)."""
    y = lax.dot_general(x, w, (((1,), (0,)), ((), ())),
                        preferred_element_type=jnp.float32)
    return y if b is None else y + b


def _ln(x, g, b, eps=1e-5):
    mu = jnp.mean(x, axis=-1, keepdims=True)
    xc = x - mu
    var = jnp.mean(xc * xc, axis=-1, keepdims=True)
    return xc * lax.rsqrt(var + eps) * g + b


def _softmax_attn(q_scaled, k, v, bias=None):
    """softmax(q_scaled @ k^T + bias) @ v  (scale already folded into q)."""
    s = lax.dot_general(q_scaled, k, (((1,), (1,)), ((), ())),
                        preferred_element_type=jnp.float32)
    if bias is not None:
        s = s + bias
    s = s - jnp.max(s, axis=-1, keepdims=True)
    e = jnp.exp(s)
    p = e * pl.reciprocal(jnp.sum(e, axis=-1, keepdims=True), approx=True)
    return lax.dot_general(p, v, (((1,), (0,)), ((), ())),
                           preferred_element_type=jnp.float32)


def _mha(q, k, v, nhead):
    """nn.MultiheadAttention core (no out-proj); nhead==1 is the fast path."""
    dm = q.shape[-1]
    dh = dm // nhead
    scale = 1.0 / math.sqrt(dh)
    if nhead == 1:
        return _softmax_attn(q * scale, k, v)
    # TODO(synk): nhead > 1 uses static sub-128 lane slices for the head split
    # (correct, but may relayout); the reference config uses nhead == 1.
    outs = [_softmax_attn(q[:, i * dh:(i + 1) * dh] * scale,
                          k[:, i * dh:(i + 1) * dh],
                          v[:, i * dh:(i + 1) * dh]) for i in range(nhead)]
    return jnp.concatenate(outs, axis=-1)


# ------------------------- the single fused kernel --------------------------

def _fused_forward_kernel(*refs, treedef, n_params, nhead, d_model):
    f_cv_ref, f_attr_ref, bias_ref = refs[0], refs[1], refs[2]
    param_refs = refs[3:3 + n_params]
    out_ref, h_cv_ref, h_attr_ref = refs[3 + n_params:]
    p = jax.tree_util.tree_unflatten(treedef, param_refs)

    D = d_model

    # ---- embeddings ---------------------------------------------------------
    x_cv = f_cv_ref[0]                                               # (S, Ccv)
    h_cv = _mm(x_cv, p['embed_cv_w'][...], p['embed_cv_b'][...])     # (S, D)
    h_cv_ref[0] = h_cv

    h_attr = _mm(f_attr_ref[...], p['embed_attr_w'][...],
                 p['embed_attr_b'][...])                             # (Na, D)
    h_attr_ref[0] = h_attr

    geo_bias = bias_ref[...]                                         # (S, S) = -relu(w_g)

    # ---- MultiLevelEncoder_woPad (h = 1, d_k = d_v = D, post-norm) ----------
    out = h_cv
    enc_scale = 1.0 / math.sqrt(D)                                   # d_k = dim_com
    for lp in p['enc_layers']:
        q = _mm(out, lp['q_w'][...], lp['q_b'][...])
        k = _mm(out, lp['k_w'][...], lp['k_b'][...])
        v = _mm(out, lp['v_w'][...], lp['v_b'][...])
        a = _softmax_attn(q * enc_scale, k, v, bias=geo_bias)
        a = _mm(a, lp['o_w'][...], lp['o_b'][...])
        # MultiHeadGeometryAttention (post-norm): LN(queries + attn_out)
        mh = _ln(out + a, lp['mh_ln_g'][...], lp['mh_ln_b'][...])
        # EncoderLayer: att = lnorm(queries + mhatt_out)
        att = _ln(out + mh, lp['enc_ln_g'][...], lp['enc_ln_b'][...])
        # PositionWiseFeedForward: LN(att + fc2(relu(fc1(att))))
        hid = jnp.maximum(_mm(att, lp['ff_w1'][...], lp['ff_b1'][...]), 0.0)
        ff = _mm(hid, lp['ff_w2'][...], lp['ff_b2'][...])
        out = _ln(att + ff, lp['pw_ln_g'][...], lp['pw_ln_b'][...])
    memory = out                                                     # (S, D)

    # ---- TransformerDecoder (SAtt=True, post-norm) ---------------------------
    tgt = h_attr                                                     # (Na, D)
    for lp in p['dec_layers']:
        # self-attention
        q = _mm(tgt, lp['sa_q_w'][...], lp['sa_q_b'][...])
        k = _mm(tgt, lp['sa_k_w'][...], lp['sa_k_b'][...])
        v = _mm(tgt, lp['sa_v_w'][...], lp['sa_v_b'][...])
        sa = _mha(q, k, v, nhead)
        sa = _mm(sa, lp['sa_o_w'][...], lp['sa_o_b'][...])
        tgt = _ln(tgt + sa, lp['norm1_g'][...], lp['norm1_b'][...])
        # cross-attention over encoder memory
        q = _mm(tgt, lp['ca_q_w'][...], lp['ca_q_b'][...])
        k = _mm(memory, lp['ca_k_w'][...], lp['ca_k_b'][...])
        v = _mm(memory, lp['ca_v_w'][...], lp['ca_v_b'][...])
        ca = _mha(q, k, v, nhead)
        ca = _mm(ca, lp['ca_o_w'][...], lp['ca_o_b'][...])
        tgt = _ln(tgt + ca, lp['norm2_g'][...], lp['norm2_b'][...])
        # feed-forward
        hid = jnp.maximum(_mm(tgt, lp['lin1_w'][...], lp['lin1_b'][...]), 0.0)
        ff = _mm(hid, lp['lin2_w'][...], lp['lin2_b'][...])
        tgt = _ln(tgt + ff, lp['norm3_g'][...], lp['norm3_b'][...])

    out_ref[0] = tgt


# -------------------- geometry bias (batch-invariant glue) -------------------

def _geometry_bias(wg_w, wg_b, seq_len, grid_size=(7, 7), dim_g=64, wave_len=1000.0):
    """-relu(WG(BoxRelationalEmbedding)) for one batch element, shape (S, S)."""
    gx, gy = grid_size
    S = gx * gy
    assert seq_len == S, "seq_len must equal grid_size[0] * grid_size[1] (= 49)"
    x = jnp.arange(gx, dtype=jnp.float32)
    y = jnp.arange(gy, dtype=jnp.float32)
    px_min = jnp.repeat(x, gx)               # x.view(-1,1).expand(-1,gx).view(-1)
    py_min = jnp.tile(y, gy)                 # y.view(1,-1).expand(gy,-1).view(-1)
    px_max, py_max = px_min + 1.0, py_min + 1.0
    rpx_min, rpx_max = px_min / gx, px_max / gx
    rpy_min, rpy_max = py_min / gy, py_max / gy
    cx = (rpx_min + rpx_max) * 0.5
    cy = (rpy_min + rpy_max) * 0.5
    w = rpx_max - rpx_min + 1.0
    h = rpy_max - rpy_min + 1.0
    delta_x = jnp.log(jnp.maximum(jnp.abs((cx[:, None] - cx[None, :]) / w[:, None]), 0.001))
    delta_y = jnp.log(jnp.maximum(jnp.abs((cy[:, None] - cy[None, :]) / h[:, None]), 0.001))
    delta_w = jnp.log(w[:, None] / w[None, :])
    delta_h = jnp.log(h[:, None] / h[None, :])
    position_mat = jnp.stack([delta_x, delta_y, delta_w, delta_h], axis=-1)      # (S,S,4)
    feat_range = jnp.arange(dim_g // 8, dtype=jnp.float32)
    dim_mat = 1.0 / jnp.power(wave_len, feat_range / (dim_g / 8.0))              # (8,)
    mul = (100.0 * position_mat)[..., None] * dim_mat                            # (S,S,4,8)
    mul = mul.reshape(S, S, 4 * (dim_g // 8))                                    # (S,S,32)
    emb = jnp.concatenate([jnp.sin(mul), jnp.cos(mul)], axis=-1)                 # (S,S,64)
    wgt = jnp.maximum(emb.reshape(S * S, dim_g) @ wg_w + wg_b, 0.0)              # (S*S,1)
    return -wgt.reshape(S, S)


# ----------------------------- model forward ---------------------------------

def transformer_forward(params, f_cv, f_attr, nhead=1):
    """f_cv: (B, in_dim_cv, 49) (NCW layout), f_attr: (N_attr, in_dim_attr)."""
    B, _, S = f_cv.shape
    Na = f_attr.shape[0]
    Ccv, D = params['embed_cv_w'].shape

    f_cv_t = jnp.transpose(f_cv, (0, 2, 1)).astype(jnp.float32)      # (B, S, Ccv)
    f_attr = f_attr.astype(jnp.float32)

    # Batch-invariant geometry attention bias, computed once per forward.
    bias = _geometry_bias(params['wg_w'], params['wg_b'], S)         # (S, S)

    kparams = {k: v for k, v in params.items() if k not in ('wg_w', 'wg_b')}
    flat, treedef = jax.tree_util.tree_flatten(kparams)
    n_params = len(flat)

    kern = functools.partial(_fused_forward_kernel, treedef=treedef,
                             n_params=n_params, nhead=nhead, d_model=D)

    def _const_spec(a):
        nd = a.ndim
        return pl.BlockSpec(a.shape, lambda b, _n=nd: (0,) * _n)

    in_specs = ([pl.BlockSpec((1, S, Ccv), lambda b: (b, 0, 0)),
                 _const_spec(f_attr),
                 _const_spec(bias)]
                + [_const_spec(a) for a in flat])

    out_shape = (jax.ShapeDtypeStruct((B, Na, D), jnp.float32),      # decoder out
                 jax.ShapeDtypeStruct((B, S, D), jnp.float32),       # h_cv
                 jax.ShapeDtypeStruct((B, Na, D), jnp.float32))      # h_attr_batch
    out_specs = (pl.BlockSpec((1, Na, D), lambda b: (b, 0, 0)),
                 pl.BlockSpec((1, S, D), lambda b: (b, 0, 0)),
                 pl.BlockSpec((1, Na, D), lambda b: (b, 0, 0)))

    out, h_cv, h_attr_batch = pl.pallas_call(
        kern,
        out_shape=out_shape,
        grid=(B,),
        in_specs=in_specs,
        out_specs=out_specs,
        compiler_params=pltpu.CompilerParams(
            dimension_semantics=("parallel",)),                      # v7x: 2 TCs split B
    )(f_cv_t, f_attr, bias, *flat)
    # torch returns out.permute(1,0,2) from (Na,B,D) -> (B,Na,D); we are already (B,Na,D)
    return out, h_cv, h_attr_batch


# ----------------------------- parameter init --------------------------------

def init_transformer_params(key, cfg):
    D, FF = cfg['dim_com'], cfg['d_ff']
    keys = iter(jax.random.split(key, 256))

    def lin(in_dim, out_dim):
        # xavier-uniform weight (stored transposed: (in, out)), zero bias (1, out)
        limit = math.sqrt(6.0 / (in_dim + out_dim))
        w = jax.random.uniform(next(keys), (in_dim, out_dim), jnp.float32, -limit, limit)
        return w, jnp.zeros((1, out_dim), jnp.float32)

    def ln_p():
        return jnp.ones((1, D), jnp.float32), jnp.zeros((1, D), jnp.float32)

    p = {}
    p['embed_cv_w'], p['embed_cv_b'] = lin(cfg['in_dim_cv'], D)
    # TODO(synk): embed_cv_aux (aux_embed=True) is initialized in torch but unused in forward; omitted.
    p['embed_attr_w'], p['embed_attr_b'] = lin(cfg['in_dim_attr'], D)
    p['wg_w'], p['wg_b'] = lin(64, 1)                                # WGs (h = 1)

    enc_layers = []
    for _ in range(cfg['ec_layer']):
        l = {}
        l['q_w'], l['q_b'] = lin(D, D)
        l['k_w'], l['k_b'] = lin(D, D)
        l['v_w'], l['v_b'] = lin(D, D)
        l['o_w'], l['o_b'] = lin(D, D)
        l['mh_ln_g'], l['mh_ln_b'] = ln_p()
        l['enc_ln_g'], l['enc_ln_b'] = ln_p()
        l['ff_w1'], l['ff_b1'] = lin(D, FF)
        l['ff_w2'], l['ff_b2'] = lin(FF, D)
        l['pw_ln_g'], l['pw_ln_b'] = ln_p()
        enc_layers.append(l)
    p['enc_layers'] = enc_layers

    dec_layers = []
    for _ in range(cfg['dc_layer']):
        l = {}
        for pre in ('sa', 'ca'):
            l[pre + '_q_w'], l[pre + '_q_b'] = lin(D, D)
            l[pre + '_k_w'], l[pre + '_k_b'] = lin(D, D)
            l[pre + '_v_w'], l[pre + '_v_b'] = lin(D, D)
            l[pre + '_o_w'], l[pre + '_o_b'] = lin(D, D)
        l['lin1_w'], l['lin1_b'] = lin(D, FF)
        l['lin2_w'], l['lin2_b'] = lin(FF, D)
        l['norm1_g'], l['norm1_b'] = ln_p()
        l['norm2_g'], l['norm2_b'] = ln_p()
        l['norm3_g'], l['norm3_b'] = ln_p()
        dec_layers.append(l)
    p['dec_layers'] = dec_layers
    return p


# ----------------------------------- main ------------------------------------

if __name__ == "__main__":
    # Small config consistent with the module (seq_len MUST be 49 = 7*7 grid).
    cfg = dict(ec_layer=1, dc_layer=1, dim_com=32, d_ff=64, heads=1,
               in_dim_cv=32, in_dim_attr=24)
    B, S, Na = 2, 49, 8

    key = jax.random.PRNGKey(0)
    kp, k1, k2 = jax.random.split(key, 3)
    params = init_transformer_params(kp, cfg)
    f_cv = jax.random.normal(k1, (B, cfg['in_dim_cv'], S), jnp.float32)
    f_attr = jax.random.normal(k2, (Na, cfg['in_dim_attr']), jnp.float32)

    fwd = jax.jit(functools.partial(transformer_forward, nhead=cfg['heads']))
    out, h_cv, h_attr_batch = fwd(params, f_cv, f_attr)
    jax.block_until_ready((out, h_cv, h_attr_batch))

    assert out.shape == (B, Na, cfg['dim_com'])
    assert h_cv.shape == (B, S, cfg['dim_com'])
    assert h_attr_batch.shape == (B, Na, cfg['dim_com'])
    assert bool(jnp.all(jnp.isfinite(out)))
    print("KERNEL_OK")
</pallas_src>

<mosaic_0001>
module attributes {stable_mosaic.version = 11 : i64} {
  func.func @_fused_forward_kernel(%arg0: i32, %arg1: memref<1x49x32xf32, #tpu.memory_space<vmem>>, %arg2: memref<8x24xf32, #tpu.memory_space<vmem>>, %arg3: memref<49x49xf32, #tpu.memory_space<vmem>>, %arg4: memref<1x32xf32, #tpu.memory_space<vmem>>, %arg5: memref<32x32xf32, #tpu.memory_space<vmem>>, %arg6: memref<1x32xf32, #tpu.memory_space<vmem>>, %arg7: memref<32x32xf32, #tpu.memory_space<vmem>>, %arg8: memref<1x32xf32, #tpu.memory_space<vmem>>, %arg9: memref<32x32xf32, #tpu.memory_space<vmem>>, %arg10: memref<1x32xf32, #tpu.memory_space<vmem>>, %arg11: memref<32x32xf32, #tpu.memory_space<vmem>>, %arg12: memref<1x64xf32, #tpu.memory_space<vmem>>, %arg13: memref<32x64xf32, #tpu.memory_space<vmem>>, %arg14: memref<1x32xf32, #tpu.memory_space<vmem>>, %arg15: memref<64x32xf32, #tpu.memory_space<vmem>>, %arg16: memref<1x32xf32, #tpu.memory_space<vmem>>, %arg17: memref<1x32xf32, #tpu.memory_space<vmem>>, %arg18: memref<1x32xf32, #tpu.memory_space<vmem>>, %arg19: memref<1x32xf32, #tpu.memory_space<vmem>>, %arg20: memref<1x32xf32, #tpu.memory_space<vmem>>, %arg21: memref<1x32xf32, #tpu.memory_space<vmem>>, %arg22: memref<1x32xf32, #tpu.memory_space<vmem>>, %arg23: memref<32x32xf32, #tpu.memory_space<vmem>>, %arg24: memref<1x32xf32, #tpu.memory_space<vmem>>, %arg25: memref<32x32xf32, #tpu.memory_space<vmem>>, %arg26: memref<1x32xf32, #tpu.memory_space<vmem>>, %arg27: memref<32x32xf32, #tpu.memory_space<vmem>>, %arg28: memref<1x32xf32, #tpu.memory_space<vmem>>, %arg29: memref<32x32xf32, #tpu.memory_space<vmem>>, %arg30: memref<1x32xf32, #tpu.memory_space<vmem>>, %arg31: memref<24x32xf32, #tpu.memory_space<vmem>>, %arg32: memref<1x32xf32, #tpu.memory_space<vmem>>, %arg33: memref<32x32xf32, #tpu.memory_space<vmem>>, %arg34: memref<1x32xf32, #tpu.memory_space<vmem>>, %arg35: memref<1x32xf32, #tpu.memory_space<vmem>>, %arg36: memref<1x64xf32, #tpu.memory_space<vmem>>, %arg37: memref<1x32xf32, #tpu.memory_space<vmem>>, %arg38: memref<32x64xf32, #tpu.memory_space<vmem>>, %arg39: memref<64x32xf32, #tpu.memory_space<vmem>>, %arg40: memref<1x32xf32, #tpu.memory_space<vmem>>, %arg41: memref<32x32xf32, #tpu.memory_space<vmem>>, %arg42: memref<1x32xf32, #tpu.memory_space<vmem>>, %arg43: memref<1x32xf32, #tpu.memory_space<vmem>>, %arg44: memref<1x32xf32, #tpu.memory_space<vmem>>, %arg45: memref<32x32xf32, #tpu.memory_space<vmem>>, %arg46: memref<1x32xf32, #tpu.memory_space<vmem>>, %arg47: memref<1x32xf32, #tpu.memory_space<vmem>>, %arg48: memref<1x32xf32, #tpu.memory_space<vmem>>, %arg49: memref<32x32xf32, #tpu.memory_space<vmem>>, %arg50: memref<1x32xf32, #tpu.memory_space<vmem>>, %arg51: memref<32x32xf32, #tpu.memory_space<vmem>>, %arg52: memref<1x8x32xf32, #tpu.memory_space<vmem>>, %arg53: memref<1x49x32xf32, #tpu.memory_space<vmem>>, %arg54: memref<1x8x32xf32, #tpu.memory_space<vmem>>) attributes {dimension_semantics = [#tpu.dimension_semantics<parallel>], iteration_bounds = array<i64: 2>, scalar_prefetch = 0 : i64, scratch_operands = 0 : i64, tpu.core_type = #tpu.core_type<tc>, window_params = [{transform_indices = @transform_0, window_bounds = array<i64: 1, 49, 32>}, {pipeline_mode = #tpu.pipeline_mode<synchronous>, transform_indices = @transform_1, window_bounds = array<i64: 8, 24>}, {pipeline_mode = #tpu.pipeline_mode<synchronous>, transform_indices = @transform_2, window_bounds = array<i64: 49, 49>}, {pipeline_mode = #tpu.pipeline_mode<synchronous>, transform_indices = @transform_3, window_bounds = array<i64: 1, 32>}, {pipeline_mode = #tpu.pipeline_mode<synchronous>, transform_indices = @transform_4, window_bounds = array<i64: 32, 32>}, {pipeline_mode = #tpu.pipeline_mode<synchronous>, transform_indices = @transform_5, window_bounds = array<i64: 1, 32>}, {pipeline_mode = #tpu.pipeline_mode<synchronous>, transform_indices = @transform_6, window_bounds = array<i64: 32, 32>}, {pipeline_mode = #tpu.pipeline_mode<synchronous>, transform_indices = @transform_7, window_bounds = array<i64: 1, 32>}, {pipeline_mode = #tpu.pipeline_mode<synchronous>, transform_indices = @transform_8, window_bounds = array<i64: 32, 32>}, {pipeline_mode = #tpu.pipeline_mode<synchronous>, transform_indices = @transform_9, window_bounds = array<i64: 1, 32>}, {pipeline_mode = #tpu.pipeline_mode<synchronous>, transform_indices = @transform_10, window_bounds = array<i64: 32, 32>}, {pipeline_mode = #tpu.pipeline_mode<synchronous>, transform_indices = @transform_11, window_bounds = array<i64: 1, 64>}, {pipeline_mode = #tpu.pipeline_mode<synchronous>, transform_indices = @transform_12, window_bounds = array<i64: 32, 64>}, {pipeline_mode = #tpu.pipeline_mode<synchronous>, transform_indices = @transform_13, window_bounds = array<i64: 1, 32>}, {pipeline_mode = #tpu.pipeline_mode<synchronous>, transform_indices = @transform_14, window_bounds = array<i64: 64, 32>}, {pipeline_mode = #tpu.pipeline_mode<synchronous>, transform_indices = @transform_15, window_bounds = array<i64: 1, 32>}, {pipeline_mode = #tpu.pipeline_mode<synchronous>, transform_indices = @transform_16, window_bounds = array<i64: 1, 32>}, {pipeline_mode = #tpu.pipeline_mode<synchronous>, transform_indices = @transform_17, window_bounds = array<i64: 1, 32>}, {pipeline_mode = #tpu.pipeline_mode<synchronous>, transform_indices = @transform_18, window_bounds = array<i64: 1, 32>}, {pipeline_mode = #tpu.pipeline_mode<synchronous>, transform_indices = @transform_19, window_bounds = array<i64: 1, 32>}, {pipeline_mode = #tpu.pipeline_mode<synchronous>, transform_indices = @transform_20, window_bounds = array<i64: 1, 32>}, {pipeline_mode = #tpu.pipeline_mode<synchronous>, transform_indices = @transform_21, window_bounds = array<i64: 1, 32>}, {pipeline_mode = #tpu.pipeline_mode<synchronous>, transform_indices = @transform_22, window_bounds = array<i64: 32, 32>}, {pipeline_mode = #tpu.pipeline_mode<synchronous>, transform_indices = @transform_23, window_bounds = array<i64: 1, 32>}, {pipeline_mode = #tpu.pipeline_mode<synchronous>, transform_indices = @transform_24, window_bounds = array<i64: 32, 32>}, {pipeline_mode = #tpu.pipeline_mode<synchronous>, transform_indices = @transform_25, window_bounds = array<i64: 1, 32>}, {pipeline_mode = #tpu.pipeline_mode<synchronous>, transform_indices = @transform_26, window_bounds = array<i64: 32, 32>}, {pipeline_mode = #tpu.pipeline_mode<synchronous>, transform_indices = @transform_27, window_bounds = array<i64: 1, 32>}, {pipeline_mode = #tpu.pipeline_mode<synchronous>, transform_indices = @transform_28, window_bounds = array<i64: 32, 32>}, {pipeline_mode = #tpu.pipeline_mode<synchronous>, transform_indices = @transform_29, window_bounds = array<i64: 1, 32>}, {pipeline_mode = #tpu.pipeline_mode<synchronous>, transform_indices = @transform_30, window_bounds = array<i64: 24, 32>}, {pipeline_mode = #tpu.pipeline_mode<synchronous>, transform_indices = @transform_31, window_bounds = array<i64: 1, 32>}, {pipeline_mode = #tpu.pipeline_mode<synchronous>, transform_indices = @transform_32, window_bounds = array<i64: 32, 32>}, {pipeline_mode = #tpu.pipeline_mode<synchronous>, transform_indices = @transform_33, window_bounds = array<i64: 1, 32>}, {pipeline_mode = #tpu.pipeline_mode<synchronous>, transform_indices = @transform_34, window_bounds = array<i64: 1, 32>}, {pipeline_mode = #tpu.pipeline_mode<synchronous>, transform_indices = @transform_35, window_bounds = array<i64: 1, 64>}, {pipeline_mode = #tpu.pipeline_mode<synchronous>, transform_indices = @transform_36, window_bounds = array<i64: 1, 32>}, {pipeline_mode = #tpu.pipeline_mode<synchronous>, transform_indices = @transform_37, window_bounds = array<i64: 32, 64>}, {pipeline_mode = #tpu.pipeline_mode<synchronous>, transform_indices = @transform_38, window_bounds = array<i64: 64, 32>}, {pipeline_mode = #tpu.pipeline_mode<synchronous>, transform_indices = @transform_39, window_bounds = array<i64: 1, 32>}, {pipeline_mode = #tpu.pipeline_mode<synchronous>, transform_indices = @transform_40, window_bounds = array<i64: 32, 32>}, {pipeline_mode = #tpu.pipeline_mode<synchronous>, transform_indices = @transform_41, window_bounds = array<i64: 1, 32>}, {pipeline_mode = #tpu.pipeline_mode<synchronous>, transform_indices = @transform_42, window_bounds = array<i64: 1, 32>}, {pipeline_mode = #tpu.pipeline_mode<synchronous>, transform_indices = @transform_43, window_bounds = array<i64: 1, 32>}, {pipeline_mode = #tpu.pipeline_mode<synchronous>, transform_indices = @transform_44, window_bounds = array<i64: 32, 32>}, {pipeline_mode = #tpu.pipeline_mode<synchronous>, transform_indices = @transform_45, window_bounds = array<i64: 1, 32>}, {pipeline_mode = #tpu.pipeline_mode<synchronous>, transform_indices = @transform_46, window_bounds = array<i64: 1, 32>}, {pipeline_mode = #tpu.pipeline_mode<synchronous>, transform_indices = @transform_47, window_bounds = array<i64: 1, 32>}, {pipeline_mode = #tpu.pipeline_mode<synchronous>, transform_indices = @transform_48, window_bounds = array<i64: 32, 32>}, {pipeline_mode = #tpu.pipeline_mode<synchronous>, transform_indices = @transform_49, window_bounds = array<i64: 1, 32>}, {pipeline_mode = #tpu.pipeline_mode<synchronous>, transform_indices = @transform_50, window_bounds = array<i64: 32, 32>}, {transform_indices = @transform_51, window_bounds = array<i64: 1, 8, 32>}, {transform_indices = @transform_52, window_bounds = array<i64: 1, 49, 32>}, {transform_indices = @transform_53, window_bounds = array<i64: 1, 8, 32>}]} {
    %c0 = arith.constant 0 : index
    %c0_0 = arith.constant 0 : index
    %c0_1 = arith.constant 0 : index
    %0 = vector.load %arg1[%c0, %c0_0, %c0_1] : memref<1x49x32xf32, #tpu.memory_space<vmem>>, vector<1x49x32xf32>
    %1 = vector.shape_cast %0 : vector<1x49x32xf32> to vector<49x32xf32>
    %c0_2 = arith.constant 0 : index
    %c0_3 = arith.constant 0 : index
    %2 = vector.load %arg33[%c0_2, %c0_3] : memref<32x32xf32, #tpu.memory_space<vmem>>, vector<32x32xf32>
    %c0_4 = arith.constant 0 : index
    %c0_5 = arith.constant 0 : index
    %3 = vector.load %arg32[%c0_4, %c0_5] : memref<1x32xf32, #tpu.memory_space<vmem>>, vector<1x32xf32>
    %cst = arith.constant dense<0.000000e+00> : vector<49x32xf32>
    %4 = tpu.matmul %1, %2, %cst {dimension_numbers = #tpu.dot_dimension_numbers<[1], [0], [0], [1], [0, 0, 1, 1], [], []>} : vector<49x32xf32>, vector<32x32xf32>, vector<49x32xf32> -> vector<49x32xf32>
    %5 = vector.broadcast %3 : vector<1x32xf32> to vector<49x32xf32>
    %6 = arith.addf %4, %5 : vector<49x32xf32>
    %c0_6 = arith.constant 0 : index
    %c0_7 = arith.constant 0 : index
    %c0_8 = arith.constant 0 : index
    %7 = vector.load %arg53[%c0_6, %c0_7, %c0_8] : memref<1x49x32xf32, #tpu.memory_space<vmem>>, vector<1x49x32xf32>
    %8 = vector.shape_cast %7 : vector<1x49x32xf32> to vector<49x32xf32>
    %9 = vector.shape_cast %6 : vector<49x32xf32> to vector<1x49x32xf32>
    tpu.vector_store %arg53[%c0_6, %c0_7, %c0_8], %9 {strides = array<i32>} : memref<1x49x32xf32, #tpu.memory_space<vmem>>, vector<1x49x32xf32>,
    %c0_9 = arith.constant 0 : index
    %c0_10 = arith.constant 0 : index
    %10 = vector.load %arg2[%c0_9, %c0_10] : memref<8x24xf32, #tpu.memory_space<vmem>>, vector<8x24xf32>
    %c0_11 = arith.constant 0 : index
    %c0_12 = arith.constant 0 : index
    %11 = vector.load %arg31[%c0_11, %c0_12] : memref<24x32xf32, #tpu.memory_space<vmem>>, vector<24x32xf32>
    %c0_13 = arith.constant 0 : index
    %c0_14 = arith.constant 0 : index
    %12 = vector.load %arg30[%c0_13, %c0_14] : memref<1x32xf32, #tpu.memory_space<vmem>>, vector<1x32xf32>
    %cst_15 = arith.constant dense<0.000000e+00> : vector<8x32xf32>
    %13 = tpu.matmul %10, %11, %cst_15 {dimension_numbers = #tpu.dot_dimension_numbers<[1], [0], [0], [1], [0, 0, 1, 1], [], []>} : vector<8x24xf32>, vector<24x32xf32>, vector<8x32xf32> -> vector<8x32xf32>
    %14 = vector.broadcast %12 : vector<1x32xf32> to vector<8x32xf32>
    %15 = arith.addf %13, %14 : vector<8x32xf32>
    %c0_16 = arith.constant 0 : index
    %c0_17 = arith.constant 0 : index
    %c0_18 = arith.constant 0 : index
    %16 = vector.load %arg54[%c0_16, %c0_17, %c0_18] : memref<1x8x32xf32, #tpu.memory_space<vmem>>, vector<1x8x32xf32>
    %17 = vector.shape_cast %16 : vector<1x8x32xf32> to vector<8x32xf32>
    %18 = vector.shape_cast %15 : vector<8x32xf32> to vector<1x8x32xf32>
    tpu.vector_store %arg54[%c0_16, %c0_17, %c0_18], %18 {strides = array<i32>} : memref<1x8x32xf32, #tpu.memory_space<vmem>>, vector<1x8x32xf32>,
    %c0_19 = arith.constant 0 : index
    %c0_20 = arith.constant 0 : index
    %19 = vector.load %arg3[%c0_19, %c0_20] : memref<49x49xf32, #tpu.memory_space<vmem>>, vector<49x49xf32>
    %c0_21 = arith.constant 0 : index
    %c0_22 = arith.constant 0 : index
    %20 = vector.load %arg49[%c0_21, %c0_22] : memref<32x32xf32, #tpu.memory_space<vmem>>, vector<32x32xf32>
    %c0_23 = arith.constant 0 : index
    %c0_24 = arith.constant 0 : index
    %21 = vector.load %arg48[%c0_23, %c0_24] : memref<1x32xf32, #tpu.memory_space<vmem>>, vector<1x32xf32>
    %cst_25 = arith.constant dense<0.000000e+00> : vector<49x32xf32>
    %22 = tpu.matmul %6, %20, %cst_25 {dimension_numbers = #tpu.dot_dimension_numbers<[1], [0], [0], [1], [0, 0, 1, 1], [], []>} : vector<49x32xf32>, vector<32x32xf32>, vector<49x32xf32> -> vector<49x32xf32>
    %23 = vector.broadcast %21 : vector<1x32xf32> to vector<49x32xf32>
    %24 = arith.addf %22, %23 : vector<49x32xf32>
    %c0_26 = arith.constant 0 : index
    %c0_27 = arith.constant 0 : index
    %25 = vector.load %arg41[%c0_26, %c0_27] : memref<32x32xf32, #tpu.memory_space<vmem>>, vector<32x32xf32>
    %c0_28 = arith.constant 0 : index
    %c0_29 = arith.constant 0 : index
    %26 = vector.load %arg40[%c0_28, %c0_29] : memref<1x32xf32, #tpu.memory_space<vmem>>, vector<1x32xf32>
    %cst_30 = arith.constant dense<0.000000e+00> : vector<49x32xf32>
    %27 = tpu.matmul %6, %25, %cst_30 {dimension_numbers = #tpu.dot_dimension_numbers<[1], [0], [0], [1], [0, 0, 1, 1], [], []>} : vector<49x32xf32>, vector<32x32xf32>, vector<49x32xf32> -> vector<49x32xf32>
    %28 = vector.broadcast %26 : vector<1x32xf32> to vector<49x32xf32>
    %29 = arith.addf %27, %28 : vector<49x32xf32>
    %c0_31 = arith.constant 0 : index
    %c0_32 = arith.constant 0 : index
    %30 = vector.load %arg51[%c0_31, %c0_32] : memref<32x32xf32, #tpu.memory_space<vmem>>, vector<32x32xf32>
    %c0_33 = arith.constant 0 : index
    %c0_34 = arith.constant 0 : index
    %31 = vector.load %arg50[%c0_33, %c0_34] : memref<1x32xf32, #tpu.memory_space<vmem>>, vector<1x32xf32>
    %cst_35 = arith.constant dense<0.000000e+00> : vector<49x32xf32>
    %32 = tpu.matmul %6, %30, %cst_35 {dimension_numbers = #tpu.dot_dimension_numbers<[1], [0], [0], [1], [0, 0, 1, 1], [], []>} : vector<49x32xf32>, vector<32x32xf32>, vector<49x32xf32> -> vector<49x32xf32>
    %33 = vector.broadcast %31 : vector<1x32xf32> to vector<49x32xf32>
    %34 = arith.addf %32, %33 : vector<49x32xf32>
    %cst_36 = arith.constant 0.176776692 : f32
    %35 = vector.broadcast %cst_36 : f32 to vector<49x32xf32>
    %36 = arith.mulf %24, %35 : vector<49x32xf32>
    %cst_37 = arith.constant dense<0.000000e+00> : vector<49x49xf32>
    %37 = tpu.matmul %36, %29, %cst_37 {dimension_numbers = #tpu.dot_dimension_numbers<[1], [1], [0], [0], [0, 0, 1, 0], [], []>} : vector<49x32xf32>, vector<49x32xf32>, vector<49x49xf32> -> vector<49x49xf32>
    %38 = arith.addf %37, %19 : vector<49x49xf32>
    %cst_38 = arith.constant dense<0xFF800000> : vector<49xf32>
    %39 = vector.multi_reduction <maximumf>, %38, %cst_38 [1] : vector<49x49xf32> to vector<49xf32>
    %40 = vector.shape_cast %39 : vector<49xf32> to vector<49x1xf32>
    %41 = vector.broadcast %40 : vector<49x1xf32> to vector<49x49xf32>
    %42 = arith.subf %38, %41 : vector<49x49xf32>
    %43 = math.exp %42 : vector<49x49xf32>
    %cst_39 = arith.constant dense<0.000000e+00> : vector<49xf32>
    %44 = vector.multi_reduction <add>, %43, %cst_39 [1] : vector<49x49xf32> to vector<49xf32>
    %45 = vector.shape_cast %44 : vector<49xf32> to vector<49x1xf32>
    %46 = tpu.reciprocal %45 {approx = true} : vector<49x1xf32> -> vector<49x1xf32>
    %47 = vector.broadcast %46 : vector<49x1xf32> to vector<49x49xf32>
    %48 = arith.mulf %43, %47 : vector<49x49xf32>
    %cst_40 = arith.constant dense<0.000000e+00> : vector<49x32xf32>
    %49 = tpu.matmul %48, %34, %cst_40 {dimension_numbers = #tpu.dot_dimension_numbers<[1], [0], [0], [1], [0, 0, 1, 1], [], []>} : vector<49x49xf32>, vector<49x32xf32>, vector<49x32xf32> -> vector<49x32xf32>
    %c0_41 = arith.constant 0 : index
    %c0_42 = arith.constant 0 : index
    %50 = vector.load %arg45[%c0_41, %c0_42] : memref<32x32xf32, #tpu.memory_space<vmem>>, vector<32x32xf32>
    %c0_43 = arith.constant 0 : index
    %c0_44 = arith.constant 0 : index
    %51 = vector.load %arg44[%c0_43, %c0_44] : memref<1x32xf32, #tpu.memory_space<vmem>>, vector<1x32xf32>
    %cst_45 = arith.constant dense<0.000000e+00> : vector<49x32xf32>
    %52 = tpu.matmul %49, %50, %cst_45 {dimension_numbers = #tpu.dot_dimension_numbers<[1], [0], [0], [1], [0, 0, 1, 1], [], []>} : vector<49x32xf32>, vector<32x32xf32>, vector<49x32xf32> -> vector<49x32xf32>
    %53 = vector.broadcast %51 : vector<1x32xf32> to vector<49x32xf32>
    %54 = arith.addf %52, %53 : vector<49x32xf32>
    %55 = arith.addf %6, %54 : vector<49x32xf32>
    %c0_46 = arith.constant 0 : index
    %c0_47 = arith.constant 0 : index
    %56 = vector.load %arg43[%c0_46, %c0_47] : memref<1x32xf32, #tpu.memory_space<vmem>>, vector<1x32xf32>
    %c0_48 = arith.constant 0 : index
    %c0_49 = arith.constant 0 : index
    %57 = vector.load %arg42[%c0_48, %c0_49] : memref<1x32xf32, #tpu.memory_space<vmem>>, vector<1x32xf32>
    %cst_50 = arith.constant dense<0.000000e+00> : vector<49xf32>
    %58 = vector.multi_reduction <add>, %55, %cst_50 [1] : vector<49x32xf32> to vector<49xf32>
    %59 = vector.shape_cast %58 : vector<49xf32> to vector<49x1xf32>
    %cst_51 = arith.constant 3.200000e+01 : f32
    %60 = vector.broadcast %cst_51 : f32 to vector<49x1xf32>
    %61 = arith.divf %59, %60 : vector<49x1xf32>
    %62 = vector.broadcast %61 : vector<49x1xf32> to vector<49x32xf32>
    %63 = arith.subf %55, %62 : vector<49x32xf32>
    %64 = arith.mulf %63, %63 : vector<49x32xf32>
    %cst_52 = arith.constant dense<0.000000e+00> : vector<49xf32>
    %65 = vector.multi_reduction <add>, %64, %cst_52 [1] : vector<49x32xf32> to vector<49xf32>
    %66 = vector.shape_cast %65 : vector<49xf32> to vector<49x1xf32>
    %cst_53 = arith.constant 3.200000e+01 : f32
    %67 = vector.broadcast %cst_53 : f32 to vector<49x1xf32>
    %68 = arith.divf %66, %67 : vector<49x1xf32>
    %cst_54 = arith.constant 9.99999974E-6 : f32
    %69 = vector.broadcast %cst_54 : f32 to vector<49x1xf32>
    %70 = arith.addf %68, %69 : vector<49x1xf32>
    %71 = math.rsqrt %70 : vector<49x1xf32>
    %72 = vector.broadcast %71 : vector<49x1xf32> to vector<49x32xf32>
    %73 = arith.mulf %63, %72 : vector<49x32xf32>
    %74 = vector.broadcast %56 : vector<1x32xf32> to vector<49x32xf32>
    %75 = arith.mulf %73, %74 : vector<49x32xf32>
    %76 = vector.broadcast %57 : vector<1x32xf32> to vector<49x32xf32>
    %77 = arith.addf %75, %76 : vector<49x32xf32>
    %78 = arith.addf %6, %77 : vector<49x32xf32>
    %c0_55 = arith.constant 0 : index
    %c0_56 = arith.constant 0 : index
    %79 = vector.load %arg35[%c0_55, %c0_56] : memref<1x32xf32, #tpu.memory_space<vmem>>, vector<1x32xf32>
    %c0_57 = arith.constant 0 : index
    %c0_58 = arith.constant 0 : index
    %80 = vector.load %arg34[%c0_57, %c0_58] : memref<1x32xf32, #tpu.memory_space<vmem>>, vector<1x32xf32>
    %cst_59 = arith.constant dense<0.000000e+00> : vector<49xf32>
    %81 = vector.multi_reduction <add>, %78, %cst_59 [1] : vector<49x32xf32> to vector<49xf32>
    %82 = vector.shape_cast %81 : vector<49xf32> to vector<49x1xf32>
    %cst_60 = arith.constant 3.200000e+01 : f32
    %83 = vector.broadcast %cst_60 : f32 to vector<49x1xf32>
    %84 = arith.divf %82, %83 : vector<49x1xf32>
    %85 = vector.broadcast %84 : vector<49x1xf32> to vector<49x32xf32>
    %86 = arith.subf %78, %85 : vector<49x32xf32>
    %87 = arith.mulf %86, %86 : vector<49x32xf32>
    %cst_61 = arith.constant dense<0.000000e+00> : vector<49xf32>
    %88 = vector.multi_reduction <add>, %87, %cst_61 [1] : vector<49x32xf32> to vector<49xf32>
    %89 = vector.shape_cast %88 : vector<49xf32> to vector<49x1xf32>
    %cst_62 = arith.constant 3.200000e+01 : f32
    %90 = vector.broadcast %cst_62 : f32 to vector<49x1xf32>
    %91 = arith.divf %89, %90 : vector<49x1xf32>
    %cst_63 = arith.constant 9.99999974E-6 : f32
    %92 = vector.broadcast %cst_63 : f32 to vector<49x1xf32>
    %93 = arith.addf %91, %92 : vector<49x1xf32>
    %94 = math.rsqrt %93 : vector<49x1xf32>
    %95 = vector.broadcast %94 : vector<49x1xf32> to vector<49x32xf32>
    %96 = arith.mulf %86, %95 : vector<49x32xf32>
    %97 = vector.broadcast %79 : vector<1x32xf32> to vector<49x32xf32>
    %98 = arith.mulf %96, %97 : vector<49x32xf32>
    %99 = vector.broadcast %80 : vector<1x32xf32> to vector<49x32xf32>
    %100 = arith.addf %98, %99 : vector<49x32xf32>
    %c0_64 = arith.constant 0 : index
    %c0_65 = arith.constant 0 : index
    %101 = vector.load %arg38[%c0_64, %c0_65] : memref<32x64xf32, #tpu.memory_space<vmem>>, vector<32x64xf32>
    %c0_66 = arith.constant 0 : index
    %c0_67 = arith.constant 0 : index
    %102 = vector.load %arg36[%c0_66, %c0_67] : memref<1x64xf32, #tpu.memory_space<vmem>>, vector<1x64xf32>
    %cst_68 = arith.constant dense<0.000000e+00> : vector<49x64xf32>
    %103 = tpu.matmul %100, %101, %cst_68 {dimension_numbers = #tpu.dot_dimension_numbers<[1], [0], [0], [1], [0, 0, 1, 1], [], []>} : vector<49x32xf32>, vector<32x64xf32>, vector<49x64xf32> -> vector<49x64xf32>
    %104 = vector.broadcast %102 : vector<1x64xf32> to vector<49x64xf32>
    %105 = arith.addf %103, %104 : vector<49x64xf32>
    %cst_69 = arith.constant 0.000000e+00 : f32
    %106 = vector.broadcast %cst_69 : f32 to vector<49x64xf32>
    %107 = arith.maximumf %105, %106 : vector<49x64xf32>
    %c0_70 = arith.constant 0 : index
    %c0_71 = arith.constant 0 : index
    %108 = vector.load %arg39[%c0_70, %c0_71] : memref<64x32xf32, #tpu.memory_space<vmem>>, vector<64x32xf32>
    %c0_72 = arith.constant 0 : index
    %c0_73 = arith.constant 0 : index
    %109 = vector.load %arg37[%c0_72, %c0_73] : memref<1x32xf32, #tpu.memory_space<vmem>>, vector<1x32xf32>
    %cst_74 = arith.constant dense<0.000000e+00> : vector<49x32xf32>
    %110 = tpu.matmul %107, %108, %cst_74 {dimension_numbers = #tpu.dot_dimension_numbers<[1], [0], [0], [1], [0, 0, 1, 1], [], []>} : vector<49x64xf32>, vector<64x32xf32>, vector<49x32xf32> -> vector<49x32xf32>
    %111 = vector.broadcast %109 : vector<1x32xf32> to vector<49x32xf32>
    %112 = arith.addf %110, %111 : vector<49x32xf32>
    %113 = arith.addf %100, %112 : vector<49x32xf32>
    %c0_75 = arith.constant 0 : index
    %c0_76 = arith.constant 0 : index
    %114 = vector.load %arg47[%c0_75, %c0_76] : memref<1x32xf32, #tpu.memory_space<vmem>>, vector<1x32xf32>
    %c0_77 = arith.constant 0 : index
    %c0_78 = arith.constant 0 : index
    %115 = vector.load %arg46[%c0_77, %c0_78] : memref<1x32xf32, #tpu.memory_space<vmem>>, vector<1x32xf32>
    %cst_79 = arith.constant dense<0.000000e+00> : vector<49xf32>
    %116 = vector.multi_reduction <add>, %113, %cst_79 [1] : vector<49x32xf32> to vector<49xf32>
    %117 = vector.shape_cast %116 : vector<49xf32> to vector<49x1xf32>
    %cst_80 = arith.constant 3.200000e+01 : f32
    %118 = vector.broadcast %cst_80 : f32 to vector<49x1xf32>
    %119 = arith.divf %117, %118 : vector<49x1xf32>
    %120 = vector.broadcast %119 : vector<49x1xf32> to vector<49x32xf32>
    %121 = arith.subf %113, %120 : vector<49x32xf32>
    %122 = arith.mulf %121, %121 : vector<49x32xf32>
    %cst_81 = arith.constant dense<0.000000e+00> : vector<49xf32>
    %123 = vector.multi_reduction <add>, %122, %cst_81 [1] : vector<49x32xf32> to vector<49xf32>
    %124 = vector.shape_cast %123 : vector<49xf32> to vector<49x1xf32>
    %cst_82 = arith.constant 3.200000e+01 : f32
    %125 = vector.broadcast %cst_82 : f32 to vector<49x1xf32>
    %126 = arith.divf %124, %125 : vector<49x1xf32>
    %cst_83 = arith.constant 9.99999974E-6 : f32
    %127 = vector.broadcast %cst_83 : f32 to vector<49x1xf32>
    %128 = arith.addf %126, %127 : vector<49x1xf32>
    %129 = math.rsqrt %128 : vector<49x1xf32>
    %130 = vector.broadcast %129 : vector<49x1xf32> to vector<49x32xf32>
    %131 = arith.mulf %121, %130 : vector<49x32xf32>
    %132 = vector.broadcast %114 : vector<1x32xf32> to vector<49x32xf32>
    %133 = arith.mulf %131, %132 : vector<49x32xf32>
    %134 = vector.broadcast %115 : vector<1x32xf32> to vector<49x32xf32>
    %135 = arith.addf %133, %134 : vector<49x32xf32>
    %c0_84 = arith.constant 0 : index
    %c0_85 = arith.constant 0 : index
    %136 = vector.load %arg27[%c0_84, %c0_85] : memref<32x32xf32, #tpu.memory_space<vmem>>, vector<32x32xf32>
    %c0_86 = arith.constant 0 : index
    %c0_87 = arith.constant 0 : index
    %137 = vector.load %arg26[%c0_86, %c0_87] : memref<1x32xf32, #tpu.memory_space<vmem>>, vector<1x32xf32>
    %cst_88 = arith.constant dense<0.000000e+00> : vector<8x32xf32>
    %138 = tpu.matmul %15, %136, %cst_88 {dimension_numbers = #tpu.dot_dimension_numbers<[1], [0], [0], [1], [0, 0, 1, 1], [], []>} : vector<8x32xf32>, vector<32x32xf32>, vector<8x32xf32> -> vector<8x32xf32>
    %139 = vector.broadcast %137 : vector<1x32xf32> to vector<8x32xf32>
    %140 = arith.addf %138, %139 : vector<8x32xf32>
    %c0_89 = arith.constant 0 : index
    %c0_90 = arith.constant 0 : index
    %141 = vector.load %arg23[%c0_89, %c0_90] : memref<32x32xf32, #tpu.memory_space<vmem>>, vector<32x32xf32>
    %c0_91 = arith.constant 0 : index
    %c0_92 = arith.constant 0 : index
    %142 = vector.load %arg22[%c0_91, %c0_92] : memref<1x32xf32, #tpu.memory_space<vmem>>, vector<1x32xf32>
    %cst_93 = arith.constant dense<0.000000e+00> : vector<8x32xf32>
    %143 = tpu.matmul %15, %141, %cst_93 {dimension_numbers = #tpu.dot_dimension_numbers<[1], [0], [0], [1], [0, 0, 1, 1], [], []>} : vector<8x32xf32>, vector<32x32xf32>, vector<8x32xf32> -> vector<8x32xf32>
    %144 = vector.broadcast %142 : vector<1x32xf32> to vector<8x32xf32>
    %145 = arith.addf %143, %144 : vector<8x32xf32>
    %c0_94 = arith.constant 0 : index
    %c0_95 = arith.constant 0 : index
    %146 = vector.load %arg29[%c0_94, %c0_95] : memref<32x32xf32, #tpu.memory_space<vmem>>, vector<32x32xf32>
    %c0_96 = arith.constant 0 : index
    %c0_97 = arith.constant 0 : index
    %147 = vector.load %arg28[%c0_96, %c0_97] : memref<1x32xf32, #tpu.memory_space<vmem>>, vector<1x32xf32>
    %cst_98 = arith.constant dense<0.000000e+00> : vector<8x32xf32>
    %148 = tpu.matmul %15, %146, %cst_98 {dimension_numbers = #tpu.dot_dimension_numbers<[1], [0], [0], [1], [0, 0, 1, 1], [], []>} : vector<8x32xf32>, vector<32x32xf32>, vector<8x32xf32> -> vector<8x32xf32>
    %149 = vector.broadcast %147 : vector<1x32xf32> to vector<8x32xf32>
    %150 = arith.addf %148, %149 : vector<8x32xf32>
    %cst_99 = arith.constant 0.176776692 : f32
    %151 = vector.broadcast %cst_99 : f32 to vector<8x32xf32>
    %152 = arith.mulf %140, %151 : vector<8x32xf32>
    %cst_100 = arith.constant dense<0.000000e+00> : vector<8x8xf32>
    %153 = tpu.matmul %152, %145, %cst_100 {dimension_numbers = #tpu.dot_dimension_numbers<[1], [1], [0], [0], [0, 0, 1, 0], [], []>} : vector<8x32xf32>, vector<8x32xf32>, vector<8x8xf32> -> vector<8x8xf32>
    %cst_101 = arith.constant dense<0xFF800000> : vector<8xf32>
    %154 = vector.multi_reduction <maximumf>, %153, %cst_101 [1] : vector<8x8xf32> to vector<8xf32>
    %155 = vector.shape_cast %154 : vector<8xf32> to vector<8x1xf32>
    %156 = vector.broadcast %155 : vector<8x1xf32> to vector<8x8xf32>
    %157 = arith.subf %153, %156 : vector<8x8xf32>
    %158 = math.exp %157 : vector<8x8xf32>
    %cst_102 = arith.constant dense<0.000000e+00> : vector<8xf32>
    %159 = vector.multi_reduction <add>, %158, %cst_102 [1] : vector<8x8xf32> to vector<8xf32>
    %160 = vector.shape_cast %159 : vector<8xf32> to vector<8x1xf32>
    %161 = tpu.reciprocal %160 {approx = true} : vector<8x1xf32> -> vector<8x1xf32>
    %162 = vector.broadcast %161 : vector<8x1xf32> to vector<8x8xf32>
    %163 = arith.mulf %158, %162 : vector<8x8xf32>
    %cst_103 = arith.constant dense<0.000000e+00> : vector<8x32xf32>
    %164 = tpu.matmul %163, %150, %cst_103 {dimension_numbers = #tpu.dot_dimension_numbers<[1], [0], [0], [1], [0, 0, 1, 1], [], []>} : vector<8x8xf32>, vector<8x32xf32>, vector<8x32xf32> -> vector<8x32xf32>
    %c0_104 = arith.constant 0 : index
    %c0_105 = arith.constant 0 : index
    %165 = vector.load %arg25[%c0_104, %c0_105] : memref<32x32xf32, #tpu.memory_space<vmem>>, vector<32x32xf32>
    %c0_106 = arith.constant 0 : index
    %c0_107 = arith.constant 0 : index
    %166 = vector.load %arg24[%c0_106, %c0_107] : memref<1x32xf32, #tpu.memory_space<vmem>>, vector<1x32xf32>
    %cst_108 = arith.constant dense<0.000000e+00> : vector<8x32xf32>
    %167 = tpu.matmul %164, %165, %cst_108 {dimension_numbers = #tpu.dot_dimension_numbers<[1], [0], [0], [1], [0, 0, 1, 1], [], []>} : vector<8x32xf32>, vector<32x32xf32>, vector<8x32xf32> -> vector<8x32xf32>
    %168 = vector.broadcast %166 : vector<1x32xf32> to vector<8x32xf32>
    %169 = arith.addf %167, %168 : vector<8x32xf32>
    %170 = arith.addf %15, %169 : vector<8x32xf32>
    %c0_109 = arith.constant 0 : index
    %c0_110 = arith.constant 0 : index
    %171 = vector.load %arg17[%c0_109, %c0_110] : memref<1x32xf32, #tpu.memory_space<vmem>>, vector<1x32xf32>
    %c0_111 = arith.constant 0 : index
    %c0_112 = arith.constant 0 : index
    %172 = vector.load %arg16[%c0_111, %c0_112] : memref<1x32xf32, #tpu.memory_space<vmem>>, vector<1x32xf32>
    %cst_113 = arith.constant dense<0.000000e+00> : vector<8xf32>
    %173 = vector.multi_reduction <add>, %170, %cst_113 [1] : vector<8x32xf32> to vector<8xf32>
    %174 = vector.shape_cast %173 : vector<8xf32> to vector<8x1xf32>
    %cst_114 = arith.constant 3.200000e+01 : f32
    %175 = vector.broadcast %cst_114 : f32 to vector<8x1xf32>
    %176 = arith.divf %174, %175 : vector<8x1xf32>
    %177 = vector.broadcast %176 : vector<8x1xf32> to vector<8x32xf32>
    %178 = arith.subf %170, %177 : vector<8x32xf32>
    %179 = arith.mulf %178, %178 : vector<8x32xf32>
    %cst_115 = arith.constant dense<0.000000e+00> : vector<8xf32>
    %180 = vector.multi_reduction <add>, %179, %cst_115 [1] : vector<8x32xf32> to vector<8xf32>
    %181 = vector.shape_cast %180 : vector<8xf32> to vector<8x1xf32>
    %cst_116 = arith.constant 3.200000e+01 : f32
    %182 = vector.broadcast %cst_116 : f32 to vector<8x1xf32>
    %183 = arith.divf %181, %182 : vector<8x1xf32>
    %cst_117 = arith.constant 9.99999974E-6 : f32
    %184 = vector.broadcast %cst_117 : f32 to vector<8x1xf32>
    %185 = arith.addf %183, %184 : vector<8x1xf32>
    %186 = math.rsqrt %185 : vector<8x1xf32>
    %187 = vector.broadcast %186 : vector<8x1xf32> to vector<8x32xf32>
    %188 = arith.mulf %178, %187 : vector<8x32xf32>
    %189 = vector.broadcast %171 : vector<1x32xf32> to vector<8x32xf32>
    %190 = arith.mulf %188, %189 : vector<8x32xf32>
    %191 = vector.broadcast %172 : vector<1x32xf32> to vector<8x32xf32>
    %192 = arith.addf %190, %191 : vector<8x32xf32>
    %c0_118 = arith.constant 0 : index
    %c0_119 = arith.constant 0 : index
    %193 = vector.load %arg9[%c0_118, %c0_119] : memref<32x32xf32, #tpu.memory_space<vmem>>, vector<32x32xf32>
    %c0_120 = arith.constant 0 : index
    %c0_121 = arith.constant 0 : index
    %194 = vector.load %arg8[%c0_120, %c0_121] : memref<1x32xf32, #tpu.memory_space<vmem>>, vector<1x32xf32>
    %cst_122 = arith.constant dense<0.000000e+00> : vector<8x32xf32>
    %195 = tpu.matmul %192, %193, %cst_122 {dimension_numbers = #tpu.dot_dimension_numbers<[1], [0], [0], [1], [0, 0, 1, 1], [], []>} : vector<8x32xf32>, vector<32x32xf32>, vector<8x32xf32> -> vector<8x32xf32>
    %196 = vector.broadcast %194 : vector<1x32xf32> to vector<8x32xf32>
    %197 = arith.addf %195, %196 : vector<8x32xf32>
    %c0_123 = arith.constant 0 : index
    %c0_124 = arith.constant 0 : index
    %198 = vector.load %arg5[%c0_123, %c0_124] : memref<32x32xf32, #tpu.memory_space<vmem>>, vector<32x32xf32>
    %c0_125 = arith.constant 0 : index
    %c0_126 = arith.constant 0 : index
    %199 = vector.load %arg4[%c0_125, %c0_126] : memref<1x32xf32, #tpu.memory_space<vmem>>, vector<1x32xf32>
    %cst_127 = arith.constant dense<0.000000e+00> : vector<49x32xf32>
    %200 = tpu.matmul %135, %198, %cst_127 {dimension_numbers = #tpu.dot_dimension_numbers<[1], [0], [0], [1], [0, 0, 1, 1], [], []>} : vector<49x32xf32>, vector<32x32xf32>, vector<49x32xf32> -> vector<49x32xf32>
    %201 = vector.broadcast %199 : vector<1x32xf32> to vector<49x32xf32>
    %202 = arith.addf %200, %201 : vector<49x32xf32>
    %c0_128 = arith.constant 0 : index
    %c0_129 = arith.constant 0 : index
    %203 = vector.load %arg11[%c0_128, %c0_129] : memref<32x32xf32, #tpu.memory_space<vmem>>, vector<32x32xf32>
    %c0_130 = arith.constant 0 : index
    %c0_131 = arith.constant 0 : index
    %204 = vector.load %arg10[%c0_130, %c0_131] : memref<1x32xf32, #tpu.memory_space<vmem>>, vector<1x32xf32>
    %cst_132 = arith.constant dense<0.000000e+00> : vector<49x32xf32>
    %205 = tpu.matmul %135, %203, %cst_132 {dimension_numbers = #tpu.dot_dimension_numbers<[1], [0], [0], [1], [0, 0, 1, 1], [], []>} : vector<49x32xf32>, vector<32x32xf32>, vector<49x32xf32> -> vector<49x32xf32>
    %206 = vector.broadcast %204 : vector<1x32xf32> to vector<49x32xf32>
    %207 = arith.addf %205, %206 : vector<49x32xf32>
    %cst_133 = arith.constant 0.176776692 : f32
    %208 = vector.broadcast %cst_133 : f32 to vector<8x32xf32>
    %209 = arith.mulf %197, %208 : vector<8x32xf32>
    %cst_134 = arith.constant dense<0.000000e+00> : vector<8x49xf32>
    %210 = tpu.matmul %209, %202, %cst_134 {dimension_numbers = #tpu.dot_dimension_numbers<[1], [1], [0], [0], [0, 0, 1, 0], [], []>} : vector<8x32xf32>, vector<49x32xf32>, vector<8x49xf32> -> vector<8x49xf32>
    %cst_135 = arith.constant dense<0xFF800000> : vector<8xf32>
    %211 = vector.multi_reduction <maximumf>, %210, %cst_135 [1] : vector<8x49xf32> to vector<8xf32>
    %212 = vector.shape_cast %211 : vector<8xf32> to vector<8x1xf32>
    %213 = vector.broadcast %212 : vector<8x1xf32> to vector<8x49xf32>
    %214 = arith.subf %210, %213 : vector<8x49xf32>
    %215 = math.exp %214 : vector<8x49xf32>
    %cst_136 = arith.constant dense<0.000000e+00> : vector<8xf32>
    %216 = vector.multi_reduction <add>, %215, %cst_136 [1] : vector<8x49xf32> to vector<8xf32>
    %217 = vector.shape_cast %216 : vector<8xf32> to vector<8x1xf32>
    %218 = tpu.reciprocal %217 {approx = true} : vector<8x1xf32> -> vector<8x1xf32>
    %219 = vector.broadcast %218 : vector<8x1xf32> to vector<8x49xf32>
    %220 = arith.mulf %215, %219 : vector<8x49xf32>
    %cst_137 = arith.constant dense<0.000000e+00> : vector<8x32xf32>
    %221 = tpu.matmul %220, %207, %cst_137 {dimension_numbers = #tpu.dot_dimension_numbers<[1], [0], [0], [1], [0, 0, 1, 1], [], []>} : vector<8x49xf32>, vector<49x32xf32>, vector<8x32xf32> -> vector<8x32xf32>
    %c0_138 = arith.constant 0 : index
    %c0_139 = arith.constant 0 : index
    %222 = vector.load %arg7[%c0_138, %c0_139] : memref<32x32xf32, #tpu.memory_space<vmem>>, vector<32x32xf32>
    %c0_140 = arith.constant 0 : index
    %c0_141 = arith.constant 0 : index
    %223 = vector.load %arg6[%c0_140, %c0_141] : memref<1x32xf32, #tpu.memory_space<vmem>>, vector<1x32xf32>
    %cst_142 = arith.constant dense<0.000000e+00> : vector<8x32xf32>
    %224 = tpu.matmul %221, %222, %cst_142 {dimension_numbers = #tpu.dot_dimension_numbers<[1], [0], [0], [1], [0, 0, 1, 1], [], []>} : vector<8x32xf32>, vector<32x32xf32>, vector<8x32xf32> -> vector<8x32xf32>
    %225 = vector.broadcast %223 : vector<1x32xf32> to vector<8x32xf32>
    %226 = arith.addf %224, %225 : vector<8x32xf32>
    %227 = arith.addf %192, %226 : vector<8x32xf32>
    %c0_143 = arith.constant 0 : index
    %c0_144 = arith.constant 0 : index
    %228 = vector.load %arg19[%c0_143, %c0_144] : memref<1x32xf32, #tpu.memory_space<vmem>>, vector<1x32xf32>
    %c0_145 = arith.constant 0 : index
    %c0_146 = arith.constant 0 : index
    %229 = vector.load %arg18[%c0_145, %c0_146] : memref<1x32xf32, #tpu.memory_space<vmem>>, vector<1x32xf32>
    %cst_147 = arith.constant dense<0.000000e+00> : vector<8xf32>
    %230 = vector.multi_reduction <add>, %227, %cst_147 [1] : vector<8x32xf32> to vector<8xf32>
    %231 = vector.shape_cast %230 : vector<8xf32> to vector<8x1xf32>
    %cst_148 = arith.constant 3.200000e+01 : f32
    %232 = vector.broadcast %cst_148 : f32 to vector<8x1xf32>
    %233 = arith.divf %231, %232 : vector<8x1xf32>
    %234 = vector.broadcast %233 : vector<8x1xf32> to vector<8x32xf32>
    %235 = arith.subf %227, %234 : vector<8x32xf32>
    %236 = arith.mulf %235, %235 : vector<8x32xf32>
    %cst_149 = arith.constant dense<0.000000e+00> : vector<8xf32>
    %237 = vector.multi_reduction <add>, %236, %cst_149 [1] : vector<8x32xf32> to vector<8xf32>
    %238 = vector.shape_cast %237 : vector<8xf32> to vector<8x1xf32>
    %cst_150 = arith.constant 3.200000e+01 : f32
    %239 = vector.broadcast %cst_150 : f32 to vector<8x1xf32>
    %240 = arith.divf %238, %239 : vector<8x1xf32>
    %cst_151 = arith.constant 9.99999974E-6 : f32
    %241 = vector.broadcast %cst_151 : f32 to vector<8x1xf32>
    %242 = arith.addf %240, %241 : vector<8x1xf32>
    %243 = math.rsqrt %242 : vector<8x1xf32>
    %244 = vector.broadcast %243 : vector<8x1xf32> to vector<8x32xf32>
    %245 = arith.mulf %235, %244 : vector<8x32xf32>
    %246 = vector.broadcast %228 : vector<1x32xf32> to vector<8x32xf32>
    %247 = arith.mulf %245, %246 : vector<8x32xf32>
    %248 = vector.broadcast %229 : vector<1x32xf32> to vector<8x32xf32>
    %249 = arith.addf %247, %248 : vector<8x32xf32>
    %c0_152 = arith.constant 0 : index
    %c0_153 = arith.constant 0 : index
    %250 = vector.load %arg13[%c0_152, %c0_153] : memref<32x64xf32, #tpu.memory_space<vmem>>, vector<32x64xf32>
    %c0_154 = arith.constant 0 : index
    %c0_155 = arith.constant 0 : index
    %251 = vector.load %arg12[%c0_154, %c0_155] : memref<1x64xf32, #tpu.memory_space<vmem>>, vector<1x64xf32>
    %cst_156 = arith.constant dense<0.000000e+00> : vector<8x64xf32>
    %252 = tpu.matmul %249, %250, %cst_156 {dimension_numbers = #tpu.dot_dimension_numbers<[1], [0], [0], [1], [0, 0, 1, 1], [], []>} : vector<8x32xf32>, vector<32x64xf32>, vector<8x64xf32> -> vector<8x64xf32>
    %253 = vector.broadcast %251 : vector<1x64xf32> to vector<8x64xf32>
    %254 = arith.addf %252, %253 : vector<8x64xf32>
    %cst_157 = arith.constant 0.000000e+00 : f32
    %255 = vector.broadcast %cst_157 : f32 to vector<8x64xf32>
    %256 = arith.maximumf %254, %255 : vector<8x64xf32>
    %c0_158 = arith.constant 0 : index
    %c0_159 = arith.constant 0 : index
    %257 = vector.load %arg15[%c0_158, %c0_159] : memref<64x32xf32, #tpu.memory_space<vmem>>, vector<64x32xf32>
    %c0_160 = arith.constant 0 : index
    %c0_161 = arith.constant 0 : index
    %258 = vector.load %arg14[%c0_160, %c0_161] : memref<1x32xf32, #tpu.memory_space<vmem>>, vector<1x32xf32>
    %cst_162 = arith.constant dense<0.000000e+00> : vector<8x32xf32>
    %259 = tpu.matmul %256, %257, %cst_162 {dimension_numbers = #tpu.dot_dimension_numbers<[1], [0], [0], [1], [0, 0, 1, 1], [], []>} : vector<8x64xf32>, vector<64x32xf32>, vector<8x32xf32> -> vector<8x32xf32>
    %260 = vector.broadcast %258 : vector<1x32xf32> to vector<8x32xf32>
    %261 = arith.addf %259, %260 : vector<8x32xf32>
    %262 = arith.addf %249, %261 : vector<8x32xf32>
    %c0_163 = arith.constant 0 : index
    %c0_164 = arith.constant 0 : index
    %263 = vector.load %arg21[%c0_163, %c0_164] : memref<1x32xf32, #tpu.memory_space<vmem>>, vector<1x32xf32>
    %c0_165 = arith.constant 0 : index
    %c0_166 = arith.constant 0 : index
    %264 = vector.load %arg20[%c0_165, %c0_166] : memref<1x32xf32, #tpu.memory_space<vmem>>, vector<1x32xf32>
    %cst_167 = arith.constant dense<0.000000e+00> : vector<8xf32>
    %265 = vector.multi_reduction <add>, %262, %cst_167 [1] : vector<8x32xf32> to vector<8xf32>
    %266 = vector.shape_cast %265 : vector<8xf32> to vector<8x1xf32>
    %cst_168 = arith.constant 3.200000e+01 : f32
    %267 = vector.broadcast %cst_168 : f32 to vector<8x1xf32>
    %268 = arith.divf %266, %267 : vector<8x1xf32>
    %269 = vector.broadcast %268 : vector<8x1xf32> to vector<8x32xf32>
    %270 = arith.subf %262, %269 : vector<8x32xf32>
    %271 = arith.mulf %270, %270 : vector<8x32xf32>
    %cst_169 = arith.constant dense<0.000000e+00> : vector<8xf32>
    %272 = vector.multi_reduction <add>, %271, %cst_169 [1] : vector<8x32xf32> to vector<8xf32>
    %273 = vector.shape_cast %272 : vector<8xf32> to vector<8x1xf32>
    %cst_170 = arith.constant 3.200000e+01 : f32
    %274 = vector.broadcast %cst_170 : f32 to vector<8x1xf32>
    %275 = arith.divf %273, %274 : vector<8x1xf32>
    %cst_171 = arith.constant 9.99999974E-6 : f32
    %276 = vector.broadcast %cst_171 : f32 to vector<8x1xf32>
    %277 = arith.addf %275, %276 : vector<8x1xf32>
    %278 = math.rsqrt %277 : vector<8x1xf32>
    %279 = vector.broadcast %278 : vector<8x1xf32> to vector<8x32xf32>
    %280 = arith.mulf %270, %279 : vector<8x32xf32>
    %281 = vector.broadcast %263 : vector<1x32xf32> to vector<8x32xf32>
    %282 = arith.mulf %280, %281 : vector<8x32xf32>
    %283 = vector.broadcast %264 : vector<1x32xf32> to vector<8x32xf32>
    %284 = arith.addf %282, %283 : vector<8x32xf32>
    %c0_172 = arith.constant 0 : index
    %c0_173 = arith.constant 0 : index
    %c0_174 = arith.constant 0 : index
    %285 = vector.load %arg52[%c0_172, %c0_173, %c0_174] : memref<1x8x32xf32, #tpu.memory_space<vmem>>, vector<1x8x32xf32>
    %286 = vector.shape_cast %285 : vector<1x8x32xf32> to vector<8x32xf32>
    %287 = vector.shape_cast %284 : vector<8x32xf32> to vector<1x8x32xf32>
    tpu.vector_store %arg52[%c0_172, %c0_173, %c0_174], %287 {strides = array<i32>} : memref<1x8x32xf32, #tpu.memory_space<vmem>>, vector<1x8x32xf32>,
    return
  }
  func.func @transform_0(%arg0: i32) -> (i32, i32, i32) {
    %c0_i32 = arith.constant 0 : i32
    %c0_i32_0 = arith.constant 0 : i32
    %c0_i32_1 = arith.constant 0 : i32
    return %arg0, %c0_i32, %c0_i32_0 : i32, i32, i32
  }
  func.func @transform_1(%arg0: i32) -> (i32, i32) {
    %c0_i32 = arith.constant 0 : i32
    %c0_i32_0 = arith.constant 0 : i32
    %c0_i32_1 = arith.constant 0 : i32
    return %c0_i32, %c0_i32_0 : i32, i32
  }
  func.func @transform_2(%arg0: i32) -> (i32, i32) {
    %c0_i32 = arith.constant 0 : i32
    %c0_i32_0 = arith.constant 0 : i32
    %c0_i32_1 = arith.constant 0 : i32
    return %c0_i32, %c0_i32_0 : i32, i32
  }
  func.func @transform_3(%arg0: i32) -> (i32, i32) {
    %c0_i32 = arith.constant 0 : i32
    %c0_i32_0 = arith.constant 0 : i32
    %c0_i32_1 = arith.constant 0 : i32
    return %c0_i32, %c0_i32_0 : i32, i32
  }
  func.func @transform_4(%arg0: i32) -> (i32, i32) {
    %c0_i32 = arith.constant 0 : i32
    %c0_i32_0 = arith.constant 0 : i32
    %c0_i32_1 = arith.constant 0 : i32
    return %c0_i32, %c0_i32_0 : i32, i32
  }
  func.func @transform_5(%arg0: i32) -> (i32, i32) {
    %c0_i32 = arith.constant 0 : i32
    %c0_i32_0 = arith.constant 0 : i32
    %c0_i32_1 = arith.constant 0 : i32
    return %c0_i32, %c0_i32_0 : i32, i32
  }
  func.func @transform_6(%arg0: i32) -> (i32, i32) {
    %c0_i32 = arith.constant 0 : i32
    %c0_i32_0 = arith.constant 0 : i32
    %c0_i32_1 = arith.constant 0 : i32
    return %c0_i32, %c0_i32_0 : i32, i32
  }
  func.func @transform_7(%arg0: i32) -> (i32, i32) {
    %c0_i32 = arith.constant 0 : i32
    %c0_i32_0 = arith.constant 0 : i32
    %c0_i32_1 = arith.constant 0 : i32
    return %c0_i32, %c0_i32_0 : i32, i32
  }
  func.func @transform_8(%arg0: i32) -> (i32, i32) {
    %c0_i32 = arith.constant 0 : i32
    %c0_i32_0 = arith.constant 0 : i32
    %c0_i32_1 = arith.constant 0 : i32
    return %c0_i32, %c0_i32_0 : i32, i32
  }
  func.func @transform_9(%arg0: i32) -> (i32, i32) {
    %c0_i32 = arith.constant 0 : i32
    %c0_i32_0 = arith.constant 0 : i32
    %c0_i32_1 = arith.constant 0 : i32
    return %c0_i32, %c0_i32_0 : i32, i32
  }
  func.func @transform_10(%arg0: i32) -> (i32, i32) {
    %c0_i32 = arith.constant 0 : i32
    %c0_i32_0 = arith.constant 0 : i32
    %c0_i32_1 = arith.constant 0 : i32
    return %c0_i32, %c0_i32_0 : i32, i32
  }
  func.func @transform_11(%arg0: i32) -> (i32, i32) {
    %c0_i32 = arith.constant 0 : i32
    %c0_i32_0 = arith.constant 0 : i32
    %c0_i32_1 = arith.constant 0 : i32
    return %c0_i32, %c0_i32_0 : i32, i32
  }
  func.func @transform_12(%arg0: i32) -> (i32, i32) {
    %c0_i32 = arith.constant 0 : i32
    %c0_i32_0 = arith.constant 0 : i32
    %c0_i32_1 = arith.constant 0 : i32
    return %c0_i32, %c0_i32_0 : i32, i32
  }
  func.func @transform_13(%arg0: i32) -> (i32, i32) {
    %c0_i32 = arith.constant 0 : i32
    %c0_i32_0 = arith.constant 0 : i32
    %c0_i32_1 = arith.constant 0 : i32
    return %c0_i32, %c0_i32_0 : i32, i32
  }
  func.func @transform_14(%arg0: i32) -> (i32, i32) {
    %c0_i32 = arith.constant 0 : i32
    %c0_i32_0 = arith.constant 0 : i32
    %c0_i32_1 = arith.constant 0 : i32
    return %c0_i32, %c0_i32_0 : i32, i32
  }
  func.func @transform_15(%arg0: i32) -> (i32, i32) {
    %c0_i32 = arith.constant 0 : i32
    %c0_i32_0 = arith.constant 0 : i32
    %c0_i32_1 = arith.constant 0 : i32
    return %c0_i32, %c0_i32_0 : i32, i32
  }
  func.func @transform_16(%arg0: i32) -> (i32, i32) {
    %c0_i32 = arith.constant 0 : i32
    %c0_i32_0 = arith.constant 0 : i32
    %c0_i32_1 = arith.constant 0 : i32
    return %c0_i32, %c0_i32_0 : i32, i32
  }
  func.func @transform_17(%arg0: i32) -> (i32, i32) {
    %c0_i32 = arith.constant 0 : i32
    %c0_i32_0 = arith.constant 0 : i32
    %c0_i32_1 = arith.constant 0 : i32
    return %c0_i32, %c0_i32_0 : i32, i32
  }
  func.func @transform_18(%arg0: i32) -> (i32, i32) {
    %c0_i32 = arith.constant 0 : i32
    %c0_i32_0 = arith.constant 0 : i32
    %c0_i32_1 = arith.constant 0 : i32
    return %c0_i32, %c0_i32_0 : i32, i32
  }
  func.func @transform_19(%arg0: i32) -> (i32, i32) {
    %c0_i32 = arith.constant 0 : i32
    %c0_i32_0 = arith.constant 0 : i32
    %c0_i32_1 = arith.constant 0 : i32
    return %c0_i32, %c0_i32_0 : i32, i32
  }
  func.func @transform_20(%arg0: i32) -> (i32, i32) {
    %c0_i32 = arith.constant 0 : i32
    %c0_i32_0 = arith.constant 0 : i32
    %c0_i32_1 = arith.constant 0 : i32
    return %c0_i32, %c0_i32_0 : i32, i32
  }
  func.func @transform_21(%arg0: i32) -> (i32, i32) {
    %c0_i32 = arith.constant 0 : i32
    %c0_i32_0 = arith.constant 0 : i32
    %c0_i32_1 = arith.constant 0 : i32
    return %c0_i32, %c0_i32_0 : i32, i32
  }
  func.func @transform_22(%arg0: i32) -> (i32, i32) {
    %c0_i32 = arith.constant 0 : i32
    %c0_i32_0 = arith.constant 0 : i32
    %c0_i32_1 = arith.constant 0 : i32
    return %c0_i32, %c0_i32_0 : i32, i32
  }
  func.func @transform_23(%arg0: i32) -> (i32, i32) {
    %c0_i32 = arith.constant 0 : i32
    %c0_i32_0 = arith.constant 0 : i32
    %c0_i32_1 = arith.constant 0 : i32
    return %c0_i32, %c0_i32_0 : i32, i32
  }
  func.func @transform_24(%arg0: i32) -> (i32, i32) {
    %c0_i32 = arith.constant 0 : i32
    %c0_i32_0 = arith.constant 0 : i32
    %c0_i32_1 = arith.constant 0 : i32
    return %c0_i32, %c0_i32_0 : i32, i32
  }
  func.func @transform_25(%arg0: i32) -> (i32, i32) {
    %c0_i32 = arith.constant 0 : i32
    %c0_i32_0 = arith.constant 0 : i32
    %c0_i32_1 = arith.constant 0 : i32
    return %c0_i32, %c0_i32_0 : i32, i32
  }
  func.func @transform_26(%arg0: i32) -> (i32, i32) {
    %c0_i32 = arith.constant 0 : i32
    %c0_i32_0 = arith.constant 0 : i32
    %c0_i32_1 = arith.constant 0 : i32
    return %c0_i32, %c0_i32_0 : i32, i32
  }
  func.func @transform_27(%arg0: i32) -> (i32, i32) {
    %c0_i32 = arith.constant 0 : i32
    %c0_i32_0 = arith.constant 0 : i32
    %c0_i32_1 = arith.constant 0 : i32
    return %c0_i32, %c0_i32_0 : i32, i32
  }
  func.func @transform_28(%arg0: i32) -> (i32, i32) {
    %c0_i32 = arith.constant 0 : i32
    %c0_i32_0 = arith.constant 0 : i32
    %c0_i32_1 = arith.constant 0 : i32
    return %c0_i32, %c0_i32_0 : i32, i32
  }
  func.func @transform_29(%arg0: i32) -> (i32, i32) {
    %c0_i32 = arith.constant 0 : i32
    %c0_i32_0 = arith.constant 0 : i32
    %c0_i32_1 = arith.constant 0 : i32
    return %c0_i32, %c0_i32_0 : i32, i32
  }
  func.func @transform_30(%arg0: i32) -> (i32, i32) {
    %c0_i32 = arith.constant 0 : i32
    %c0_i32_0 = arith.constant 0 : i32
    %c0_i32_1 = arith.constant 0 : i32
    return %c0_i32, %c0_i32_0 : i32, i32
  }
  func.func @transform_31(%arg0: i32) -> (i32, i32) {
    %c0_i32 = arith.constant 0 : i32
    %c0_i32_0 = arith.constant 0 : i32
    %c0_i32_1 = arith.constant 0 : i32
    return %c0_i32, %c0_i32_0 : i32, i32
  }
  func.func @transform_32(%arg0: i32) -> (i32, i32) {
    %c0_i32 = arith.constant 0 : i32
    %c0_i32_0 = arith.constant 0 : i32
    %c0_i32_1 = arith.constant 0 : i32
    return %c0_i32, %c0_i32_0 : i32, i32
  }
  func.func @transform_33(%arg0: i32) -> (i32, i32) {
    %c0_i32 = arith.constant 0 : i32
    %c0_i32_0 = arith.constant 0 : i32
    %c0_i32_1 = arith.constant 0 : i32
    return %c0_i32, %c0_i32_0 : i32, i32
  }
  func.func @transform_34(%arg0: i32) -> (i32, i32) {
    %c0_i32 = arith.constant 0 : i32
    %c0_i32_0 = arith.constant 0 : i32
    %c0_i32_1 = arith.constant 0 : i32
    return %c0_i32, %c0_i32_0 : i32, i32
  }
  func.func @transform_35(%arg0: i32) -> (i32, i32) {
    %c0_i32 = arith.constant 0 : i32
    %c0_i32_0 = arith.constant 0 : i32
    %c0_i32_1 = arith.constant 0 : i32
    return %c0_i32, %c0_i32_0 : i32, i32
  }
  func.func @transform_36(%arg0: i32) -> (i32, i32) {
    %c0_i32 = arith.constant 0 : i32
    %c0_i32_0 = arith.constant 0 : i32
    %c0_i32_1 = arith.constant 0 : i32
    return %c0_i32, %c0_i32_0 : i32, i32
  }
  func.func @transform_37(%arg0: i32) -> (i32, i32) {
    %c0_i32 = arith.constant 0 : i32
    %c0_i32_0 = arith.constant 0 : i32
    %c0_i32_1 = arith.constant 0 : i32
    return %c0_i32, %c0_i32_0 : i32, i32
  }
  func.func @transform_38(%arg0: i32) -> (i32, i32) {
    %c0_i32 = arith.constant 0 : i32
    %c0_i32_0 = arith.constant 0 : i32
    %c0_i32_1 = arith.constant 0 : i32
    return %c0_i32, %c0_i32_0 : i32, i32
  }
  func.func @transform_39(%arg0: i32) -> (i32, i32) {
    %c0_i32 = arith.constant 0 : i32
    %c0_i32_0 = arith.constant 0 : i32
    %c0_i32_1 = arith.constant 0 : i32
    return %c0_i32, %c0_i32_0 : i32, i32
  }
  func.func @transform_40(%arg0: i32) -> (i32, i32) {
    %c0_i32 = arith.constant 0 : i32
    %c0_i32_0 = arith.constant 0 : i32
    %c0_i32_1 = arith.constant 0 : i32
    return %c0_i32, %c0_i32_0 : i32, i32
  }
  func.func @transform_41(%arg0: i32) -> (i32, i32) {
    %c0_i32 = arith.constant 0 : i32
    %c0_i32_0 = arith.constant 0 : i32
    %c0_i32_1 = arith.constant 0 : i32
    return %c0_i32, %c0_i32_0 : i32, i32
  }
  func.func @transform_42(%arg0: i32) -> (i32, i32) {
    %c0_i32 = arith.constant 0 : i32
    %c0_i32_0 = arith.constant 0 : i32
    %c0_i32_1 = arith.constant 0 : i32
    return %c0_i32, %c0_i32_0 : i32, i32
  }
  func.func @transform_43(%arg0: i32) -> (i32, i32) {
    %c0_i32 = arith.constant 0 : i32
    %c0_i32_0 = arith.constant 0 : i32
    %c0_i32_1 = arith.constant 0 : i32
    return %c0_i32, %c0_i32_0 : i32, i32
  }
  func.func @transform_44(%arg0: i32) -> (i32, i32) {
    %c0_i32 = arith.constant 0 : i32
    %c0_i32_0 = arith.constant 0 : i32
    %c0_i32_1 = arith.constant 0 : i32
    return %c0_i32, %c0_i32_0 : i32, i32
  }
  func.func @transform_45(%arg0: i32) -> (i32, i32) {
    %c0_i32 = arith.constant 0 : i32
    %c0_i32_0 = arith.constant 0 : i32
    %c0_i32_1 = arith.constant 0 : i32
    return %c0_i32, %c0_i32_0 : i32, i32
  }
  func.func @transform_46(%arg0: i32) -> (i32, i32) {
    %c0_i32 = arith.constant 0 : i32
    %c0_i32_0 = arith.constant 0 : i32
    %c0_i32_1 = arith.constant 0 : i32
    return %c0_i32, %c0_i32_0 : i32, i32
  }
  func.func @transform_47(%arg0: i32) -> (i32, i32) {
    %c0_i32 = arith.constant 0 : i32
    %c0_i32_0 = arith.constant 0 : i32
    %c0_i32_1 = arith.constant 0 : i32
    return %c0_i32, %c0_i32_0 : i32, i32
  }
  func.func @transform_48(%arg0: i32) -> (i32, i32) {
    %c0_i32 = arith.constant 0 : i32
    %c0_i32_0 = arith.constant 0 : i32
    %c0_i32_1 = arith.constant 0 : i32
    return %c0_i32, %c0_i32_0 : i32, i32
  }
  func.func @transform_49(%arg0: i32) -> (i32, i32) {
    %c0_i32 = arith.constant 0 : i32
    %c0_i32_0 = arith.constant 0 : i32
    %c0_i32_1 = arith.constant 0 : i32
    return %c0_i32, %c0_i32_0 : i32, i32
  }
  func.func @transform_50(%arg0: i32) -> (i32, i32) {
    %c0_i32 = arith.constant 0 : i32
    %c0_i32_0 = arith.constant 0 : i32
    %c0_i32_1 = arith.constant 0 : i32
    return %c0_i32, %c0_i32_0 : i32, i32
  }
  func.func @transform_51(%arg0: i32) -> (i32, i32, i32) {
    %c0_i32 = arith.constant 0 : i32
    %c0_i32_0 = arith.constant 0 : i32
    %c0_i32_1 = arith.constant 0 : i32
    return %arg0, %c0_i32, %c0_i32_0 : i32, i32, i32
  }
  func.func @transform_52(%arg0: i32) -> (i32, i32, i32) {
    %c0_i32 = arith.constant 0 : i32
    %c0_i32_0 = arith.constant 0 : i32
    %c0_i32_1 = arith.constant 0 : i32
    return %arg0, %c0_i32, %c0_i32_0 : i32, i32, i32
  }
  func.func @transform_53(%arg0: i32) -> (i32, i32, i32) {
    %c0_i32 = arith.constant 0 : i32
    %c0_i32_0 = arith.constant 0 : i32
    %c0_i32_1 = arith.constant 0 : i32
    return %arg0, %c0_i32, %c0_i32_0 : i32, i32, i32
  }
}

</mosaic_0001>

<bundles_post_ra>
// kernel: transformer_forward.1
= control target key start
LH: loop header
LB: loop body
LE: loop exit
PB: predicated region body
PF: predicated region fallthrough
CT: control target
= control target key end

     0   :  { %s4879_s6 = smov 1   ;;  %s4880_s10 = smov 2   ;;  %s6128_s0 = inlined_call_operand.smem [shape: u32[54], index: -1, kind: input, shape index: {}] }
   0x1   :  { %s4952_s5 = sld [smem:[%s6128_s0]]   ;;  %s4881_s14 = smov 3  }
   0x2   :  { %s4957_s9 = sld [smem:[%s6128_s0 + %s4879_s6]]   ;;  %s4882_s18 = smov 4  }
   0x3   :  { %s4962_s13 = sld [smem:[%s6128_s0 + %s4880_s10]]   ;;  %s4883_s22 = smov 5  }
   0x4   :  { %s4967_s17 = sld [smem:[%s6128_s0 + %s4881_s14]]   ;;  %s4884_s26 = smov 6  }
   0x5   :  { %s4972_s21 = sld [smem:[%s6128_s0 + %s4882_s18]]   ;;  %s4885_s30 = smov 7  }
   0x6   :  { %s4977_s25 = sld [smem:[%s6128_s0 + %s4883_s22]]   ;;  %s4886_s4 = smov 8  }
   0x7   :  { %6172 = sst [smem:[#allocation31_spill]] %s4952_s5  ;;  %s4887_s10 = smov 9  }
   0x8   :  { %6173 = sst [smem:[#allocation32_spill]] %s4957_s9  ;;  %s4888_s15 = smov 10  }
   0x9   :  { %6174 = sst [smem:[#allocation33_spill]] %s4962_s13  ;;  %s4889_s20 = smov 11  }
   0xa   :  { %6175 = sst [smem:[#allocation34_spill]] %s4967_s17  ;;  %s4891_s1 = smov 13  }
   0xb   :  { %6176 = sst [smem:[#allocation35_spill]] %s4972_s21  ;;  %s4892_s7 = smov 14  }
   0xc   :  { %6177 = sst [smem:[#allocation36_spill]] %s4977_s25  ;;  %s4894_s22 = smov 16  }
   0xd   :  { %s4982_s29 = sld [smem:[%s6128_s0 + %s4884_s26]]   ;;  %s4890_s26 = smov 12  }
   0xe   :  { %s4987_s3 = sld [smem:[%s6128_s0 + %s4885_s30]]   ;;  %s4895_s28 = smov 17  }
   0xf   :  { %s4992_s8 = sld [smem:[%s6128_s0 + %s4886_s4]]  }
  0x10   :  { %s4997_s14 = sld [smem:[%s6128_s0 + %s4887_s10]]  }
  0x11   :  { %s5002_s19 = sld [smem:[%s6128_s0 + %s4888_s15]]   ;;  %s4893_s15 = smov 15  }
  0x12   :  { %s5007_s24 = sld [smem:[%s6128_s0 + %s4889_s20]]  }
  0x13   :  { %6178 = sst [smem:[#allocation37_spill]] %s4982_s29 }
  0x14   :  { %6179 = sst [smem:[#allocation38_spill]] %s4987_s3 }
  0x15   :  { %6180 = sst [smem:[#allocation39_spill]] %s4992_s8 }
  0x16   :  { %6181 = sst [smem:[#allocation40_spill]] %s4997_s14 }
  0x17   :  { %6182 = sst [smem:[#allocation41_spill]] %s5002_s19 }
  0x18   :  { %6183 = sst [smem:[#allocation42_spill]] %s5007_s24 }
  0x19   :  { %s5012_s30 = sld [smem:[%s6128_s0 + %s4890_s26]]  }
  0x1a   :  { %s5017_s6 = sld [smem:[%s6128_s0 + %s4891_s1]]  }
  0x1b   :  { %s5022_s12 = sld [smem:[%s6128_s0 + %s4892_s7]]   ;;  %s4896_s7 = smov 18  }
  0x1c   :  { %s5027_s20 = sld [smem:[%s6128_s0 + %s4893_s15]]   ;;  %s4897_s15 = smov 19  }
  0x1d   :  { %s5032_s27 = sld [smem:[%s6128_s0 + %s4894_s22]]   ;;  %s4898_s22 = smov 20  }
  0x1e   :  { %s5037_s4 = sld [smem:[%s6128_s0 + %s4895_s28]]   ;;  %s4899_s28 = smov 21  }
  0x1f   :  { %6184 = sst [smem:[#allocation43_spill]] %s5012_s30 }
  0x20   :  { %6185 = sst [smem:[#allocation44_spill]] %s5017_s6 }
  0x21   :  { %6186 = sst [smem:[#allocation45_spill]] %s5022_s12 }
  0x22   :  { %6187 = sst [smem:[#allocation46_spill]] %s5027_s20 }
  0x23   :  { %6188 = sst [smem:[#allocation47_spill]] %s5032_s27 }
  0x24   :  { %6189 = sst [smem:[#allocation48_spill]] %s5037_s4 }
  0x25   :  { %s5042_s6 = sld [smem:[%s6128_s0 + %s4896_s7]]   ;;  %s4900_s7 = smov 22  }
  0x26   :  { %s5047_s24 = sld [smem:[%s6128_s0 + %s4897_s15]]   ;;  %s4901_s15 = smov 23  }
  0x27   :  { %s5052_s12 = sld [smem:[%s6128_s0 + %s4898_s22]]   ;;  %s4902_s22 = smov 24  }
  0x28   :  { %s5057_s4 = sld [smem:[%s6128_s0 + %s4899_s28]]   ;;  %s4903_s28 = smov 25  }
  0x29   :  { %s5077_s30 = sld [smem:[%s6128_s0 + %s4903_s28]]   ;;  %s4907_s28 = smov 29  }
  0x2a   :  { %s5097_s17 = sld [smem:[%s6128_s0 + %s4907_s28]]   ;;  %s4911_s28 = smov 33  }
  0x2b   :  { %6190 = sst [smem:[#allocation49_spill]] %s5042_s6 }
  0x2c   :  { %6191 = sst [smem:[#allocation50_spill]] %s5047_s24 }
  0x2d   :  { %6192 = sst [smem:[#allocation51_spill]] %s5052_s12 }
  0x2e   :  { %6193 = sst [smem:[#allocation52_spill]] %s5057_s4 }
  0x2f   :  { %s5062_s6 = sld [smem:[%s6128_s0 + %s4900_s7]]   ;;  %s4904_s7 = smov 26  }
  0x30   :  { %s5067_s24 = sld [smem:[%s6128_s0 + %s4901_s15]]   ;;  %s4905_s15 = smov 27  }
  0x31   :  { %s5072_s12 = sld [smem:[%s6128_s0 + %s4902_s22]]   ;;  %s4906_s22 = smov 28  }
  0x32   :  { %6197 = sst [smem:[#allocation56_spill]] %s5077_s30 }
  0x33   :  { %s5082_s25 = sld [smem:[%s6128_s0 + %s4904_s7]]   ;;  %s4908_s7 = smov 30  }
  0x34   :  { %s5087_s29 = sld [smem:[%s6128_s0 + %s4905_s15]]   ;;  %s4909_s15 = smov 31  }
  0x35   :  { %6194 = sst [smem:[#allocation53_spill]] %s5062_s6 }
  0x36   :  { %6195 = sst [smem:[#allocation54_spill]] %s5067_s24 }
  0x37   :  { %6196 = sst [smem:[#allocation55_spill]] %s5072_s12 }
  0x38   :  { %s5092_s3 = sld [smem:[%s6128_s0 + %s4906_s22]]   ;;  %s4910_s22 = smov 32  }
  0x39   :  { %6198 = sst [smem:[#allocation57_spill]] %s5082_s25 }
  0x3a   :  { %6199 = sst [smem:[#allocation58_spill]] %s5087_s29 }
  0x3b   :  { %6201 = sst [smem:[#allocation60_spill]] %s5097_s17 }
  0x3c   :  { %s5102_s14 = sld [smem:[%s6128_s0 + %s4908_s7]]   ;;  %s4912_s7 = smov 34  }
  0x3d   :  { %s5107_s20 = sld [smem:[%s6128_s0 + %s4909_s15]]   ;;  %s4913_s15 = smov 35  }
  0x3e   :  { %6200 = sst [smem:[#allocation59_spill]] %s5092_s3 }
  0x3f   :  { %s5112_s27 = sld [smem:[%s6128_s0 + %s4910_s22]]   ;;  %s4914_s22 = smov 36  }
  0x40   :  { %s5117_s8 = sld [smem:[%s6128_s0 + %s4911_s28]]   ;;  %s4915_s28 = smov 37  }
  0x41   :  { %s5122_s19 = sld [smem:[%s6128_s0 + %s4912_s7]]   ;;  %s4916_s7 = smov 38  }
  0x42   :  { %s5127_s21 = sld [smem:[%s6128_s0 + %s4913_s15]]   ;;  %s4917_s15 = smov 39  }
  0x43   :  { %6202 = sst [smem:[#allocation61_spill]] %s5107_s20 }
  0x44   :  { %s5132_s24 = sld [smem:[%s6128_s0 + %s4914_s22]]   ;;  %s4918_s22 = smov 40  }
  0x45   :  { %s5137_s12 = sld [smem:[%s6128_s0 + %s4915_s28]]   ;;  %s4919_s28 = smov 41  }
  0x46   :  { %6203 = sst [smem:[#allocation62_spill]] %s5117_s8 }
  0x47   :  { %s5142_s29 = sld [smem:[%s6128_s0 + %s4916_s7]]   ;;  %s4920_s7 = smov 42  }
  0x48   :  { %s5147_s3 = sld [smem:[%s6128_s0 + %s4917_s15]]   ;;  %s4921_s15 = smov 43  }
  0x49   :  { %s5152_s8 = sld [smem:[%s6128_s0 + %s4918_s22]]   ;;  %s4922_s22 = smov 44  }
  0x4a   :  { %s5167_s4 = sld [smem:[%s6128_s0 + %s4921_s15]]   ;;  %s4925_s15 = smov 47  }
  0x4b   :  { %6204 = sst [smem:[#allocation63_spill]] %s5137_s12 }
  0x4c   :  { %s5157_s12 = sld [smem:[%s6128_s0 + %s4919_s28]]   ;;  %s4923_s28 = smov 45  }
  0x4d   :  { %6205 = sst [smem:[#allocation64_spill]] %s5142_s29 }
  0x4e   :  { %6206 = sst [smem:[#allocation65_spill]] %s5147_s3 }
  0x4f   :  { %6207 = sst [smem:[#allocation66_spill]] %s5152_s8 }
  0x50   :  { %s5162_s29 = sld [smem:[%s6128_s0 + %s4920_s7]]   ;;  %s4924_s7 = smov 46  }
  0x51   :  { %6209 = sst [smem:[#allocation68_spill]] %s5167_s4 }
  0x52   :  { %6208 = sst [smem:[#allocation67_spill]] %s5157_s12 }
  0x53   :  { %s5172_s30 = sld [smem:[%s6128_s0 + %s4922_s22]]   ;;  %s4926_s22 = smov 48  }
  0x54   :  { %s5177_s6 = sld [smem:[%s6128_s0 + %s4923_s28]]   ;;  %s4927_s28 = smov 49  }
  0x55   :  { %s5182_s25 = sld [smem:[%s6128_s0 + %s4924_s7]]   ;;  %s4928_s7 = smov 50  }
  0x56   :  { %s5187_s17 = sld [smem:[%s6128_s0 + %s4925_s15]]   ;;  %s4929_s15 = smov 51  }
  0x57   :  { %s5197_s13 = sld [smem:[%s6128_s0 + %s4927_s28]]   ;;  %s4931_s28 = smov 53  }
  0x58   :  { %s5202_s20 = sld [smem:[%s6128_s0 + %s4928_s7]]  }
  0x59   :  { %6210 = sst [smem:[#allocation69_spill]] %s5172_s30 }
  0x5a   :  { %6211 = sst [smem:[#allocation70_spill]] %s5177_s6 }
  0x5b   :  { %s5192_s30 = sld [smem:[%s6128_s0 + %s4926_s22]]   ;;  %s4930_s22 = smov 52  }
  0x5c   :  { %s5207_s9 = sld [smem:[%s6128_s0 + %s4929_s15]]  }
  0x5d   :  { %s5212_s8 = sld [smem:[%s6128_s0 + %s4930_s22]]  }
  0x61   :  { %6212 = sst [smem:[#allocation71_spill]] %s5192_s30 }
  0x62   :  { %6213 = sst [smem:[#allocation72_spill]] %s5207_s9 }
  0x63   :  { %6214 = sst [smem:[#allocation73_spill]] %s5212_s8 }
  0x64   :  { %s5217_s30 = sld [smem:[%s6128_s0 + %s4931_s28]]  }
  0x6a   :  { %6215 = sst [smem:[#allocation74_spill]] %s5217_s30 }
  0x6b   :  { %113 = vsyncpa [#allocation3], 0 }
  0x6c   :  { %114 = vsyncpa [#allocation6], 0 }
  0x6d   :  { %115 = vsyncpa [#allocation9], 0 }
  0x6e   :  { %116 = vsyncpa [#allocation12], 0 }
  0x6f   :  { %117 = vsyncpa [#allocation15], 0 }
  0x70   :  { %118 = vsyncpa [#allocation18], 0 }
  0x71   :  { %119 = vsyncpa [#allocation4], 0 }
  0x72   :  { %121 = vsyncpa [#allocation4 + $0x1], 0 }
  0x73   :  { %122 = vsyncpa [#allocation22], 0 }
  0x74   :  { %124 = vsyncpa [#allocation22 + $0x1], 0  ;;  %s5219_s7 = smov 0   ;;  %s5221_s10 = smov 0  }
  0x75   :  { %s5223_s11 = smov 0   ;;  %s5225_s15 = smov 0  }
  0x76 LB: > { %s6216_s12 = sld [smem:[#allocation67_spill]]  ;;  %s5240_s0 = sadd.s32 4294967295, %s4877_s15   ;;  %s4877_s15 = sphi %s5225_s15, %s6287_s15   ;;  %s4873_s11 = sphi %s5223_s11, %s6289_s11   ;;  %s4869_s10 = sphi %s5221_s10, %s6291_s10   ;;  %s4865_s7 = sphi %s5219_s7, %s6290_s7  }
  0x77   : > { %s6217_s6 = sld [smem:[#allocation70_spill]]  ;;  %s3960_s16 = sadd.s32 4294967294, %s4877_s15  }
  0x78   : > { %s6218_s4 = sld [smem:[#allocation68_spill]]  ;;  %s5244_s18 = sadd.s32 1, %s4877_s15  }
  0x79   : > { %s6219_s3 = sld [smem:[#allocation65_spill]]  ;;  %s1213_s22 = sadd.s32 1, %s4873_s11 }
  0x7a   : > { %6220 = sst [smem:[#allocation75_spill]] %s4865_s7  ;;  %s1210_s23 = ssub.s32 %s4877_s15, %s5244_s18 }
  0x7b   : > { %6221 = sst [smem:[#allocation76_spill]] %s4873_s11  ;;  %p1223_p0 = scmp.ne.s32.totalorder %s4873_s11, %s4869_s10 }
  0x7c   : > { %6222 = sst [smem:[#allocation77_spill]] %s4877_s15  ;;  %p1211_p1 = scmp.eq.s32.totalorder %s1210_s23, 0 }
  0x7d   : > { %6223 = sst [smem:[#allocation78_spill]] %s5244_s18  ;;  %p1224_p2 = scmp.eq.s32.totalorder %s5240_s0, 1 }
  0x7e   : > { %p1229_p3 = scmp.ne.s32.totalorder %s4869_s10, %s4865_s7  ;;  %p1230_p4 = scmp.eq.s32.totalorder %s3960_s16, 1 }
  0x7f   : > { %s5255_s26 = scalar_select %p1211_p1, %s4873_s11, %s1213_s22  }
  0x80   : > { %p5257_p5 = por %p1224_p2, %p1223_p0  ;;  %p5261_p6 = por %p1230_p4, %p1229_p3 }
  0x81   : > { %6224 = sst [smem:[#allocation79_spill]] %s5255_s26  ;;  %p3961_p7 = scmp.ge.s32.totalorder %s4877_s15, 1 }
  0x82   : > { %s6225_s28 = scalar_select %p5257_p5, 1, 0 }
  0x83   : > { %s6227_s1 = scalar_select %p5261_p6, 1, 0 }
  0x84   : > { %6226 = sst [smem:[#allocation80_spill]] %s6225_s28  ;;  %p1289_p8 = scmp.lt.s32.totalorder %s4877_s15, 3 }
  0x85   : > { %6228 = sst [smem:[#allocation81_spill]] %s6227_s1  ;;  %p4193_p9 = scmp.eq.s32.totalorder %s5240_s0, 0 }
  0x86   : > { %p5268_p10 = pnand %p3961_p7, %p1289_p8  ;;  %s1412_s16 = sshll.u32 %s5127_s21, 4  ;;  %s1413_s16 = int_to_ptr.hbm [resolvable:$true] %s1412_s16 }
  0x87   : > { %s4932_s22 = smov [#allocation5]   ;;  %s1442_s26 = sshll.u32 %s6219_s3, 4  ;;  %s5282_s26 = int_to_ptr.hbm [resolvable:$true] %s1442_s26 }
  0x88   : > { %p4152_p11 = pneg %p5268_p10  ;;  %s1414_s23 = sshll.u32 %s4932_s22, 4  ;;  %s1415_s23 = int_to_ptr.vmem [resolvable:$true] %s1414_s23 }
  0x89   : > { %s1469_s18 = sshll.u32 %s5162_s29, 4  ;;  %s4933_s1 = smov [#allocation8]   ;;  %s5300_s18 = int_to_ptr.hbm [resolvable:$true] %s1469_s18 }
  0x8a   : > { %p5278_p12 = pnand %p4193_p9, %p4152_p11  ;;  %s5285_s7 = sshll.u32 %s4933_s1, 4  ;;  %s1445_s7 = int_to_ptr.vmem [resolvable:$true] %s5285_s7 }
  0x8b   : > { %s4429_s15 = sshra.s32 %s1413_s16, 4  ;;  %s4436_s28 = scalar_lea.hbm %s5127_s21, 1  ;;  %s4430_s15 = int_to_ptr.hbm [resolvable:$true] %s4429_s15 }
  0x8c   : > { %s4431_s9 = scalar_lea.hbm %s4430_s15, 1  ;;  %p5289_p0 = pneg %p5278_p12 }
  0x8d   : > { %p4432_p13 = scmp.ne.s32.totalorder %s4430_s15, %s4431_s9  ;;  %p4437_p3 = scmp.lt.s32.totalorder %s4430_s15, %s5127_s21 }
  0x8e   : > { %p4438_p4 = scmp.lt.s32.totalorder %s4436_s28, %s4431_s9 }
  0x8f   : > { %p4434_p1 = pnand %p5289_p0, %p4432_p13 }
  0x90   : > { %p4439_p7 = por %p4438_p4, %p4437_p3 }
  0x91   : > { %p4435_p2 = pneg %p4434_p1 }
  0x93   : > { %p4440_p8 = pnand %p4439_p7, %p4435_p2 }
  0x95   : > { %4443 = shalt.err (!%p4440_p8)
}
  0x96   : > { %4158 = dma.hbm_to_vmem [thread:$0]  (!%p5278_p12), %s1413_s16, 16, %s1415_s23, [#allocation6]  }
  0x97   : > { %s4459_s1 = sshra.s32 %s5282_s26, 4  ;;  %s4466_s9 = scalar_lea.hbm %s6219_s3, 1  ;;  %s4460_s1 = int_to_ptr.hbm [resolvable:$true] %s4459_s1 }
  0x98   : > { %s4461_s30 = scalar_lea.hbm %s4460_s1, 1  ;;  %p4467_p2 = scmp.lt.s32.totalorder %s4460_s1, %s6219_s3 }
  0x99   : > { %p4462_p11 = scmp.ne.s32.totalorder %s4460_s1, %s4461_s30  ;;  %p4468_p3 = scmp.lt.s32.totalorder %s4466_s9, %s4461_s30 }
  0x9b   : > { %p4464_p13 = pnand %p4462_p11, %p5289_p0  ;;  %p4469_p4 = por %p4468_p3, %p4467_p2 }
  0x9d   : > { %p4465_p1 = pneg %p4464_p13 }
  0x9f   : > { %p4470_p7 = pnand %p4469_p4, %p4465_p1 }
  0xa1   : > { %4473 = shalt.err (!%p4470_p7)
}
  0xa2   : > { %4164 = dma.hbm_to_vmem [thread:$0]  (!%p5278_p12), %s5282_s26, 16, %s1445_s7, [#allocation9]  }
  0xa3   : > { %s1496_s15 = sshll.u32 %s6217_s6, 4  ;;  %s4934_s28 = smov [#allocation11]   ;;  %s5311_s15 = int_to_ptr.hbm [resolvable:$true] %s1496_s15 }
  0xa4   : > { %s1471_s16 = sshll.u32 %s4934_s28, 4  ;;  %s4489_s23 = sshra.s32 %s5300_s18, 4  ;;  %s1472_s16 = int_to_ptr.vmem [resolvable:$true] %s1471_s16  ;;  %s4490_s23 = int_to_ptr.hbm [resolvable:$true] %s4489_s23 }
  0xa5   : > { %s4491_s30 = scalar_lea.hbm %s4490_s23, 1  ;;  %s4496_s1 = scalar_lea.hbm %s5162_s29, 1 }
  0xa6   : > { %p4492_p8 = scmp.ne.s32.totalorder %s4490_s23, %s4491_s30  ;;  %p4497_p1 = scmp.lt.s32.totalorder %s4490_s23, %s5162_s29 }
  0xa7   : > { %p4498_p2 = scmp.lt.s32.totalorder %s4496_s1, %s4491_s30 }
  0xa8   : > { %p4494_p11 = pnand %p4492_p8, %p5289_p0 }
  0xa9   : > { %p4499_p3 = por %p4498_p2, %p4497_p1 }
  0xaa   : > { %p4495_p13 = pneg %p4494_p11 }
  0xac   : > { %p4500_p4 = pnand %p4499_p3, %p4495_p13 }
  0xae   : > { %4503 = shalt.err (!%p4500_p4)
}
  0xaf   : > { %4170 = dma.hbm_to_vmem [thread:$0]  (!%p5278_p12), %s5300_s18, 16, %s1472_s16, [#allocation12]  }
  0xb0   : > { %s4935_s7 = smov [#allocation14]   ;;  %s1520_s9 = sshll.u32 %s5187_s17, 4  ;;  %s5322_s9 = int_to_ptr.hbm [resolvable:$true] %s1520_s9 }
  0xb1   : > { %s1498_s26 = sshll.u32 %s4935_s7, 4  ;;  %s4519_s28 = sshra.s32 %s5311_s15, 4  ;;  %s1499_s26 = int_to_ptr.vmem [resolvable:$true] %s1498_s26  ;;  %s4520_s28 = int_to_ptr.hbm [resolvable:$true] %s4519_s28 }
  0xb2   : > { %s4521_s23 = scalar_lea.hbm %s4520_s28, 1  ;;  %s4526_s30 = scalar_lea.hbm %s6217_s6, 1 }
  0xb3   : > { %p4522_p7 = scmp.ne.s32.totalorder %s4520_s28, %s4521_s23  ;;  %p4527_p13 = scmp.lt.s32.totalorder %s4520_s28, %s6217_s6 }
  0xb4   : > { %p4528_p1 = scmp.lt.s32.totalorder %s4526_s30, %s4521_s23 }
  0xb5   : > { %p4524_p8 = pnand %p4522_p7, %p5289_p0 }
  0xb6   : > { %p4529_p2 = por %p4528_p1, %p4527_p13 }
  0xb7   : > { %p4525_p11 = pneg %p4524_p8 }
  0xb9   : > { %p4530_p3 = pnand %p4529_p2, %p4525_p11 }
  0xbb   : > { %4533 = shalt.err (!%p4530_p3)
}
  0xbc   : > { %4176 = dma.hbm_to_vmem [thread:$0]  (!%p5278_p12), %s5311_s15, 16, %s1499_s26, [#allocation15]  }
  0xbd   : > { %s1400_s18 = sshll.u32 %s5122_s19, 4  ;;  %s4936_s16 = smov [#allocation17]   ;;  %s5333_s18 = int_to_ptr.hbm [resolvable:$true] %s1400_s18 }
  0xbe   : > { %s1522_s1 = sshll.u32 %s4936_s16, 4  ;;  %s4549_s7 = sshra.s32 %s5322_s9, 4  ;;  %s1523_s1 = int_to_ptr.vmem [resolvable:$true] %s1522_s1  ;;  %s4550_s7 = int_to_ptr.hbm [resolvable:$true] %s4549_s7 }
  0xbf   : > { %s4551_s28 = scalar_lea.hbm %s4550_s7, 1  ;;  %s4556_s23 = scalar_lea.hbm %s5187_s17, 1 }
  0xc0   : > { %p4552_p4 = scmp.ne.s32.totalorder %s4550_s7, %s4551_s28  ;;  %p4557_p11 = scmp.lt.s32.totalorder %s4550_s7, %s5187_s17 }
  0xc1   : > { %p4558_p13 = scmp.lt.s32.totalorder %s4556_s23, %s4551_s28 }
  0xc2   : > { %p4554_p7 = pnand %p4552_p4, %p5289_p0 }
  0xc3   : > { %p4559_p1 = por %p4558_p13, %p4557_p11 }
  0xc4   : > { %p4555_p8 = pneg %p4554_p7 }
  0xc6   : > { %p4560_p2 = pnand %p4559_p1, %p4555_p8 }
  0xc8   : > { %4563 = shalt.err (!%p4560_p2)
}
  0xc9   : > { %4182 = dma.hbm_to_vmem [thread:$0]  (!%p5278_p12), %s5322_s9, 16, %s1523_s1, [#allocation18]  }
  0xca   : > { %s4937_s15 = smov [#allocation2]   ;;  %s1424_s30 = sshll.u32 %s5132_s24, 4  ;;  %s5344_s30 = int_to_ptr.hbm [resolvable:$true] %s1424_s30 }
  0xcb   : > { %s1402_s26 = sshll.u32 %s4937_s15, 4  ;;  %s4579_s16 = sshra.s32 %s5333_s18, 4  ;;  %s1403_s26 = int_to_ptr.vmem [resolvable:$true] %s1402_s26  ;;  %s4580_s16 = int_to_ptr.hbm [resolvable:$true] %s4579_s16 }
  0xcc   : > { %s4581_s7 = scalar_lea.hbm %s4580_s16, 1  ;;  %s4586_s28 = scalar_lea.hbm %s5122_s19, 1 }
  0xcd   : > { %p4582_p3 = scmp.ne.s32.totalorder %s4580_s16, %s4581_s7  ;;  %p4587_p8 = scmp.lt.s32.totalorder %s4580_s16, %s5122_s19 }
  0xce   : > { %p4588_p11 = scmp.lt.s32.totalorder %s4586_s28, %s4581_s7 }
  0xcf   : > { %p4584_p4 = pnand %p4582_p3, %p5289_p0 }
  0xd0   : > { %p4589_p13 = por %p4588_p11, %p4587_p8 }
  0xd1   : > { %p4585_p7 = pneg %p4584_p4 }
  0xd3   : > { %p4590_p1 = pnand %p4589_p13, %p4585_p7 }
  0xd5   : > { %4593 = shalt.err (!%p4590_p1)
}
  0xd6   : > { %4155 = dma.hbm_to_vmem [thread:$0]  (!%p5278_p12), %s5333_s18, 16, %s1403_s26, [#allocation3]  }
  0xd7   : > { %s1457_s9 = sshll.u32 %s6216_s12, 4  ;;  %s4938_s1 = smov [#allocation7]   ;;  %s5355_s9 = int_to_ptr.hbm [resolvable:$true] %s1457_s9 }
  0xd8   : > { %s1426_s23 = sshll.u32 %s4938_s1, 4  ;;  %s4609_s15 = sshra.s32 %s5344_s30, 4  ;;  %s1427_s23 = int_to_ptr.vmem [resolvable:$true] %s1426_s23  ;;  %s4610_s15 = int_to_ptr.hbm [resolvable:$true] %s4609_s15 }
  0xd9   : > { %s4611_s16 = scalar_lea.hbm %s4610_s15, 1  ;;  %s4616_s7 = scalar_lea.hbm %s5132_s24, 1 }
  0xda   : > { %p4612_p2 = scmp.ne.s32.totalorder %s4610_s15, %s4611_s16  ;;  %p4617_p7 = scmp.lt.s32.totalorder %s4610_s15, %s5132_s24 }
  0xdb   : > { %p4618_p8 = scmp.lt.s32.totalorder %s4616_s7, %s4611_s16 }
  0xdc   : > { %p4614_p3 = pnand %p4612_p2, %p5289_p0 }
  0xdd   : > { %p4619_p11 = por %p4618_p8, %p4617_p7 }
  0xde   : > { %p4615_p4 = pneg %p4614_p3 }
  0xe0   : > { %p4620_p13 = pnand %p4619_p11, %p4615_p4 }
  0xe2   : > { %4623 = shalt.err (!%p4620_p13)
}
  0xe3   : > { %4161 = dma.hbm_to_vmem [thread:$0]  (!%p5278_p12), %s5344_s30, 16, %s1427_s23, [#allocation6]  }
  0xe4   : > { %s4939_s18 = smov [#allocation10]   ;;  %s1481_s28 = sshll.u32 %s6218_s4, 4  ;;  %s5366_s28 = int_to_ptr.hbm [resolvable:$true] %s1481_s28 }
  0xe5   : > { %s1459_s26 = sshll.u32 %s4939_s18, 4  ;;  %s4639_s1 = sshra.s32 %s5355_s9, 4  ;;  %s1460_s26 = int_to_ptr.vmem [resolvable:$true] %s1459_s26  ;;  %s4640_s1 = int_to_ptr.hbm [resolvable:$true] %s4639_s1 }
  0xe6   : > { %s4641_s15 = scalar_lea.hbm %s4640_s1, 1  ;;  %s4646_s16 = scalar_lea.hbm %s6216_s12, 1 }
  0xe7   : > { %p4642_p1 = scmp.ne.s32.totalorder %s4640_s1, %s4641_s15  ;;  %p4647_p4 = scmp.lt.s32.totalorder %s4640_s1, %s6216_s12 }
  0xe8   : > { %p4648_p7 = scmp.lt.s32.totalorder %s4646_s16, %s4641_s15 }
  0xe9   : > { %p4644_p2 = pnand %p4642_p1, %p5289_p0 }
  0xea   : > { %p4649_p8 = por %p4648_p7, %p4647_p4 }
  0xeb   : > { %p4645_p3 = pneg %p4644_p2 }
  0xed   : > { %p4650_p11 = pnand %p4649_p8, %p4645_p3 }
  0xef   : > { %4653 = shalt.err (!%p4650_p11)
}
  0xf0   : > { %4167 = dma.hbm_to_vmem [thread:$0]  (!%p5278_p12), %s5355_s9, 16, %s1460_s26, [#allocation9]  }
  0xf1   : > { %s1508_s30 = sshll.u32 %s5182_s25, 4  ;;  %s4940_s23 = smov [#allocation13]   ;;  %s5377_s30 = int_to_ptr.hbm [resolvable:$true] %s1508_s30 }
  0xf2   : > { %s1483_s7 = sshll.u32 %s4940_s23, 4  ;;  %s4669_s18 = sshra.s32 %s5366_s28, 4  ;;  %s1484_s7 = int_to_ptr.vmem [resolvable:$true] %s1483_s7  ;;  %s4670_s18 = int_to_ptr.hbm [resolvable:$true] %s4669_s18 }
  0xf3   : > { %s4671_s1 = scalar_lea.hbm %s4670_s18, 1  ;;  %s4676_s15 = scalar_lea.hbm %s6218_s4, 1 }
  0xf4   : > { %p4672_p13 = scmp.ne.s32.totalorder %s4670_s18, %s4671_s1  ;;  %p4677_p3 = scmp.lt.s32.totalorder %s4670_s18, %s6218_s4 }
  0xf5   : > { %p4678_p4 = scmp.lt.s32.totalorder %s4676_s15, %s4671_s1 }
  0xf6   : > { %p4674_p1 = pnand %p4672_p13, %p5289_p0 }
  0xf7   : > { %p4679_p7 = por %p4678_p4, %p4677_p3 }
  0xf8   : > { %p4675_p2 = pneg %p4674_p1 }
  0xfa   : > { %p4680_p8 = pnand %p4679_p7, %p4675_p2 }
  0xfc   : > { %4683 = shalt.err (!%p4680_p8)
}
  0xfd   : > { %4173 = dma.hbm_to_vmem [thread:$0]  (!%p5278_p12), %s5366_s28, 16, %s1484_s7, [#allocation12]  }
  0xfe   : > { %s4941_s9 = smov [#allocation16]   ;;  %s1535_s16 = sshll.u32 %s5197_s13, 4  ;;  %s1536_s16 = int_to_ptr.hbm [resolvable:$true] %s1535_s16 }
  0xff   : > { %s1510_s26 = sshll.u32 %s4941_s9, 4  ;;  %s4699_s23 = sshra.s32 %s5377_s30, 4  ;;  %s1511_s26 = int_to_ptr.vmem [resolvable:$true] %s1510_s26  ;;  %s4700_s23 = int_to_ptr.hbm [resolvable:$true] %s4699_s23 }
 0x100   : > { %s4701_s18 = scalar_lea.hbm %s4700_s23, 1  ;;  %s4706_s1 = scalar_lea.hbm %s5182_s25, 1 }
 0x101   : > { %p4702_p11 = scmp.ne.s32.totalorder %s4700_s23, %s4701_s18  ;;  %p4707_p2 = scmp.lt.s32.totalorder %s4700_s23, %s5182_s25 }
 0x102   : > { %p4708_p3 = scmp.lt.s32.totalorder %s4706_s1, %s4701_s18 }
 0x103   : > { %p4704_p13 = pnand %p4702_p11, %p5289_p0 }
 0x104   : > { %p4709_p4 = por %p4708_p3, %p4707_p2 }
 0x105   : > { %p4705_p1 = pneg %p4704_p13 }
 0x107   : > { %p4710_p7 = pnand %p4709_p4, %p4705_p1 }
 0x109   : > { %4713 = shalt.err (!%p4710_p7)
}
 0x10a   : > { %4179 = dma.hbm_to_vmem [thread:$0]  (!%p5278_p12), %s5377_s30, 16, %s1511_s26, [#allocation15]  }
 0x10b   : > { %s4942_s28 = smov [#allocation19]   ;;  %s4729_s15 = sshra.s32 %s1536_s16, 4  ;;  %s4730_s15 = int_to_ptr.hbm [resolvable:$true] %s4729_s15 }
 0x10c   : > { %s1537_s7 = sshll.u32 %s4942_s28, 4  ;;  %s4731_s9 = scalar_lea.hbm %s4730_s15, 1  ;;  %s1538_s7 = int_to_ptr.vmem [resolvable:$true] %s1537_s7 }
 0x10d   : > { %p4732_p8 = scmp.ne.s32.totalorder %s4730_s15, %s4731_s9  ;;  %s4736_s23 = scalar_lea.hbm %s5197_s13, 1 }
 0x10e   : > { %p4737_p1 = scmp.lt.s32.totalorder %s4730_s15, %s5197_s13  ;;  %p4738_p2 = scmp.lt.s32.totalorder %s4736_s23, %s4731_s9 }
 0x10f   : > { %p4734_p11 = pnand %p4732_p8, %p5289_p0 }
 0x110   : > { %p4739_p3 = por %p4738_p2, %p4737_p1 }
 0x111   : > { %p4735_p13 = pneg %p4734_p11 }
 0x113   : > { %p4740_p4 = pnand %p4739_p3, %p4735_p13 }
 0x115   : > { %4743 = shalt.err (!%p4740_p4)
}
 0x116   : > { %4185 = dma.hbm_to_vmem [thread:$0]  (!%p5278_p12), %s1536_s16, 16, %s1538_s7, [#allocation18]  }
 0x117   : > { %1561 = sbr.rel (%p5268_p10) target bundleno = 4132 (0x1024), region = 224 }
 0x11c   : > { %4832 = dma.done.wait (%p4193_p9), [#allocation3], 16  }
 0x11d   : > { %4834 = vsyncadd (%p4193_p9), [#allocation3], 4294967280 }
 0x11e   : > { %4836 = dma.done.wait (%p4193_p9), [#allocation6], 32  }
 0x11f   : > { %4838 = vsyncadd (%p4193_p9), [#allocation6], 4294967264 }
 0x120   : > { %4840 = dma.done.wait (%p4193_p9), [#allocation9], 32  }
 0x121   : > { %4842 = vsyncadd (%p4193_p9), [#allocation9], 4294967264 }
 0x122   : > { %4844 = dma.done.wait (%p4193_p9), [#allocation12], 32  }
 0x123   : > { %4846 = vsyncadd (%p4193_p9), [#allocation12], 4294967264 }
 0x124   : > { %4848 = dma.done.wait (%p4193_p9), [#allocation15], 32  }
 0x125   : > { %4850 = vsyncadd (%p4193_p9), [#allocation15], 4294967264 }
 0x126   : > { %4852 = dma.done.wait (%p4193_p9), [#allocation18], 32  }
 0x127   : > { %4854 = vsyncadd (%p4193_p9), [#allocation18], 4294967264  ;;  %s6232_s5 = sld [smem:[#allocation31_spill]]  ;;  %p1746_p10 = scmp.lt.s32.totalorder %s5240_s0, 1  ;;  %v1766_v0 = vld [vmem:[%s5112_s27 + $0x18] sm:$0xff]  ;;  %v1765_v1 = vld [vmem:[%s5112_s27 + $0x10] sm:$0xff] }
 0x128   : > { %1805 = vmatpush.msra.mxu0 %v1766_v0  ;;  %s6233_s30 = sld [smem:[#allocation71_spill]]  ;;  %v1764_v2 = vld [vmem:[%s5112_s27 + $0x8] sm:$0xff]  ;;  %v1763_v3 = vld [vmem:[%s5112_s27] sm:$0xff]  ;;  %vm1771_vm0 = vcmask 261120   ;;  %v1842_v7 = vld [vmem:[%s5102_s14 + $0x10] sm:$0xff]  ;;  %vm1847_vm1 = vcmask 195584  }
 0x129   : > { %s5430_s11 = scalar_select %p1746_p10, %s5240_s0, 1  ;;  %v1841_v8 = vld [vmem:[%s5102_s14 + $0x8] sm:$0xff]  ;;  %1864 = vmatpush.msra.mxu1 %v1842_v7  ;;  %v1840_v11 = vld [vmem:[%s5102_s14] sm:$0xff]  ;;  %v1995_v15 = vld [vmem:[%s5202_s20 + $0x18] sm:$0xff]  ;;  %vm1837_vm2 = vcmask 253952   ;;  %vm2225_vm3 = vcmask 1040384  }
 0x12a   : > { %s6234_s26 = sld [smem:[#allocation66_spill]]  ;;  %1806 = vmatpush.msra.mxu0 %v1765_v1  ;;  %v1994_v17 = vld [vmem:[%s5202_s20 + $0x10] sm:$0xff]  ;;  %v1993_v23 = vld [vmem:[%s5202_s20 + $0x8] sm:$0xff]  ;;  %v1992_v26 = vld [vmem:[%s5202_s20] sm:$0xff]  ;;  %vm2125_vm4 = vcmask 400384   ;;  %vm2144_vm5 = vcmask 393216  }
 0x12b   : > { %s4103_s2 = smul.u32 56, %s5430_s11  ;;  %s6235_s16 = sld [smem:[#allocation32_spill]]  ;;  %1865 = vmatpush.msra.mxu1 %v1841_v8  ;;  %v4315_v55 = vld [vmem:[#allocation19] ss:$0 sm:$0xff]  ;;  %v4317_v59 = vld [vmem:[#allocation8] ss:$0 sm:$0xff] }
 0x12c   : > { %1807 = vmatpush.msra.mxu0 %v1764_v2  ;;  %s6236_s18 = sld [smem:[#allocation61_spill]]  ;;  %s5591_s15 = sand.u32 1, %s4869_s10  }
 0x12d   : > { %s5438_s22 = scalar_lea.vmem %s6232_s5, %s4103_s2  ;;  %1866 = vmatpush.msra.mxu1 %v1840_v11  ;;  %s6237_s8 = sld [smem:[#allocation73_spill]] }
 0x12e   : > { %v1756_v4 = vld [vmem:[%s5438_s22] sm:$0xff]  ;;  %1808 = vmatpush.msra.mxu0 %v1763_v3  ;;  %v1757_v5 = vld [vmem:[%s5438_s22 + $0x8] sm:$0xff]  ;;  %v1758_v6 = vld [vmem:[%s5438_s22 + $0x10] sm:$0xff]  ;;  %s6238_s28 = sld [smem:[#allocation33_spill]]  ;;  %s6155_s9 = sshll.u32 %s5591_s15, 3 }
 0x12f   : > { %3990 = vmatmul.msk.f32.vlgmr.msra.gmra.mxu0 %vm1771_vm0, %v1756_v4  ;;  %v1882_v9 = vld [vmem:[%s6233_s30 + $0x18] sm:$0xff]  ;;  %v1881_v12 = vld [vmem:[%s6233_s30 + $0x10] sm:$0xff]  ;;  %2012 = vmatpush.msrb.mxu1 %v1995_v15  ;;  %v1760_v18 = vld [vmem:[%s5438_s22 + $0x20] sm:$0xff]  ;;  %s6239_s7 = sld [smem:[#allocation60_spill]]  ;;  %s5596_s23 = scalar_lea.vmem [#allocation21], %s6155_s9 }
 0x130   : > { %v1949_v10 = vld [vmem:[%s6234_s26 + $0x18] sm:$0xff]  ;;  %1920 = vmatpush.msra.mxu2 %v1882_v9  ;;  %v1948_v13 = vld [vmem:[%s6234_s26 + $0x10] sm:$0xff]  ;;  %v1761_v19 = vld [vmem:[%s5438_s22 + $0x28] sm:$0xff]  ;;  %s6240_s11 = sld [smem:[#allocation57_spill]]  ;;  %s3651_s6 = scalar_lea.sflag [#allocation22], %s5591_s15 }
 0x131   : > { %1966 = vmatpush.msra.mxu3 %v1949_v10  ;;  %v1839_v14 = vld [vmem:[%s6235_s16] sm:$0xff]  ;;  %v1759_v16 = vld [vmem:[%s5438_s22 + $0x18] sm:$0xff]  ;;  %2013 = vmatpush.msrb.mxu1 %v1994_v17  ;;  %v1762_v20 = vld [vmem:[%s5438_s22 + $0x30] sm:$0x1]  ;;  %s6242_s22 = sld [smem:[#allocation69_spill]] }
 0x132   : > { %1921 = vmatpush.msra.mxu2 %v1881_v12  ;;  %3997 = vmatmul.msk.f32.vlgmr.msra.gmra.mxu1 %vm1847_vm1, %v1839_v14  ;;  %v1880_v21 = vld [vmem:[%s6233_s30 + $0x8] sm:$0xff]  ;;  %v1879_v24 = vld [vmem:[%s6233_s30] sm:$0xff]  ;;  %v4316_v9 = vld [vmem:[#allocation17] ss:$0 sm:$0xff]  ;;  %s6243_s16 = sld [smem:[#allocation53_spill]] }
 0x133   : > { %1967 = vmatpush.msra.mxu3 %v1948_v13  ;;  %v1947_v22 = vld [vmem:[%s6234_s26 + $0x8] sm:$0xff]  ;;  %2014 = vmatpush.msrb.mxu1 %v1993_v23  ;;  %v1946_v25 = vld [vmem:[%s6234_s26] sm:$0xff]  ;;  %s5476_s1 = scalar_lea.vmem %s6237_s8, %s4103_s2  ;;  %s6270_s3 = sld [smem:[#allocation45_spill]] }
 0x134   : > { %1922 = vmatpush.msra.mxu2 %v1880_v21  ;;  %v4313_v27 = vld [vmem:[%s6236_s18] ss:$0 sm:$0xff]  ;;  %s6244_s18 = sld [smem:[#allocation56_spill]] }
 0x135   : > { %1968 = vmatpush.msra.mxu3 %v1947_v22  ;;  %2015 = vmatpush.msrb.mxu1 %v1992_v26 }
 0x136   : > { %1923 = vmatpush.msra.mxu2 %v1879_v24  ;;  %s6241_s2 = smov %s6240_s11 }
 0x137   : > { %3991 = vmatmul.msk.f32.gmra.mxu0 %vm1771_vm0, %v1757_v5  ;;  %1969 = vmatpush.msra.mxu3 %v1946_v25 }
 0x13f   : > { %3992 = vmatmul.msk.f32.gmra.mxu0 %vm1771_vm0, %v1758_v6 }
 0x147   : > { %3993 = vmatmul.msk.f32.gmra.mxu0 %vm1771_vm0, %v1759_v16 }
 0x14f   : > { %3994 = vmatmul.msk.f32.gmra.mxu0 %vm1771_vm0, %v1760_v18 }
 0x157   : > { %3995 = vmatmul.msk.f32.gmra.mxu0 %vm1771_vm0, %v1761_v19 }
 0x15f   : > { %3996 = vmatmul.msk.f32.gmra.mxu0 %vm1771_vm0, %v1762_v20 }
 0x1ac   : > { %v1810_v28 = vpop.f32.mrf.mxu0 }
 0x1ad   : > { %v5478_v29 = vadd.f32 %v4313_v27, %v1810_v28 }
 0x1af   : > { %1831 = vst.msk [vmem:[%s5476_s1] sm:$0xff] %vm1771_vm0, %v5478_v29  ;;  %3998 = vmatmul.msk.f32.vlgmr.msra.gmra.mxu2 %vm1771_vm0, %v5478_v29  ;;  %4005 = vmatmul.msk.f32.vlgmr.msra.gmra.mxu3 %vm1771_vm0, %v5478_v29  ;;  %v5555_v42 = vpop.f32.mrf.mxu1 }
 0x1b0   : > { %4012 = vmatmul.msk.f32.vlgmr.msrb.gmra.mxu1 %vm1771_vm0, %v5478_v29 }
 0x1b4   : > { %v1813_v30 = vpop.f32.mrf.mxu0 }
 0x1b5   : > { %v5489_v31 = vadd.f32 %v4313_v27, %v1813_v30 }
 0x1b7   : > { %1832 = vst.msk [vmem:[%s5476_s1 + $0x8] sm:$0xff] %vm1771_vm0, %v5489_v31  ;;  %3999 = vmatmul.msk.f32.gmra.mxu2 %vm1771_vm0, %v5489_v31  ;;  %4006 = vmatmul.msk.f32.gmra.mxu3 %vm1771_vm0, %v5489_v31 }
 0x1b8   : > { %4013 = vmatmul.msk.f32.gmra.mxu1 %vm1771_vm0, %v5489_v31 }
 0x1bc   : > { %v1816_v32 = vpop.f32.mrf.mxu0 }
 0x1bd   : > { %v5500_v33 = vadd.f32 %v4313_v27, %v1816_v32 }
 0x1bf   : > { %1833 = vst.msk [vmem:[%s5476_s1 + $0x10] sm:$0xff] %vm1771_vm0, %v5500_v33  ;;  %4000 = vmatmul.msk.f32.gmra.mxu2 %vm1771_vm0, %v5500_v33  ;;  %4007 = vmatmul.msk.f32.gmra.mxu3 %vm1771_vm0, %v5500_v33 }
 0x1c0   : > { %4014 = vmatmul.msk.f32.gmra.mxu1 %vm1771_vm0, %v5500_v33 }
 0x1c4   : > { %v1819_v34 = vpop.f32.mrf.mxu0 }
 0x1c5   : > { %v5511_v35 = vadd.f32 %v4313_v27, %v1819_v34  ;;  %v1872_v34 = vld [vmem:[%s6238_s28] sm:$0xff] }
 0x1c7   : > { %1834 = vst.msk [vmem:[%s5476_s1 + $0x18] sm:$0xff] %vm1771_vm0, %v5511_v35  ;;  %4001 = vmatmul.msk.f32.gmra.mxu2 %vm1771_vm0, %v5511_v35  ;;  %4008 = vmatmul.msk.f32.gmra.mxu3 %vm1771_vm0, %v5511_v35 }
 0x1c8   : > { %4015 = vmatmul.msk.f32.gmra.mxu1 %vm1771_vm0, %v5511_v35 }
 0x1cc   : > { %v1822_v36 = vpop.f32.mrf.mxu0 }
 0x1cd   : > { %v5522_v37 = vadd.f32 %v4313_v27, %v1822_v36 }
 0x1cf   : > { %1835 = vst.msk [vmem:[%s5476_s1 + $0x20] sm:$0xff] %vm1771_vm0, %v5522_v37  ;;  %4002 = vmatmul.msk.f32.gmra.mxu2 %vm1771_vm0, %v5522_v37  ;;  %4009 = vmatmul.msk.f32.gmra.mxu3 %vm1771_vm0, %v5522_v37 }
 0x1d0   : > { %4016 = vmatmul.msk.f32.gmra.mxu1 %vm1771_vm0, %v5522_v37 }
 0x1d4   : > { %v1825_v38 = vpop.f32.mrf.mxu0 }
 0x1d5   : > { %v5533_v39 = vadd.f32 %v4313_v27, %v1825_v38 }
 0x1d7   : > { %1836 = vst.msk [vmem:[%s5476_s1 + $0x28] sm:$0xff] %vm1771_vm0, %v5533_v39  ;;  %4003 = vmatmul.msk.f32.gmra.mxu2 %vm1771_vm0, %v5533_v39  ;;  %4010 = vmatmul.msk.f32.gmra.mxu3 %vm1771_vm0, %v5533_v39 }
 0x1d8   : > { %4017 = vmatmul.msk.f32.gmra.mxu1 %vm1771_vm0, %v5533_v39 }
 0x1dc   : > { %v1828_v40 = vpop.f32.mrf.mxu0 }
 0x1dd   : > { %v5544_v41 = vadd.f32 %v4313_v27, %v1828_v40 }
 0x1df   : > { %4004 = vmatmul.msk.f32.gmra.mxu2 %vm1771_vm0, %v5544_v41  ;;  %4011 = vmatmul.msk.f32.gmra.mxu3 %vm1771_vm0, %v5544_v41  ;;  %1838 = vst.msk [vmem:[%s5476_s1 + $0x30] sm:$0x1] %vm1837_vm2, %v5544_v41  ;;  %s6245_s1 = sld [smem:[#allocation52_spill]] }
 0x1e0   : > { %4018 = vmatmul.msk.f32.gmra.mxu1 %vm1771_vm0, %v5544_v41 }
 0x22d   : > { %v2017_v43 = vpop.f32.mrf.mxu1 }
 0x22e   : > { %v2018_v3 = vadd.f32 %v4315_v55, %v2017_v43  ;;  %v1873_v43 = vld [vmem:[%s6238_s28 + $0x8] sm:$0xff] }
 0x232   : > { %v1971_v44 = vpop.f32.mrf.mxu3  ;;  %v1925_v4 = vpop.f32.mrf.mxu2 }
 0x233   : > { %v1926_v11 = vadd.f32 %v4316_v9, %v1925_v4  ;;  %v1972_v12 = vadd.f32 %v4317_v59, %v1971_v44 }
 0x235   : > { %v2020_v45 = vpop.f32.mrf.mxu1  ;;  %v2038_v13 = vmul.f32 0.17677669, %v1926_v11 }
 0x236   : > { %v2021_v2 = vadd.f32 %v4315_v55, %v2020_v45 }
 0x23a   : > { %v1974_v46 = vpop.f32.mrf.mxu3  ;;  %v1928_v8 = vpop.f32.mrf.mxu2 }
 0x23b   : > { %v1975_v10 = vadd.f32 %v4317_v59, %v1974_v46  ;;  %v1929_v15 = vadd.f32 %v4316_v9, %v1928_v8 }
 0x23d   : > { %v2023_v47 = vpop.f32.mrf.mxu1  ;;  %v2039_v16 = vmul.f32 0.17677669, %v1929_v15 }
 0x23e   : > { %v2024_v0 = vadd.f32 %v4315_v55, %v2023_v47  ;;  %v1874_v47 = vld [vmem:[%s6238_s28 + $0x10] sm:$0xff] }
 0x242   : > { %v1977_v48 = vpop.f32.mrf.mxu3  ;;  %v1931_v14 = vpop.f32.mrf.mxu2 }
 0x243   : > { %v1978_v7 = vadd.f32 %v4317_v59, %v1977_v48  ;;  %v1932_v18 = vadd.f32 %v4316_v9, %v1931_v14 }
 0x245   : > { %v2026_v49 = vpop.f32.mrf.mxu1  ;;  %v2040_v19 = vmul.f32 0.17677669, %v1932_v18 }
 0x246   : > { %v2027_v63 = vadd.f32 %v4315_v55, %v2026_v49 }
 0x24a   : > { %v1980_v50 = vpop.f32.mrf.mxu3  ;;  %v1934_v17 = vpop.f32.mrf.mxu2 }
 0x24b   : > { %v1981_v6 = vadd.f32 %v4317_v59, %v1980_v50  ;;  %v1935_v20 = vadd.f32 %v4316_v9, %v1934_v17 }
 0x24d   : > { %v2029_v51 = vpop.f32.mrf.mxu1  ;;  %v2041_v22 = vmul.f32 0.17677669, %v1935_v20 }
 0x24e   : > { %v2030_v60 = vadd.f32 %v4315_v55, %v2029_v51  ;;  %v1875_v51 = vld [vmem:[%s6238_s28 + $0x18] sm:$0xff] }
 0x252   : > { %v1983_v52 = vpop.f32.mrf.mxu3  ;;  %v1937_v21 = vpop.f32.mrf.mxu2 }
 0x253   : > { %v1984_v5 = vadd.f32 %v4317_v59, %v1983_v52  ;;  %v1938_v23 = vadd.f32 %v4316_v9, %v1937_v21 }
 0x255   : > { %v2032_v53 = vpop.f32.mrf.mxu1  ;;  %v2042_v25 = vmul.f32 0.17677669, %v1938_v23 }
 0x256   : > { %v2033_v58 = vadd.f32 %v4315_v55, %v2032_v53 }
 0x25a   : > { %v1986_v54 = vpop.f32.mrf.mxu3  ;;  %v1940_v24 = vpop.f32.mrf.mxu2 }
 0x25b   : > { %v1987_v1 = vadd.f32 %v4317_v59, %v1986_v54  ;;  %v1941_v26 = vadd.f32 %v4316_v9, %v1940_v24 }
 0x25d   : > { %v2035_v56 = vpop.f32.mrf.mxu1  ;;  %v2043_v27 = vmul.f32 0.17677669, %v1941_v26 }
 0x25e   : > { %v2036_v57 = vadd.f32 %v4315_v55, %v2035_v56  ;;  %v1876_v55 = vld [vmem:[%s6238_s28 + $0x20] sm:$0xff] }
 0x260   : > { %4033 = vmatpush.msk.msrb.mxu2 %vm2225_vm3, %v2036_v57 }
 0x262   : > { %2239 = vmatpush.msrb.mxu2 %v2033_v58  ;;  %v1989_v61 = vpop.f32.mrf.mxu3  ;;  %v1943_v28 = vpop.f32.mrf.mxu2 }
 0x263   : > { %v1990_v62 = vadd.f32 %v4317_v59, %v1989_v61  ;;  %v1944_v30 = vadd.f32 %v4316_v9, %v1943_v28  ;;  %v1877_v59 = vld [vmem:[%s6238_s28 + $0x28] sm:$0xff] }
 0x264   : > { %2240 = vmatpush.msrb.mxu2 %v2030_v60 }
 0x265   : > { %4019 = vmatpush.xpose.msk.msrb.mxu0 %vm1771_vm0, %v1990_v62  ;;  %v2044_v32 = vmul.f32 0.17677669, %v1944_v30 }
 0x266   : > { %2241 = vmatpush.msrb.mxu2 %v2027_v63  ;;  %v1878_v63 = vld [vmem:[%s6238_s28 + $0x30] sm:$0x1] }
 0x268   : > { %2242 = vmatpush.msrb.mxu2 %v2024_v0 }
 0x269   : > { %4020 = vmatpush.xpose.msk.msrb.mxu0 %vm1771_vm0, %v1987_v1 }
 0x26a   : > { %2243 = vmatpush.msrb.mxu2 %v2021_v2 }
 0x26c   : > { %2244 = vmatpush.msrb.mxu2 %v2018_v3  ;;  %v4314_v3 = vld [vmem:[%s6239_s7] ss:$0 sm:$0xff]  ;;  %s6246_s7 = sld [smem:[#allocation63_spill]] }
 0x26d   : > { %4021 = vmatpush.xpose.msk.msrb.mxu0 %vm1771_vm0, %v1984_v5  ;;  %v5588_v4 = vadd.f32 %v4314_v3, %v5555_v42 }
 0x26f   : > { %1871 = vst.msk [vmem:[%s5596_s23] sm:$0xff] %vm1771_vm0, %v5588_v4 }
 0x271   : > { %4022 = vmatpush.xpose.msk.msrb.mxu0 %vm1771_vm0, %v1981_v6 }
 0x275   : > { %4023 = vmatpush.xpose.msk.msrb.mxu0 %vm1771_vm0, %v1978_v7 }
 0x279   : > { %4024 = vmatpush.xpose.msk.msrb.mxu0 %vm1771_vm0, %v1975_v10 }
 0x27d   : > { %4025 = vmatpush.xpose.msk.msrb.mxu0 %vm1771_vm0, %v1972_v12 }
 0x280   : > { %4026 = vmatmul.msk.f32.vlgmr.msrb.gmra.mxu0 %vm1771_vm0, %v2038_v13 }
 0x288   : > { %4027 = vmatmul.msk.f32.gmra.mxu0 %vm1771_vm0, %v2039_v16 }
 0x290   : > { %4028 = vmatmul.msk.f32.gmra.mxu0 %vm1771_vm0, %v2040_v19 }
 0x298   : > { %4029 = vmatmul.msk.f32.gmra.mxu0 %vm1771_vm0, %v2041_v22 }
 0x2a0   : > { %4030 = vmatmul.msk.f32.gmra.mxu0 %vm1771_vm0, %v2042_v25 }
 0x2a8   : > { %4031 = vmatmul.msk.f32.gmra.mxu0 %vm1771_vm0, %v2043_v27 }
 0x2b0   : > { %4032 = vmatmul.msk.f32.gmra.mxu0 %vm1771_vm0, %v2044_v32 }
 0x2fd   : > { %v2104_v36 = vpop.f32.mrf.mxu0 }
 0x2fe   : > { %v2105_v38 = vadd.f32 %v2104_v36, %v1872_v34 }
 0x300   : > { %v2126_v40 = vsel %vm2125_vm4, %v2105_v38, -inf }
 0x301   : > { %2127 = vmax.xlane.f32.xlu0 %v2126_v40 }
 0x305   : > { %v2107_v44 = vpop.f32.mrf.mxu0 }
 0x306   : > { %v2108_v45 = vadd.f32 %v2107_v44, %v1873_v43 }
 0x308   : > { %v2129_v46 = vsel %vm2125_vm4, %v2108_v45, -inf }
 0x309   : > { %2130 = vmax.xlane.f32.xlu0 %v2129_v46 }
 0x30d   : > { %v2110_v48 = vpop.f32.mrf.mxu0 }
 0x30e   : > { %v2111_v49 = vadd.f32 %v2110_v48, %v1874_v47 }
 0x310   : > { %v2132_v50 = vsel %vm2125_vm4, %v2111_v49, -inf }
 0x311   : > { %2133 = vmax.xlane.f32.xlu1 %v2132_v50 }
 0x315   : > { %v2113_v52 = vpop.f32.mrf.mxu0 }
 0x316   : > { %v2114_v53 = vadd.f32 %v2113_v52, %v1875_v51 }
 0x318   : > { %v2135_v54 = vsel %vm2125_vm4, %v2114_v53, -inf }
 0x319   : > { %2136 = vmax.xlane.f32.xlu1 %v2135_v54 }
 0x31d   : > { %v2116_v56 = vpop.f32.mrf.mxu0 }
 0x31e   : > { %v2117_v57 = vadd.f32 %v2116_v56, %v1876_v55 }
 0x320   : > { %v2138_v58 = vsel %vm2125_vm4, %v2117_v57, -inf }
 0x321   : > { %2139 = vmax.xlane.f32.xlu2 %v2138_v58  ;;  %v3038_v58 = vld [vmem:[%s6241_s2 + $0x10] sm:$0xff] }
 0x325   : > { %v2119_v60 = vpop.f32.mrf.mxu0 }
 0x326   : > { %v2120_v61 = vadd.f32 %v2119_v60, %v1877_v59  ;;  %v3037_v59 = vld [vmem:[%s6241_s2 + $0x8] sm:$0xff]  ;;  %v3036_v60 = vld [vmem:[%s6241_s2] sm:$0xff]  ;;  %s6258_s2 = sld [smem:[#allocation41_spill]] }
 0x328   : > { %v2141_v62 = vsel %vm2125_vm4, %v2120_v61, -inf }
 0x329   : > { %2142 = vmax.xlane.f32.xlu2 %v2141_v62 }
 0x32d   : > { %v2122_v0 = vpop.f32.mrf.mxu0 }
 0x32e   : > { %v2123_v1 = vadd.f32 %v2122_v0, %v1878_v63  ;;  %v2270_v0 = vld [vmem:[%s6242_s22 + $0x18] sm:$0xff] }
 0x32f   : > { %2308 = vmatpush.msrb.mxu3 %v2270_v0 }
 0x330   : > { %v2145_v2 = vsel %vm2144_vm5, %v2123_v1, -inf }
 0x331   : > { %2146 = vmax.xlane.f32.xlu0 %v2145_v2  ;;  %v2268_v2 = vld [vmem:[%s6242_s22 + $0x8] sm:$0xff] }
 0x374   : > { %v2128_v5 = vpop.xlane.xlu0 %2127 }
 0x375   : > { %v2148_v6 = vsub.f32 %v2105_v38, %v2128_v5 }
 0x377   : > { %v2155_v7 = vmul.f32 1.442695, %v2148_v6 }
 0x379   : > { %4343 = vpow2.f32 %v2155_v7 }
 0x37c   : > { %v2131_v8 = vpop.xlane.xlu0 %2130 }
 0x37d   : > { %v2149_v9 = vsub.f32 %v2108_v45, %v2131_v8 }
 0x37f   : > { %v4344_v42 = vpop.eup %4343  ;;  %v2157_v10 = vmul.f32 1.442695, %v2149_v9 }
 0x380   : > { %v2169_v11 = vsel %vm2125_vm4, %v4344_v42, 0.0 }
 0x381   : > { %4345 = vpow2.f32 %v2157_v10  ;;  %2170 = vadd.xlane.f32.xlu1 %v2169_v11  ;;  %v2267_v11 = vld [vmem:[%s6242_s22] sm:$0xff] }
 0x384   : > { %v2134_v12 = vpop.xlane.xlu1 %2133 }
 0x385   : > { %v2150_v13 = vsub.f32 %v2111_v49, %v2134_v12 }
 0x387   : > { %v4346_v14 = vpop.eup %4345  ;;  %v2159_v15 = vmul.f32 1.442695, %v2150_v13 }
 0x388   : > { %v2172_v16 = vsel %vm2125_vm4, %v4346_v14, 0.0 }
 0x389   : > { %4347 = vpow2.f32 %v2159_v15  ;;  %2173 = vadd.xlane.f32.xlu2 %v2172_v16  ;;  %v3070_v15 = vld [vmem:[%s6243_s16 + $0x18] sm:$0xff]  ;;  %v3069_v16 = vld [vmem:[%s6243_s16 + $0x10] sm:$0xff] }
 0x38c   : > { %v2137_v17 = vpop.xlane.xlu1 %2136 }
 0x38d   : > { %v2151_v18 = vsub.f32 %v2114_v53, %v2137_v17  ;;  %v3068_v17 = vld [vmem:[%s6243_s16 + $0x8] sm:$0xff] }
 0x38f   : > { %v4348_v19 = vpop.eup %4347  ;;  %v2161_v20 = vmul.f32 1.442695, %v2151_v18 }
 0x390   : > { %v2175_v21 = vsel %vm2125_vm4, %v4348_v19, 0.0 }
 0x391   : > { %4349 = vpow2.f32 %v2161_v20  ;;  %2176 = vadd.xlane.f32.xlu0 %v2175_v21 }
 0x394   : > { %v2140_v22 = vpop.xlane.xlu2 %2139 }
 0x395   : > { %v2152_v23 = vsub.f32 %v2117_v57, %v2140_v22  ;;  %v3039_v57 = vld [vmem:[%s6240_s11 + $0x18] sm:$0xff]  ;;  %s6248_s11 = sld [smem:[#allocation62_spill]] }
 0x396   : > { %3059 = vmatpush.msra.mxu2 %v3039_v57 }
 0x397   : > { %v4350_v24 = vpop.eup %4349  ;;  %v2163_v25 = vmul.f32 1.442695, %v2152_v23  ;;  %v4319_v23 = vld [vmem:[#allocation13] ss:$0 sm:$0xff] }
 0x398   : > { %v2178_v26 = vsel %vm2125_vm4, %v4350_v24, 0.0  ;;  %3060 = vmatpush.msra.mxu2 %v3038_v58 }
 0x399   : > { %4351 = vpow2.f32 %v2163_v25  ;;  %2179 = vadd.xlane.f32.xlu1 %v2178_v26 }
 0x39a   : > { %3061 = vmatpush.msra.mxu2 %v3037_v59  ;;  %v4318_v59 = vld [vmem:[%s6244_s18] ss:$0 sm:$0xff]  ;;  %s6247_s18 = smov %s6246_s7 }
 0x39c   : > { %v2143_v27 = vpop.xlane.xlu2 %2142  ;;  %3062 = vmatpush.msra.mxu2 %v3036_v60 }
 0x39d   : > { %v2153_v28 = vsub.f32 %v2120_v61, %v2143_v27 }
 0x39f   : > { %v4352_v30 = vpop.eup %4351  ;;  %v2165_v32 = vmul.f32 1.442695, %v2153_v28 }
 0x3a0   : > { %v2181_v34 = vsel %vm2125_vm4, %v4352_v30, 0.0 }
 0x3a1   : > { %4353 = vpow2.f32 %v2165_v32  ;;  %2182 = vadd.xlane.f32.xlu2 %v2181_v34 }
 0x3a4   : > { %v2147_v36 = vpop.xlane.xlu0 %2146 }
 0x3a5   : > { %v2154_v38 = vsub.f32 %v2123_v1, %v2147_v36  ;;  %v2269_v1 = vld [vmem:[%s6242_s22 + $0x10] sm:$0xff] }
 0x3a6   : > { %2309 = vmatpush.msrb.mxu3 %v2269_v1 }
 0x3a7   : > { %v4354_v40 = vpop.eup %4353  ;;  %v2167_v43 = vmul.f32 1.442695, %v2154_v38 }
 0x3a8   : > { %v2184_v44 = vsel %vm2125_vm4, %v4354_v40, 0.0  ;;  %2310 = vmatpush.msrb.mxu3 %v2268_v2 }
 0x3a9   : > { %4355 = vpow2.f32 %v2167_v43  ;;  %2185 = vadd.xlane.f32.xlu0 %v2184_v44 }
 0x3aa   : > { %2311 = vmatpush.msrb.mxu3 %v2267_v11 }
 0x3ac   : > { %3087 = vmatpush.msra.mxu3 %v3070_v15 }
 0x3ae   : > { %3088 = vmatpush.msra.mxu3 %v3069_v16 }
 0x3af   : > { %v4356_v45 = vpop.eup %4355 }
 0x3b0   : > { %v2187_v46 = vsel %vm2144_vm5, %v4356_v45, 0.0  ;;  %3089 = vmatpush.msra.mxu3 %v3068_v17 }
 0x3b1   : > { %2188 = vadd.xlane.f32.xlu1 %v2187_v46 }
 0x3f4   : > { %v2171_v47 = vpop.xlane.xlu1 %2170 }
 0x3f5   : > { %4357 = vrcp.f32 %v2171_v47 }
 0x3fb   : > { %v4358_v48 = vpop.eup %4357 }
 0x3fc   : > { %v2174_v49 = vpop.xlane.xlu2 %2173  ;;  %v2197_v50 = vmul.f32 %v4358_v48, %v4344_v42 }
 0x3fd   : > { %4359 = vrcp.f32 %v2174_v49 }
 0x3fe   : > { %4034 = vmatmul.msk.f32.vlgmr.msrb.gmra.mxu2 %vm2125_vm4, %v2197_v50 }
 0x403   : > { %v4360_v51 = vpop.eup %4359 }
 0x404   : > { %v2177_v52 = vpop.xlane.xlu0 %2176  ;;  %v2198_v53 = vmul.f32 %v4360_v51, %v4346_v14 }
 0x405   : > { %4361 = vrcp.f32 %v2177_v52 }
 0x406   : > { %4035 = vmatmul.msk.f32.gmra.mxu2 %vm2125_vm4, %v2198_v53 }
 0x40b   : > { %v4362_v54 = vpop.eup %4361 }
 0x40c   : > { %v2180_v55 = vpop.xlane.xlu1 %2179  ;;  %v2199_v56 = vmul.f32 %v4362_v54, %v4348_v19  ;;  %v3067_v19 = vld [vmem:[%s6243_s16] sm:$0xff] }
 0x40d   : > { %4363 = vrcp.f32 %v2180_v55  ;;  %3090 = vmatpush.msra.mxu3 %v3067_v19 }
 0x40e   : > { %4036 = vmatmul.msk.f32.gmra.mxu2 %vm2125_vm4, %v2199_v56 }
 0x413   : > { %v4364_v61 = vpop.eup %4363 }
 0x414   : > { %v2183_v62 = vpop.xlane.xlu2 %2182  ;;  %v2200_v63 = vmul.f32 %v4364_v61, %v4350_v24 }
 0x415   : > { %4365 = vrcp.f32 %v2183_v62  ;;  %v4320_v62 = vld [vmem:[%s6245_s1] ss:$0 sm:$0xff]  ;;  %s6249_s1 = sld [smem:[#allocation59_spill]] }
 0x416   : > { %4037 = vmatmul.msk.f32.gmra.mxu2 %vm2125_vm4, %v2200_v63 }
 0x41b   : > { %v4366_v3 = vpop.eup %4365 }
 0x41c   : > { %v2186_v5 = vpop.xlane.xlu0 %2185  ;;  %v2201_v6 = vmul.f32 %v4366_v3, %v4352_v30  ;;  %v4943_v3 = vmov 32.0  }
 0x41d   : > { %4367 = vrcp.f32 %v2186_v5 }
 0x41e   : > { %4038 = vmatmul.msk.f32.gmra.mxu2 %vm2125_vm4, %v2201_v6 }
 0x423   : > { %v4368_v7 = vpop.eup %4367 }
 0x424   : > { %v2189_v8 = vpop.xlane.xlu1 %2188  ;;  %v2202_v9 = vmul.f32 %v4368_v7, %v4354_v40 }
 0x425   : > { %4369 = vrcp.f32 %v2189_v8 }
 0x426   : > { %4039 = vmatmul.msk.f32.gmra.mxu2 %vm2125_vm4, %v2202_v9  ;;  %4371 = vrcp.f32 %v4943_v3 }
 0x42b   : > { %v4370_v42 = vpop.eup %4369 }
 0x42c   : > { %v2203_v10 = vmul.f32 %v4370_v42, %v4356_v45  ;;  %v4372_v5 = vpop.eup %4371 }
 0x42d   : > { %v2365_v6 = vmul.f32 32.0, %v4372_v5  ;;  %vm2369_vm6 = vweird.f32 %v4372_v5 }
 0x42e   : > { %4040 = vmatmul.msk.f32.gmra.mxu2 %vm2125_vm4, %v2203_v10 }
 0x42f   : > { %v2366_v7 = vsub.f32 1.0, %v2365_v6 }
 0x431   : > { %v2367_v8 = vmul.f32 %v4372_v5, %v2366_v7  ;;  %v5703_v7 = vld [vmem:[#allocation11] ss:$0 sm:$0xff] }
 0x433   : > { %v2368_v9 = vadd.f32 %v4372_v5, %v2367_v8 }
 0x435   : > { %v5656_v42 = vsel %vm2369_vm6, %v4372_v5, %v2368_v9 }
 0x436   : > { %4062 = vmatmul.msk.f32.vlgmr.msra.gmra.mxu2 %vm1771_vm0, %v5588_v4 }
 0x481   : > { %v2246_v12 = vpop.f32.mrf.mxu2 }
 0x482   : > { %4041 = vmatmul.msk.f32.vlgmr.msrb.gmra.mxu3 %vm1771_vm0, %v2246_v12 }
 0x489   : > { %v2249_v13 = vpop.f32.mrf.mxu2 }
 0x48a   : > { %4042 = vmatmul.msk.f32.gmra.mxu3 %vm1771_vm0, %v2249_v13 }
 0x491   : > { %v2252_v14 = vpop.f32.mrf.mxu2 }
 0x492   : > { %4043 = vmatmul.msk.f32.gmra.mxu3 %vm1771_vm0, %v2252_v14 }
 0x499   : > { %v2255_v18 = vpop.f32.mrf.mxu2 }
 0x49a   : > { %4044 = vmatmul.msk.f32.gmra.mxu3 %vm1771_vm0, %v2255_v18 }
 0x4a1   : > { %v2258_v20 = vpop.f32.mrf.mxu2 }
 0x4a2   : > { %4045 = vmatmul.msk.f32.gmra.mxu3 %vm1771_vm0, %v2258_v20 }
 0x4a9   : > { %v2261_v21 = vpop.f32.mrf.mxu2 }
 0x4aa   : > { %4046 = vmatmul.msk.f32.gmra.mxu3 %vm1771_vm0, %v2261_v21 }
 0x4b1   : > { %v2264_v22 = vpop.f32.mrf.mxu2 }
 0x4b2   : > { %4047 = vmatmul.msk.f32.gmra.mxu3 %vm1771_vm0, %v2264_v22 }
 0x4b9   : > { %v3064_v60 = vpop.f32.mrf.mxu2 }
 0x4ba   : > { %4063 = vmatmul.msk.f32.vlgmr.msra.gmra.mxu3 %vm1771_vm0, %v5588_v4  ;;  %v3065_v63 = vadd.f32 %v4318_v59, %v3064_v60 }
 0x4bc   : > { %v3123_v2 = vmul.f32 0.17677669, %v3065_v63 }
 0x505   : > { %v2313_v24 = vpop.f32.mrf.mxu3 }
 0x506   : > { %v2314_v25 = vadd.f32 %v4319_v23, %v2313_v24 }
 0x508   : > { %v2334_v26 = vadd.f32 %v2314_v25, %v5478_v29 }
 0x50a   : > { %v2343_v27 = vsel %vm1771_vm0, %v2334_v26, 0.0 }
 0x50b   : > { %2344 = vadd.xlane.f32.xlu2 %v2343_v27 }
 0x50d   : > { %v2316_v28 = vpop.f32.mrf.mxu3 }
 0x50e   : > { %v2317_v30 = vadd.f32 %v4319_v23, %v2316_v28 }
 0x510   : > { %v2335_v32 = vadd.f32 %v2317_v30, %v5489_v31 }
 0x512   : > { %v2346_v34 = vsel %vm1771_vm0, %v2335_v32, 0.0 }
 0x513   : > { %2347 = vadd.xlane.f32.xlu0 %v2346_v34 }
 0x515   : > { %v2319_v36 = vpop.f32.mrf.mxu3 }
 0x516   : > { %v2320_v38 = vadd.f32 %v4319_v23, %v2319_v36 }
 0x518   : > { %v2336_v40 = vadd.f32 %v2320_v38, %v5500_v33 }
 0x51a   : > { %v2349_v43 = vsel %vm1771_vm0, %v2336_v40, 0.0 }
 0x51b   : > { %2350 = vadd.xlane.f32.xlu1 %v2349_v43 }
 0x51d   : > { %v2322_v44 = vpop.f32.mrf.mxu3 }
 0x51e   : > { %v2323_v45 = vadd.f32 %v4319_v23, %v2322_v44 }
 0x520   : > { %v2337_v46 = vadd.f32 %v2323_v45, %v5511_v35 }
 0x522   : > { %v2352_v47 = vsel %vm1771_vm0, %v2337_v46, 0.0 }
 0x523   : > { %2353 = vadd.xlane.f32.xlu2 %v2352_v47 }
 0x525   : > { %v2325_v48 = vpop.f32.mrf.mxu3 }
 0x526   : > { %v2326_v49 = vadd.f32 %v4319_v23, %v2325_v48 }
 0x528   : > { %v2338_v50 = vadd.f32 %v2326_v49, %v5522_v37 }
 0x52a   : > { %v2355_v51 = vsel %vm1771_vm0, %v2338_v50, 0.0 }
 0x52b   : > { %2356 = vadd.xlane.f32.xlu0 %v2355_v51 }
 0x52d   : > { %v2328_v52 = vpop.f32.mrf.mxu3 }
 0x52e   : > { %v2329_v53 = vadd.f32 %v4319_v23, %v2328_v52 }
 0x530   : > { %v2339_v54 = vadd.f32 %v2329_v53, %v5533_v39 }
 0x532   : > { %v2358_v55 = vsel %vm1771_vm0, %v2339_v54, 0.0 }
 0x533   : > { %2359 = vadd.xlane.f32.xlu1 %v2358_v55 }
 0x535   : > { %v2331_v56 = vpop.f32.mrf.mxu3 }
 0x536   : > { %v2332_v57 = vadd.f32 %v4319_v23, %v2331_v56 }
 0x538   : > { %v2340_v58 = vadd.f32 %v2332_v57, %v5544_v41 }
 0x53a   : > { %v2361_v61 = vsel %vm1837_vm2, %v2340_v58, 0.0 }
 0x53b   : > { %2362 = vadd.xlane.f32.xlu0 %v2361_v61 }
 0x53d   : > { %v3092_v0 = vpop.f32.mrf.mxu3 }
 0x53e   : > { %v3093_v1 = vadd.f32 %v4320_v62, %v3092_v0 }
 0x540   : > { %4065 = vmatpush.xpose.msk.msrb.mxu2 %vm1771_vm0, %v3093_v1 }
 0x543   : > { %4066 = vmatmul.msk.f32.vlgmr.msrb.gmra.mxu2 %vm1771_vm0, %v3123_v2 }
 0x57e   : > { %v2345_v10 = vpop.xlane.xlu2 %2344 }
 0x57f   : > { %v2371_v11 = vmul.f32 %v5656_v42, %v2345_v10 }
 0x581   : > { %v5659_v12 = vsub.f32 %v2334_v26, %v2371_v11  ;;  %v5706_v11 = vld [vmem:[#allocation10] ss:$0 sm:$0xff] }
 0x583   : > { %v2385_v13 = vmul.f32 %v5659_v12, %v5659_v12 }
 0x585   : > { %v2392_v14 = vsel %vm1771_vm0, %v2385_v13, 0.0 }
 0x586   : > { %2393 = vadd.xlane.f32.xlu2 %v2392_v14  ;;  %v2348_v15 = vpop.xlane.xlu0 %2347 }
 0x587   : > { %v2372_v16 = vmul.f32 %v5656_v42, %v2348_v15 }
 0x589   : > { %v5665_v17 = vsub.f32 %v2335_v32, %v2372_v16 }
 0x58b   : > { %v2386_v18 = vmul.f32 %v5665_v17, %v5665_v17 }
 0x58d   : > { %v2395_v19 = vsel %vm1771_vm0, %v2386_v18, 0.0 }
 0x58e   : > { %v2351_v20 = vpop.xlane.xlu1 %2350  ;;  %2396 = vadd.xlane.f32.xlu1 %v2395_v19 }
 0x58f   : > { %v2373_v21 = vmul.f32 %v5656_v42, %v2351_v20 }
 0x591   : > { %v5671_v22 = vsub.f32 %v2336_v40, %v2373_v21 }
 0x593   : > { %v2387_v23 = vmul.f32 %v5671_v22, %v5671_v22 }
 0x595   : > { %v2398_v24 = vsel %vm1771_vm0, %v2387_v23, 0.0 }
 0x596   : > { %2399 = vadd.xlane.f32.xlu2 %v2398_v24  ;;  %v2354_v25 = vpop.xlane.xlu2 %2353 }
 0x597   : > { %v2374_v26 = vmul.f32 %v5656_v42, %v2354_v25 }
 0x599   : > { %v5677_v27 = vsub.f32 %v2337_v46, %v2374_v26 }
 0x59b   : > { %v2388_v28 = vmul.f32 %v5677_v27, %v5677_v27 }
 0x59d   : > { %v2401_v30 = vsel %vm1771_vm0, %v2388_v28, 0.0 }
 0x59e   : > { %2402 = vadd.xlane.f32.xlu0 %v2401_v30  ;;  %v2357_v32 = vpop.xlane.xlu0 %2356 }
 0x59f   : > { %v2375_v34 = vmul.f32 %v5656_v42, %v2357_v32 }
 0x5a1   : > { %v5683_v36 = vsub.f32 %v2338_v50, %v2375_v34 }
 0x5a3   : > { %v2389_v38 = vmul.f32 %v5683_v36, %v5683_v36 }
 0x5a5   : > { %v2404_v40 = vsel %vm1771_vm0, %v2389_v38, 0.0 }
 0x5a6   : > { %v2360_v43 = vpop.xlane.xlu1 %2359  ;;  %2405 = vadd.xlane.f32.xlu1 %v2404_v40 }
 0x5a7   : > { %v2376_v44 = vmul.f32 %v5656_v42, %v2360_v43 }
 0x5a9   : > { %v5689_v45 = vsub.f32 %v2339_v54, %v2376_v44 }
 0x5ab   : > { %v2390_v46 = vmul.f32 %v5689_v45, %v5689_v45 }
 0x5ad   : > { %v2407_v47 = vsel %vm1771_vm0, %v2390_v46, 0.0 }
 0x5ae   : > { %2408 = vadd.xlane.f32.xlu2 %v2407_v47  ;;  %v2363_v48 = vpop.xlane.xlu0 %2362 }
 0x5af   : > { %v2377_v49 = vmul.f32 %v5656_v42, %v2363_v48 }
 0x5b1   : > { %v5695_v50 = vsub.f32 %v2340_v58, %v2377_v49 }
 0x5b3   : > { %v2391_v51 = vmul.f32 %v5695_v50, %v5695_v50 }
 0x5b5   : > { %v2410_v52 = vsel %vm1837_vm2, %v2391_v51, 0.0 }
 0x5b6   : > { %2411 = vadd.xlane.f32.xlu0 %v2410_v52 }
 0x5f9   : > { %v2394_v53 = vpop.xlane.xlu2 %2393 }
 0x5fa   : > { %v2413_v54 = vmul.f32 %v2394_v53, %v5656_v42 }
 0x5fc   : > { %v2420_v55 = vadd.f32 1e-05, %v2413_v54 }
 0x5fe   : > { %4373 = vrsqrt.f32 %v2420_v55  ;;  %vm2433_vm8 = vweird.f32 %v2420_v55 }
 0x601   : > { %v2397_v56 = vpop.xlane.xlu1 %2396 }
 0x602   : > { %v2414_v57 = vmul.f32 %v2397_v56, %v5656_v42 }
 0x604   : > { %v4374_v59 = vpop.eup %4373  ;;  %v2421_v60 = vadd.f32 1e-05, %v2414_v57 }
 0x605   : > { %v2428_v61 = vmul.f32 %v4374_v59, %v2420_v55  ;;  %vm2434_vm7 = vweird.f32 %v4374_v59 }
 0x606   : > { %4375 = vrsqrt.f32 %v2421_v60  ;;  %vm2435_vm9 = vmor %vm2433_vm8, %vm2434_vm7  ;;  %vm2443_vm11 = vweird.f32 %v2421_v60 }
 0x607   : > { %v2429_v58 = vmul.f32 %v4374_v59, %v2428_v61 }
 0x609   : > { %v2430_v62 = vmul.f32 0.5, %v2429_v58  ;;  %v2400_v63 = vpop.xlane.xlu2 %2399 }
 0x60a   : > { %v2415_v0 = vmul.f32 %v2400_v63, %v5656_v42 }
 0x60b   : > { %v2431_v1 = vsub.f32 1.5, %v2430_v62 }
 0x60c   : > { %v4376_v2 = vpop.eup %4375  ;;  %v2422_v3 = vadd.f32 1e-05, %v2415_v0 }
 0x60d   : > { %v2432_v5 = vmul.f32 %v4374_v59, %v2431_v1  ;;  %v2438_v6 = vmul.f32 %v4376_v2, %v2421_v60  ;;  %vm2444_vm10 = vweird.f32 %v4376_v2 }
 0x60e   : > { %4377 = vrsqrt.f32 %v2422_v3  ;;  %vm2445_vm12 = vmor %vm2443_vm11, %vm2444_vm10  ;;  %vm2453_vm14 = vweird.f32 %v2422_v3 }
 0x60f   : > { %v2436_v8 = vsel %vm2435_vm9, %v4374_v59, %v2432_v5  ;;  %v2439_v9 = vmul.f32 %v4376_v2, %v2438_v6 }
 0x610   : > { %v2497_v10 = vmul.f32 %v2436_v8, %v5659_v12 }
 0x611   : > { %v2440_v13 = vmul.f32 0.5, %v2439_v9  ;;  %v2403_v14 = vpop.xlane.xlu0 %2402 }
 0x612   : > { %v2416_v15 = vmul.f32 %v2403_v14, %v5656_v42  ;;  %v2507_v16 = vmul.f32 %v5703_v7, %v2497_v10 }
 0x613   : > { %v2441_v18 = vsub.f32 1.5, %v2440_v13 }
 0x614   : > { %v4378_v19 = vpop.eup %4377  ;;  %v2423_v20 = vadd.f32 1e-05, %v2416_v15  ;;  %v2517_v21 = vadd.f32 %v5706_v11, %v2507_v16 }
 0x615   : > { %v2442_v23 = vmul.f32 %v4376_v2, %v2441_v18  ;;  %v2448_v24 = vmul.f32 %v4378_v19, %v2422_v3  ;;  %vm2454_vm13 = vweird.f32 %v4378_v19 }
 0x616   : > { %4379 = vrsqrt.f32 %v2423_v20  ;;  %v5712_v12 = vadd.f32 %v2517_v21, %v5478_v29  ;;  %vm2455_vm15 = vmor %vm2453_vm14, %vm2454_vm13  ;;  %vm2463_vm5 = vweird.f32 %v2423_v20 }
 0x617   : > { %v2446_v25 = vsel %vm2445_vm12, %v4376_v2, %v2442_v23  ;;  %v2449_v26 = vmul.f32 %v4378_v19, %v2448_v24 }
 0x618   : > { %v2533_v28 = vsel %vm1771_vm0, %v5712_v12, 0.0  ;;  %v2498_v30 = vmul.f32 %v2446_v25, %v5665_v17 }
 0x619   : > { %v2450_v32 = vmul.f32 0.5, %v2449_v26  ;;  %2534 = vadd.xlane.f32.xlu1 %v2533_v28  ;;  %v2406_v34 = vpop.xlane.xlu1 %2405 }
 0x61a   : > { %v2417_v38 = vmul.f32 %v2406_v34, %v5656_v42  ;;  %v2508_v40 = vmul.f32 %v5703_v7, %v2498_v30 }
 0x61b   : > { %v2451_v43 = vsub.f32 1.5, %v2450_v32 }
 0x61c   : > { %v4380_v44 = vpop.eup %4379  ;;  %v2424_v46 = vadd.f32 1e-05, %v2417_v38  ;;  %v2518_v29 = vadd.f32 %v5706_v11, %v2508_v40 }
 0x61d   : > { %v2452_v47 = vmul.f32 %v4378_v19, %v2451_v43  ;;  %v2458_v48 = vmul.f32 %v4380_v44, %v2423_v20  ;;  %vm2464_vm1 = vweird.f32 %v4380_v44 }
 0x61e   : > { %4381 = vrsqrt.f32 %v2424_v46  ;;  %v5721_v17 = vadd.f32 %v2518_v29, %v5489_v31  ;;  %vm2465_vm6 = vmor %vm2463_vm5, %vm2464_vm1  ;;  %vm2473_vm8 = vweird.f32 %v2424_v46  ;;  %vm3150_vm1 = vcmask 64512  }
 0x61f   : > { %v2456_v49 = vsel %vm2455_vm15, %v4378_v19, %v2452_v47  ;;  %v2459_v51 = vmul.f32 %v4380_v44, %v2458_v48 }
 0x620   : > { %v2536_v52 = vsel %vm1771_vm0, %v5721_v17, 0.0  ;;  %v2499_v53 = vmul.f32 %v2456_v49, %v5671_v22 }
 0x621   : > { %v2460_v54 = vmul.f32 0.5, %v2459_v51  ;;  %v2409_v55 = vpop.xlane.xlu2 %2408  ;;  %2537 = vadd.xlane.f32.xlu2 %v2536_v52 }
 0x622   : > { %v2418_v56 = vmul.f32 %v2409_v55, %v5656_v42  ;;  %v2509_v57 = vmul.f32 %v5703_v7, %v2499_v53 }
 0x623   : > { %v2461_v59 = vsub.f32 1.5, %v2460_v54 }
 0x624   : > { %v4382_v60 = vpop.eup %4381  ;;  %v2425_v61 = vadd.f32 1e-05, %v2418_v56  ;;  %v2519_v31 = vadd.f32 %v5706_v11, %v2509_v57 }
 0x625   : > { %v2462_v58 = vmul.f32 %v4380_v44, %v2461_v59  ;;  %v2468_v62 = vmul.f32 %v4382_v60, %v2424_v46  ;;  %vm2474_vm7 = vweird.f32 %v4382_v60 }
 0x626   : > { %4383 = vrsqrt.f32 %v2425_v61  ;;  %v5730_v22 = vadd.f32 %v2519_v31, %v5500_v33  ;;  %vm2475_vm9 = vmor %vm2473_vm8, %vm2474_vm7  ;;  %vm2483_vm11 = vweird.f32 %v2425_v61 }
 0x627   : > { %v2466_v63 = vsel %vm2465_vm6, %v4380_v44, %v2462_v58  ;;  %v2469_v0 = vmul.f32 %v4382_v60, %v2468_v62 }
 0x628   : > { %v2539_v1 = vsel %vm1771_vm0, %v5730_v22, 0.0  ;;  %v2500_v2 = vmul.f32 %v2466_v63, %v5677_v27 }
 0x629   : > { %v2470_v3 = vmul.f32 0.5, %v2469_v0  ;;  %2540 = vadd.xlane.f32.xlu0 %v2539_v1  ;;  %v2412_v5 = vpop.xlane.xlu0 %2411 }
 0x62a   : > { %v2419_v6 = vmul.f32 %v2412_v5, %v5656_v42  ;;  %v2510_v8 = vmul.f32 %v5703_v7, %v2500_v2 }
 0x62b   : > { %v2471_v9 = vsub.f32 1.5, %v2470_v3 }
 0x62c   : > { %v4384_v10 = vpop.eup %4383  ;;  %v2426_v13 = vadd.f32 1e-05, %v2419_v6  ;;  %v2520_v33 = vadd.f32 %v5706_v11, %v2510_v8 }
 0x62d   : > { %v2472_v14 = vmul.f32 %v4382_v60, %v2471_v9  ;;  %v2478_v15 = vmul.f32 %v4384_v10, %v2425_v61  ;;  %vm2484_vm10 = vweird.f32 %v4384_v10 }
 0x62e   : > { %4385 = vrsqrt.f32 %v2426_v13  ;;  %v2527_v27 = vadd.f32 %v2520_v33, %v5511_v35  ;;  %vm2485_vm12 = vmor %vm2483_vm11, %vm2484_vm10  ;;  %vm2493_vm14 = vweird.f32 %v2426_v13 }
 0x62f   : > { %v2476_v16 = vsel %vm2475_vm9, %v4382_v60, %v2472_v14  ;;  %v2479_v18 = vmul.f32 %v4384_v10, %v2478_v15 }
 0x630   : > { %v2542_v19 = vsel %vm1771_vm0, %v2527_v27, 0.0  ;;  %v2501_v20 = vmul.f32 %v2476_v16, %v5683_v36 }
 0x631   : > { %v2480_v21 = vmul.f32 0.5, %v2479_v18  ;;  %2543 = vadd.xlane.f32.xlu1 %v2542_v19 }
 0x632   : > { %v2511_v23 = vmul.f32 %v5703_v7, %v2501_v20 }
 0x633   : > { %v2481_v24 = vsub.f32 1.5, %v2480_v21  ;;  %v2710_v21 = vld [vmem:[%s6246_s7 + $0x18] sm:$0xff]  ;;  %s6250_s7 = sld [smem:[#allocation64_spill]] }
 0x634   : > { %v4386_v25 = vpop.eup %4385  ;;  %v2521_v26 = vadd.f32 %v5706_v11, %v2511_v23  ;;  %2748 = vmatpush.msra.mxu1 %v2710_v21  ;;  %v2709_v23 = vld [vmem:[%s6247_s18 + $0x10] sm:$0xff] }
 0x635   : > { %v2482_v28 = vmul.f32 %v4384_v10, %v2481_v24  ;;  %v2488_v30 = vmul.f32 %v4386_v25, %v2426_v13  ;;  %vm2494_vm13 = vweird.f32 %v4386_v25  ;;  %v5791_v13 = vpop.f32.mrf.mxu2  ;;  %v2708_v24 = vld [vmem:[%s6247_s18 + $0x8] sm:$0xff] }
 0x636   : > { %v2528_v35 = vadd.f32 %v2521_v26, %v5522_v37  ;;  %vm2495_vm15 = vmor %vm2493_vm14, %vm2494_vm13  ;;  %v3151_v14 = vsel %vm3150_vm1, %v5791_v13, -inf  ;;  %2749 = vmatpush.msra.mxu1 %v2709_v23 }
 0x637   : > { %v2486_v32 = vsel %vm2485_vm12, %v4384_v10, %v2482_v28  ;;  %v2489_v34 = vmul.f32 %v4386_v25, %v2488_v30 }
 0x638   : > { %v2545_v38 = vsel %vm1771_vm0, %v2528_v35, 0.0  ;;  %v2502_v36 = vmul.f32 %v2486_v32, %v5689_v45  ;;  %2750 = vmatpush.msra.mxu1 %v2708_v24 }
 0x639   : > { %v2490_v40 = vmul.f32 0.5, %v2489_v34  ;;  %2546 = vadd.xlane.f32.xlu2 %v2545_v38  ;;  %s6251_s9 = smov %s6250_s7 }
 0x63a   : > { %v2512_v43 = vmul.f32 %v5703_v7, %v2502_v36 }
 0x63b   : > { %v2491_v44 = vsub.f32 1.5, %v2490_v40 }
 0x63c   : > { %v2522_v46 = vadd.f32 %v5706_v11, %v2512_v43 }
 0x63d   : > { %v2492_v29 = vmul.f32 %v4386_v25, %v2491_v44 }
 0x63e   : > { %v2529_v47 = vadd.f32 %v2522_v46, %v5533_v39 }
 0x63f   : > { %v2496_v37 = vsel %vm2495_vm15, %v4386_v25, %v2492_v29  ;;  %v2707_v25 = vld [vmem:[%s6247_s18] sm:$0xff] }
 0x640   : > { %v2548_v48 = vsel %vm1771_vm0, %v2529_v47, 0.0  ;;  %v2503_v49 = vmul.f32 %v2496_v37, %v5695_v50  ;;  %2751 = vmatpush.msra.mxu1 %v2707_v25 }
 0x641   : > { %2549 = vadd.xlane.f32.xlu0 %v2548_v48 }
 0x642   : > { %v2513_v45 = vmul.f32 %v5703_v7, %v2503_v49 }
 0x644   : > { %v2523_v51 = vadd.f32 %v5706_v11, %v2513_v45  ;;  %v5811_v45 = vld [vmem:[#allocation2] ss:$0 sm:$0xff] }
 0x646   : > { %v2530_v52 = vadd.f32 %v2523_v51, %v5544_v41 }
 0x648   : > { %v2551_v53 = vsel %vm1837_vm2, %v2530_v52, 0.0 }
 0x649   : > { %2552 = vadd.xlane.f32.xlu2 %v2551_v53 }
 0x68c   : > { %v2535_v54 = vpop.xlane.xlu1 %2534 }
 0x68d   : > { %v2554_v55 = vmul.f32 %v2535_v54, %v5656_v42  ;;  %v5815_v54 = vld [vmem:[%s6248_s11] ss:$0 sm:$0xff]  ;;  %s6252_s11 = sld [smem:[#allocation58_spill]] }
 0x68f   : > { %v5757_v39 = vsub.f32 %v5712_v12, %v2554_v55 }
 0x691   : > { %v2568_v56 = vmul.f32 %v5757_v39, %v5757_v39 }
 0x693   : > { %v2575_v50 = vsel %vm1771_vm0, %v2568_v56, 0.0 }
 0x694   : > { %v2538_v57 = vpop.xlane.xlu2 %2537  ;;  %2576 = vadd.xlane.f32.xlu1 %v2575_v50 }
 0x695   : > { %v2555_v7 = vmul.f32 %v2538_v57, %v5656_v42 }
 0x697   : > { %v5764_v41 = vsub.f32 %v5721_v17, %v2555_v7 }
 0x699   : > { %v2569_v11 = vmul.f32 %v5764_v41, %v5764_v41 }
 0x69b   : > { %v2578_v59 = vsel %vm1771_vm0, %v2569_v11, 0.0 }
 0x69c   : > { %2579 = vadd.xlane.f32.xlu0 %v2578_v59  ;;  %v2541_v12 = vpop.xlane.xlu0 %2540 }
 0x69d   : > { %v2556_v60 = vmul.f32 %v2541_v12, %v5656_v42 }
 0x69f   : > { %v5771_v61 = vsub.f32 %v5730_v22, %v2556_v60 }
 0x6a1   : > { %v2570_v31 = vmul.f32 %v5771_v61, %v5771_v61 }
 0x6a3   : > { %v2581_v58 = vsel %vm1771_vm0, %v2570_v31, 0.0 }
 0x6a4   : > { %v2544_v62 = vpop.xlane.xlu1 %2543  ;;  %2582 = vadd.xlane.f32.xlu1 %v2581_v58 }
 0x6a5   : > { %v2557_v17 = vmul.f32 %v2544_v62, %v5656_v42 }
 0x6a7   : > { %v5777_v63 = vsub.f32 %v2527_v27, %v2557_v17 }
 0x6a9   : > { %v2571_v0 = vmul.f32 %v5777_v63, %v5777_v63 }
 0x6ab   : > { %v2584_v1 = vsel %vm1771_vm0, %v2571_v0, 0.0 }
 0x6ac   : > { %v2547_v2 = vpop.xlane.xlu2 %2546  ;;  %2585 = vadd.xlane.f32.xlu2 %v2584_v1 }
 0x6ad   : > { %v2558_v22 = vmul.f32 %v2547_v2, %v5656_v42 }
 0x6af   : > { %v5783_v3 = vsub.f32 %v2528_v35, %v2558_v22 }
 0x6b1   : > { %v2572_v5 = vmul.f32 %v5783_v3, %v5783_v3 }
 0x6b3   : > { %v2587_v6 = vsel %vm1771_vm0, %v2572_v5, 0.0 }
 0x6b4   : > { %2588 = vadd.xlane.f32.xlu0 %v2587_v6  ;;  %v2550_v8 = vpop.xlane.xlu0 %2549 }
 0x6b5   : > { %v2559_v9 = vmul.f32 %v2550_v8, %v5656_v42 }
 0x6b7   : > { %v5789_v10 = vsub.f32 %v2529_v47, %v2559_v9 }
 0x6b9   : > { %v2573_v33 = vmul.f32 %v5789_v10, %v5789_v10 }
 0x6bb   : > { %v2590_v15 = vsel %vm1771_vm0, %v2573_v33, 0.0 }
 0x6bc   : > { %3152 = vmax.xlane.f32.xlu0 %v3151_v14  ;;  %v2553_v27 = vpop.xlane.xlu2 %2552  ;;  %2591 = vadd.xlane.f32.xlu1 %v2590_v15  ;;  %v3098_v15 = vld [vmem:[%s6249_s1 + $0x18] sm:$0xff] }
 0x6bd   : > { %v2560_v16 = vmul.f32 %v2553_v27, %v5656_v42  ;;  %v3097_v27 = vld [vmem:[%s6249_s1 + $0x10] sm:$0xff]  ;;  %3115 = vmatpush.msrb.mxu1 %v3098_v15 }
 0x6bf   : > { %v5799_v18 = vsub.f32 %v2530_v52, %v2560_v16  ;;  %3116 = vmatpush.msrb.mxu1 %v3097_v27 }
 0x6c1   : > { %v2574_v19 = vmul.f32 %v5799_v18, %v5799_v18 }
 0x6c3   : > { %v2593_v20 = vsel %vm1837_vm2, %v2574_v19, 0.0 }
 0x6c4   : > { %2594 = vadd.xlane.f32.xlu2 %v2593_v20 }
 0x707   : > { %v2577_v26 = vpop.xlane.xlu1 %2576 }
 0x708   : > { %v2596_v28 = vmul.f32 %v2577_v26, %v5656_v42 }
 0x70a   : > { %v2603_v30 = vadd.f32 1e-05, %v2596_v28 }
 0x70c   : > { %4387 = vrsqrt.f32 %v2603_v30  ;;  %vm2616_vm6 = vweird.f32 %v2603_v30 }
 0x70f   : > { %v2580_v35 = vpop.xlane.xlu0 %2579 }
 0x710   : > { %v2597_v32 = vmul.f32 %v2580_v35, %v5656_v42 }
 0x712   : > { %v4388_v34 = vpop.eup %4387  ;;  %v2604_v38 = vadd.f32 1e-05, %v2597_v32 }
 0x713   : > { %v2611_v36 = vmul.f32 %v4388_v34, %v2603_v30  ;;  %vm2617_vm5 = vweird.f32 %v4388_v34 }
 0x714   : > { %4389 = vrsqrt.f32 %v2604_v38  ;;  %vm2618_vm7 = vmor %vm2616_vm6, %vm2617_vm5  ;;  %vm2626_vm9 = vweird.f32 %v2604_v38 }
 0x715   : > { %v2612_v40 = vmul.f32 %v4388_v34, %v2611_v36 }
 0x717   : > { %v2613_v43 = vmul.f32 0.5, %v2612_v40  ;;  %v2583_v44 = vpop.xlane.xlu1 %2582 }
 0x718   : > { %v2598_v46 = vmul.f32 %v2583_v44, %v5656_v42 }
 0x719   : > { %v2614_v29 = vsub.f32 1.5, %v2613_v43 }
 0x71a   : > { %v4390_v47 = vpop.eup %4389  ;;  %v2605_v37 = vadd.f32 1e-05, %v2598_v46 }
 0x71b   : > { %v2615_v48 = vmul.f32 %v4388_v34, %v2614_v29  ;;  %v2621_v49 = vmul.f32 %v4390_v47, %v2604_v38  ;;  %vm2627_vm8 = vweird.f32 %v4390_v47  ;;  %v3095_v38 = vld [vmem:[%s6249_s1] sm:$0xff] }
 0x71c   : > { %4391 = vrsqrt.f32 %v2605_v37  ;;  %vm2628_vm10 = vmor %vm2626_vm9, %vm2627_vm8  ;;  %vm2636_vm12 = vweird.f32 %v2605_v37 }
 0x71d   : > { %v2619_v51 = vsel %vm2618_vm7, %v4388_v34, %v2615_v48  ;;  %v2622_v52 = vmul.f32 %v4390_v47, %v2621_v49 }
 0x71e   : > { %v2680_v53 = vmul.f32 %v2619_v51, %v5757_v39 }
 0x71f   : > { %v2623_v55 = vmul.f32 0.5, %v2622_v52  ;;  %v2586_v56 = vpop.xlane.xlu2 %2585 }
 0x720   : > { %v2690_v50 = vmul.f32 %v5811_v45, %v2680_v53  ;;  %v2599_v57 = vmul.f32 %v2586_v56, %v5656_v42  ;;  %v2788_v56 = vld [vmem:[%s6250_s7 + $0x38] sm:$0xff]  ;;  %s6253_s7 = sld [smem:[#allocation55_spill]] }
 0x721   : > { %v2624_v7 = vsub.f32 1.5, %v2623_v55  ;;  %2823 = vmatpush.msra.mxu0 %v2788_v56 }
 0x722   : > { %v4392_v11 = vpop.eup %4391  ;;  %v2606_v59 = vadd.f32 1e-05, %v2599_v57  ;;  %v5820_v12 = vadd.f32 %v5815_v54, %v2690_v50  ;;  %v2787_v50 = vld [vmem:[%s6251_s9 + $0x30] sm:$0xff] }
 0x723   : > { %v2625_v60 = vmul.f32 %v4390_v47, %v2624_v7  ;;  %v2631_v31 = vmul.f32 %v4392_v11, %v2605_v37  ;;  %vm2637_vm11 = vweird.f32 %v4392_v11  ;;  %2824 = vmatpush.msra.mxu0 %v2787_v50  ;;  %v4327_v50 = vld [vmem:[#allocation7] ss:$0 sm:$0xff] }
 0x724   : > { %4393 = vrsqrt.f32 %v2606_v59  ;;  %4048 = vmatmul.msk.f32.vlgmr.msra.gmra.mxu1 %vm1771_vm0, %v5820_v12  ;;  %vm2638_vm13 = vmor %vm2636_vm12, %vm2637_vm11  ;;  %vm2646_vm15 = vweird.f32 %v2606_v59 }
 0x725   : > { %v2629_v39 = vsel %vm2628_vm10, %v4390_v47, %v2625_v60  ;;  %v2632_v58 = vmul.f32 %v4392_v11, %v2631_v31 }
 0x726   : > { %v2681_v62 = vmul.f32 %v2629_v39, %v5764_v41  ;;  %v2785_v39 = vld [vmem:[%s6251_s9 + $0x20] sm:$0xff] }
 0x727   : > { %v2633_v17 = vmul.f32 0.5, %v2632_v58  ;;  %v2589_v0 = vpop.xlane.xlu0 %2588 }
 0x728   : > { %v2600_v1 = vmul.f32 %v2589_v0, %v5656_v42  ;;  %v2691_v2 = vmul.f32 %v5811_v45, %v2681_v62  ;;  %v2784_v0 = vld [vmem:[%s6251_s9 + $0x18] sm:$0xff] }
 0x729   : > { %v2634_v22 = vsub.f32 1.5, %v2633_v17 }
 0x72a   : > { %v4394_v5 = vpop.eup %4393  ;;  %v2607_v6 = vadd.f32 1e-05, %v2600_v1  ;;  %v5828_v8 = vadd.f32 %v5815_v54, %v2691_v2 }
 0x72b   : > { %v2635_v9 = vmul.f32 %v4392_v11, %v2634_v22  ;;  %v2641_v33 = vmul.f32 %v4394_v5, %v2606_v59  ;;  %vm2647_vm14 = vweird.f32 %v4394_v5  ;;  %v2786_v59 = vld [vmem:[%s6251_s9 + $0x28] sm:$0xff] }
 0x72c   : > { %4395 = vrsqrt.f32 %v2607_v6  ;;  %4049 = vmatmul.msk.f32.gmra.mxu1 %vm1771_vm0, %v5828_v8  ;;  %vm2648_vm5 = vmor %vm2646_vm15, %vm2647_vm14  ;;  %vm2656_vm7 = vweird.f32 %v2607_v6  ;;  %2825 = vmatpush.msra.mxu0 %v2786_v59  ;;  %vm2793_vm15 = vcmask 523264  }
 0x72d   : > { %v2639_v41 = vsel %vm2638_vm13, %v4392_v11, %v2635_v9  ;;  %v2642_v14 = vmul.f32 %v4394_v5, %v2641_v33 }
 0x72e   : > { %v2682_v16 = vmul.f32 %v2639_v41, %v5771_v61  ;;  %2826 = vmatpush.msra.mxu0 %v2785_v39 }
 0x72f   : > { %v2643_v19 = vmul.f32 0.5, %v2642_v14  ;;  %v2592_v20 = vpop.xlane.xlu1 %2591  ;;  %v3153_v21 = vpop.xlane.xlu0 %3152 }
 0x730   : > { %v2601_v23 = vmul.f32 %v2592_v20, %v5656_v42  ;;  %v3154_v24 = vsub.f32 %v5791_v13, %v3153_v21  ;;  %v2692_v25 = vmul.f32 %v5811_v45, %v2682_v16  ;;  %v3096_v13 = vld [vmem:[%s6249_s1 + $0x8] sm:$0xff]  ;;  %2827 = vmatpush.msra.mxu0 %v2784_v0  ;;  %v2781_v21 = vld [vmem:[%s6251_s9] sm:$0xff]  ;;  %s6254_s1 = smov %s6253_s7 }
 0x731   : > { %v2644_v26 = vsub.f32 1.5, %v2643_v19  ;;  %3117 = vmatpush.msrb.mxu1 %v3096_v13  ;;  %v2783_v19 = vld [vmem:[%s6251_s9 + $0x10] sm:$0xff]  ;;  %v2782_v20 = vld [vmem:[%s6251_s9 + $0x8] sm:$0xff] }
 0x732   : > { %v4396_v28 = vpop.eup %4395  ;;  %v2608_v30 = vadd.f32 1e-05, %v2601_v23  ;;  %v3155_v35 = vmul.f32 1.442695, %v3154_v24  ;;  %v5839_v61 = vadd.f32 %v5815_v54, %v2692_v25  ;;  %2828 = vmatpush.msra.mxu0 %v2783_v19  ;;  %v4325_v23 = vld [vmem:[#allocation5] ss:$0 sm:$0xff] }
 0x733   : > { %v2645_v32 = vmul.f32 %v4394_v5, %v2644_v26  ;;  %v2651_v34 = vmul.f32 %v4396_v28, %v2607_v6  ;;  %3118 = vmatpush.msrb.mxu1 %v3095_v38  ;;  %vm2657_vm6 = vweird.f32 %v4396_v28 }
 0x734   : > { %4397 = vrsqrt.f32 %v2608_v30  ;;  %4050 = vmatmul.msk.f32.gmra.mxu1 %vm1771_vm0, %v5839_v61  ;;  %vm2658_vm8 = vmor %vm2656_vm7, %vm2657_vm6  ;;  %vm2666_vm10 = vweird.f32 %v2608_v30  ;;  %2829 = vmatpush.msra.mxu0 %v2782_v20 }
 0x735   : > { %v2649_v36 = vsel %vm2648_vm5, %v4394_v5, %v2645_v32  ;;  %v2652_v40 = vmul.f32 %v4396_v28, %v2651_v34  ;;  %4399 = vpow2.f32 %v3155_v35 }
 0x736   : > { %v2683_v43 = vmul.f32 %v2649_v36, %v5777_v63  ;;  %2830 = vmatpush.msra.mxu0 %v2781_v21 }
 0x737   : > { %v2653_v44 = vmul.f32 0.5, %v2652_v40  ;;  %v2595_v46 = vpop.xlane.xlu2 %2594 }
 0x738   : > { %v2602_v29 = vmul.f32 %v2595_v46, %v5656_v42  ;;  %v2693_v47 = vmul.f32 %v5811_v45, %v2683_v43 }
 0x739   : > { %v2654_v37 = vsub.f32 1.5, %v2653_v44 }
 0x73a   : > { %v4398_v48 = vpop.eup %4397  ;;  %v2609_v49 = vadd.f32 1e-05, %v2602_v29  ;;  %v5849_v51 = vadd.f32 %v5815_v54, %v2693_v47 }
 0x73b   : > { %v5851_v52 = vpop.eup %4399  ;;  %v2655_v63 = vmul.f32 %v4396_v28, %v2654_v37  ;;  %v2661_v53 = vmul.f32 %v4398_v48, %v2608_v30  ;;  %vm2667_vm9 = vweird.f32 %v4398_v48 }
 0x73c   : > { %4401 = vrsqrt.f32 %v2609_v49  ;;  %4051 = vmatmul.msk.f32.gmra.mxu1 %vm1771_vm0, %v5849_v51  ;;  %v3157_v55 = vsel %vm3150_vm1, %v5851_v52, 0.0  ;;  %vm2668_vm11 = vmor %vm2666_vm10, %vm2667_vm9  ;;  %vm2676_vm13 = vweird.f32 %v2609_v49 }
 0x73d   : > { %v2659_v57 = vsel %vm2658_vm8, %v4396_v28, %v2655_v63  ;;  %v2662_v7 = vmul.f32 %v4398_v48, %v2661_v53  ;;  %3158 = vadd.xlane.f32.xlu1 %v3157_v55 }
 0x73e   : > { %v2684_v11 = vmul.f32 %v2659_v57, %v5783_v3 }
 0x73f   : > { %v2663_v60 = vmul.f32 0.5, %v2662_v7 }
 0x740   : > { %v2694_v31 = vmul.f32 %v5811_v45, %v2684_v11 }
 0x741   : > { %v2664_v58 = vsub.f32 1.5, %v2663_v60 }
 0x742   : > { %v4402_v62 = vpop.eup %4401  ;;  %v5864_v17 = vadd.f32 %v5815_v54, %v2694_v31 }
 0x743   : > { %v2665_v1 = vmul.f32 %v4398_v48, %v2664_v58  ;;  %v2671_v2 = vmul.f32 %v4402_v62, %v2609_v49  ;;  %vm2677_vm12 = vweird.f32 %v4402_v62  ;;  %v4326_v49 = vld [vmem:[%s6252_s11] ss:$0 sm:$0xff]  ;;  %s6255_s11 = sld [smem:[#allocation54_spill]] }
 0x744   : > { %4052 = vmatmul.msk.f32.gmra.mxu1 %vm1771_vm0, %v5864_v17  ;;  %vm2678_vm14 = vmor %vm2676_vm13, %vm2677_vm12 }
 0x745   : > { %v2669_v3 = vsel %vm2668_vm11, %v4398_v48, %v2665_v1  ;;  %v2672_v22 = vmul.f32 %v4402_v62, %v2671_v2  ;;  %v3187_v2 = vld [vmem:[%s6254_s1 + $0x10] sm:$0xff] }
 0x746   : > { %v2685_v5 = vmul.f32 %v2669_v3, %v5789_v10 }
 0x747   : > { %v2673_v6 = vmul.f32 0.5, %v2672_v22  ;;  %v3186_v22 = vld [vmem:[%s6254_s1 + $0x8] sm:$0xff] }
 0x748   : > { %v2695_v9 = vmul.f32 %v5811_v45, %v2685_v5 }
 0x749   : > { %v2674_v33 = vsub.f32 1.5, %v2673_v6 }
 0x74a   : > { %v5872_v41 = vadd.f32 %v5815_v54, %v2695_v9  ;;  %v3185_v9 = vld [vmem:[%s6254_s1] sm:$0xff] }
 0x74b   : > { %v2675_v14 = vmul.f32 %v4402_v62, %v2674_v33 }
 0x74c   : > { %4053 = vmatmul.msk.f32.gmra.mxu1 %vm1771_vm0, %v5872_v41 }
 0x74d   : > { %v2679_v15 = vsel %vm2678_vm14, %v4402_v62, %v2675_v14 }
 0x74e   : > { %v2686_v10 = vmul.f32 %v2679_v15, %v5799_v18 }
 0x750   : > { %v2696_v27 = vmul.f32 %v5811_v45, %v2686_v10 }
 0x752   : > { %v5879_v16 = vadd.f32 %v5815_v54, %v2696_v27 }
 0x754   : > { %4054 = vmatmul.msk.f32.gmra.mxu1 %vm1771_vm0, %v5879_v16 }
 0x75c   : > { %4064 = vmatmul.msk.f32.vlgmr.msrb.gmra.mxu1 %vm1771_vm0, %v5588_v4 }
 0x7a1   : > { %v2753_v24 = vpop.f32.mrf.mxu1 }
 0x7a2   : > { %v2754_v18 = vadd.f32 %v4325_v23, %v2753_v24 }
 0x7a4   : > { %v2774_v45 = vmax.f32 %v2754_v18, 0.0 }
 0x7a6   : > { %4055 = vmatmul.msk.f32.vlgmr.msra.gmra.mxu0 %vm2793_vm15, %v2774_v45 }
 0x7a9   : > { %v2756_v54 = vpop.f32.mrf.mxu1 }
 0x7aa   : > { %v2757_v25 = vadd.f32 %v4325_v23, %v2756_v54 }
 0x7ac   : > { %v2775_v26 = vmax.f32 %v2757_v25, 0.0 }
 0x7ae   : > { %4056 = vmatmul.msk.f32.gmra.mxu0 %vm2793_vm15, %v2775_v26 }
 0x7b0   : > { %v3159_v29 = vpop.xlane.xlu1 %3158 }
 0x7b1   : > { %v2759_v28 = vpop.f32.mrf.mxu1  ;;  %4403 = vrcp.f32 %v3159_v29 }
 0x7b2   : > { %v2760_v30 = vadd.f32 %v4325_v23, %v2759_v28 }
 0x7b4   : > { %v2776_v35 = vmax.f32 %v2760_v30, 0.0 }
 0x7b6   : > { %4057 = vmatmul.msk.f32.gmra.mxu0 %vm2793_vm15, %v2776_v35 }
 0x7b7   : > { %v4404_v63 = vpop.eup %4403 }
 0x7b8   : > { %v3161_v56 = vmul.f32 %v4404_v63, %v5851_v52 }
 0x7b9   : > { %v2762_v32 = vpop.f32.mrf.mxu1 }
 0x7ba   : > { %v2763_v34 = vadd.f32 %v4325_v23, %v2762_v32 }
 0x7bc   : > { %v2777_v13 = vmax.f32 %v2763_v34, 0.0 }
 0x7be   : > { %4058 = vmatmul.msk.f32.gmra.mxu0 %vm2793_vm15, %v2777_v13 }
 0x7c1   : > { %v2765_v38 = vpop.f32.mrf.mxu1 }
 0x7c2   : > { %v2766_v36 = vadd.f32 %v4325_v23, %v2765_v38 }
 0x7c4   : > { %v2778_v40 = vmax.f32 %v2766_v36, 0.0 }
 0x7c6   : > { %4059 = vmatmul.msk.f32.gmra.mxu0 %vm2793_vm15, %v2778_v40 }
 0x7c9   : > { %v2768_v43 = vpop.f32.mrf.mxu1 }
 0x7ca   : > { %v2769_v44 = vadd.f32 %v4325_v23, %v2768_v43 }
 0x7cc   : > { %v2779_v46 = vmax.f32 %v2769_v44, 0.0 }
 0x7ce   : > { %4060 = vmatmul.msk.f32.gmra.mxu0 %vm2793_vm15, %v2779_v46 }
 0x7d1   : > { %v2771_v47 = vpop.f32.mrf.mxu1 }
 0x7d2   : > { %v2772_v37 = vadd.f32 %v4325_v23, %v2771_v47 }
 0x7d4   : > { %v2780_v48 = vmax.f32 %v2772_v37, 0.0 }
 0x7d6   : > { %4061 = vmatmul.msk.f32.gmra.mxu0 %vm2793_vm15, %v2780_v48 }
 0x7d9   : > { %v3120_v53 = vpop.f32.mrf.mxu1 }
 0x7da   : > { %v3121_v55 = vadd.f32 %v4326_v49, %v3120_v53 }
 0x7dc   : > { %3180 = vmatpush.msrb.mxu3 %v3121_v55 }
 0x7dd   : > { %4067 = vmatmul.msk.f32.vlgmr.msrb.gmra.mxu3 %vm3150_vm1, %v3161_v56 }
 0x823   : > { %v2832_v57 = vpop.f32.mrf.mxu0 }
 0x824   : > { %v2833_v7 = vadd.f32 %v4327_v50, %v2832_v57 }
 0x826   : > { %v2853_v11 = vadd.f32 %v2833_v7, %v5820_v12  ;;  %v3188_v12 = vld [vmem:[%s6253_s7 + $0x18] sm:$0xff]  ;;  %s6256_s7 = sld [smem:[#allocation35_spill]]  ;;  %v4328_v7 = vld [vmem:[%s6255_s11] ss:$0 sm:$0xff] }
 0x827   : > { %3208 = vmatpush.msra.mxu1 %v3188_v12  ;;  %v3350_v12 = vld [vmem:[%s6258_s2 + $0x18] sm:$0xff]  ;;  %s6259_s11 = sld [smem:[#allocation39_spill]] }
 0x828   : > { %v2862_v59 = vsel %vm1771_vm0, %v2853_v11, 0.0 }
 0x829   : > { %2863 = vadd.xlane.f32.xlu2 %v2862_v59  ;;  %3209 = vmatpush.msra.mxu1 %v3187_v2  ;;  %v3349_v2 = vld [vmem:[%s6258_s2 + $0x10] sm:$0xff] }
 0x82b   : > { %v2835_v60 = vpop.f32.mrf.mxu0  ;;  %3210 = vmatpush.msra.mxu1 %v3186_v22  ;;  %v3348_v22 = vld [vmem:[%s6258_s2 + $0x8] sm:$0xff] }
 0x82c   : > { %v2836_v31 = vadd.f32 %v4327_v50, %v2835_v60  ;;  %s6257_s1 = smov %s6256_s7 }
 0x82d   : > { %3211 = vmatpush.msra.mxu1 %v3185_v9 }
 0x82e   : > { %v2854_v39 = vadd.f32 %v2836_v31, %v5828_v8 }
 0x82f   : > { %3367 = vmatpush.msrb.mxu1 %v3350_v12 }
 0x830   : > { %v2865_v52 = vsel %vm1771_vm0, %v2854_v39, 0.0 }
 0x831   : > { %2866 = vadd.xlane.f32.xlu0 %v2865_v52  ;;  %3368 = vmatpush.msrb.mxu1 %v3349_v2 }
 0x833   : > { %v2838_v58 = vpop.f32.mrf.mxu0  ;;  %3369 = vmatpush.msrb.mxu1 %v3348_v22 }
 0x834   : > { %v2839_v62 = vadd.f32 %v4327_v50, %v2838_v58 }
 0x836   : > { %v2855_v0 = vadd.f32 %v2839_v62, %v5839_v61 }
 0x838   : > { %v2868_v1 = vsel %vm1771_vm0, %v2855_v0, 0.0 }
 0x839   : > { %2869 = vadd.xlane.f32.xlu1 %v2868_v1  ;;  %v3283_v1 = vld [vmem:[%s6256_s7 + $0x18] sm:$0xff]  ;;  %s6261_s7 = sld [smem:[#allocation47_spill]] }
 0x83a   : > { %3321 = vmatpush.msra.mxu3 %v3283_v1 }
 0x83b   : > { %v2841_v3 = vpop.f32.mrf.mxu0 }
 0x83c   : > { %v2842_v5 = vadd.f32 %v4327_v50, %v2841_v3  ;;  %v3281_v3 = vld [vmem:[%s6257_s1 + $0x8] sm:$0xff] }
 0x83e   : > { %v2856_v8 = vadd.f32 %v2842_v5, %v5849_v51  ;;  %v3280_v5 = vld [vmem:[%s6257_s1] sm:$0xff] }
 0x840   : > { %v2871_v6 = vsel %vm1771_vm0, %v2856_v8, 0.0 }
 0x841   : > { %2872 = vadd.xlane.f32.xlu2 %v2871_v6 }
 0x843   : > { %v2844_v33 = vpop.f32.mrf.mxu0 }
 0x844   : > { %v2845_v61 = vadd.f32 %v4327_v50, %v2844_v33 }
 0x846   : > { %v2857_v14 = vadd.f32 %v2845_v61, %v5864_v17 }
 0x848   : > { %v2874_v15 = vsel %vm1771_vm0, %v2857_v14, 0.0 }
 0x849   : > { %2875 = vadd.xlane.f32.xlu0 %v2874_v15 }
 0x84b   : > { %v2847_v10 = vpop.f32.mrf.mxu0 }
 0x84c   : > { %v2848_v27 = vadd.f32 %v4327_v50, %v2847_v10 }
 0x84e   : > { %v2858_v19 = vadd.f32 %v2848_v27, %v5872_v41 }
 0x850   : > { %v2877_v20 = vsel %vm1771_vm0, %v2858_v19, 0.0 }
 0x851   : > { %2878 = vadd.xlane.f32.xlu1 %v2877_v20 }
 0x853   : > { %v2850_v51 = vpop.f32.mrf.mxu0 }
 0x854   : > { %v2851_v21 = vadd.f32 %v4327_v50, %v2850_v51 }
 0x856   : > { %v2859_v23 = vadd.f32 %v2851_v21, %v5879_v16 }
 0x858   : > { %v2880_v24 = vsel %vm1837_vm2, %v2859_v23, 0.0 }
 0x859   : > { %2881 = vadd.xlane.f32.xlu0 %v2880_v24 }
 0x860   : > { %v3182_v18 = vpop.f32.mrf.mxu3 }
 0x861   : > { %4068 = vmatmul.msk.f32.vlgmr.msra.gmra.mxu1 %vm1771_vm0, %v3182_v18 }
 0x89c   : > { %v2864_v17 = vpop.xlane.xlu2 %2863 }
 0x89d   : > { %v2883_v45 = vmul.f32 %v2864_v17, %v5656_v42 }
 0x89f   : > { %v5918_v54 = vsub.f32 %v2853_v11, %v2883_v45 }
 0x8a1   : > { %v2897_v41 = vmul.f32 %v5918_v54, %v5918_v54 }
 0x8a3   : > { %v2904_v25 = vsel %vm1771_vm0, %v2897_v41, 0.0  ;;  %v5976_v41 = vld [vmem:[#allocation16] ss:$0 sm:$0xff] }
 0x8a4   : > { %2905 = vadd.xlane.f32.xlu2 %v2904_v25  ;;  %v2867_v26 = vpop.xlane.xlu0 %2866 }
 0x8a5   : > { %v2884_v16 = vmul.f32 %v2867_v26, %v5656_v42 }
 0x8a7   : > { %v5924_v28 = vsub.f32 %v2854_v39, %v2884_v16 }
 0x8a9   : > { %v2898_v30 = vmul.f32 %v5924_v28, %v5924_v28 }
 0x8ab   : > { %v2907_v35 = vsel %vm1771_vm0, %v2898_v30, 0.0  ;;  %v5979_v30 = vld [vmem:[#allocation14] ss:$0 sm:$0xff] }
 0x8ac   : > { %v2870_v32 = vpop.xlane.xlu1 %2869  ;;  %2908 = vadd.xlane.f32.xlu1 %v2907_v35 }
 0x8ad   : > { %v2885_v34 = vmul.f32 %v2870_v32, %v5656_v42 }
 0x8af   : > { %v5930_v13 = vsub.f32 %v2855_v0, %v2885_v34 }
 0x8b1   : > { %v2899_v38 = vmul.f32 %v5930_v13, %v5930_v13 }
 0x8b3   : > { %v2910_v36 = vsel %vm1771_vm0, %v2899_v38, 0.0 }
 0x8b4   : > { %v2873_v40 = vpop.xlane.xlu2 %2872  ;;  %2911 = vadd.xlane.f32.xlu2 %v2910_v36 }
 0x8b5   : > { %v2886_v43 = vmul.f32 %v2873_v40, %v5656_v42 }
 0x8b7   : > { %v5936_v44 = vsub.f32 %v2856_v8, %v2886_v43  ;;  %v3347_v8 = vld [vmem:[%s6258_s2] sm:$0xff]  ;;  %s6262_s2 = sld [smem:[#allocation46_spill]] }
 0x8b8   : > { %3370 = vmatpush.msrb.mxu1 %v3347_v8 }
 0x8b9   : > { %v2900_v46 = vmul.f32 %v5936_v44, %v5936_v44 }
 0x8bb   : > { %v2913_v29 = vsel %vm1771_vm0, %v2900_v46, 0.0 }
 0x8bc   : > { %2914 = vadd.xlane.f32.xlu0 %v2913_v29  ;;  %v2876_v47 = vpop.xlane.xlu0 %2875 }
 0x8bd   : > { %v2887_v37 = vmul.f32 %v2876_v47, %v5656_v42 }
 0x8bf   : > { %v5942_v48 = vsub.f32 %v2857_v14, %v2887_v37 }
 0x8c1   : > { %v2901_v49 = vmul.f32 %v5942_v48, %v5942_v48 }
 0x8c3   : > { %v2916_v63 = vsel %vm1771_vm0, %v2901_v49, 0.0 }
 0x8c4   : > { %v2879_v53 = vpop.xlane.xlu1 %2878  ;;  %2917 = vadd.xlane.f32.xlu2 %v2916_v63 }
 0x8c5   : > { %v2888_v55 = vmul.f32 %v2879_v53, %v5656_v42 }
 0x8c7   : > { %v5948_v56 = vsub.f32 %v2858_v19, %v2888_v55 }
 0x8c9   : > { %v2902_v50 = vmul.f32 %v5948_v56, %v5948_v56 }
 0x8cb   : > { %v2919_v57 = vsel %vm1771_vm0, %v2902_v50, 0.0 }
 0x8cc   : > { %2920 = vadd.xlane.f32.xlu0 %v2919_v57  ;;  %v2882_v11 = vpop.xlane.xlu0 %2881 }
 0x8cd   : > { %v2889_v60 = vmul.f32 %v2882_v11, %v5656_v42 }
 0x8cf   : > { %v5958_v52 = vsub.f32 %v2859_v23, %v2889_v60 }
 0x8d1   : > { %v2903_v62 = vmul.f32 %v5958_v52, %v5958_v52 }
 0x8d3   : > { %v2922_v0 = vsel %vm1837_vm2, %v2903_v62, 0.0 }
 0x8de   : > { %v3213_v59 = vpop.f32.mrf.mxu1 }
 0x8df   : > { %v3214_v31 = vadd.f32 %v4328_v7, %v3213_v59 }
 0x8e1   : > { %v5956_v39 = vadd.f32 %v3214_v31, %v5588_v4  ;;  %v3282_v4 = vld [vmem:[%s6257_s1 + $0x10] sm:$0xff]  ;;  %s6260_s1 = smov %s6259_s11 }
 0x8e2   : > { %3322 = vmatpush.msra.mxu3 %v3282_v4 }
 0x8e3   : > { %v3219_v58 = vsel %vm1771_vm0, %v5956_v39, 0.0 }
 0x8e4   : > { %3220 = vadd.xlane.f32.xlu1 %v3219_v58  ;;  %3323 = vmatpush.msra.mxu3 %v3281_v3 }
 0x8e6   : > { %3324 = vmatpush.msra.mxu3 %v3280_v5 }
 0x8ec   : > { %2923 = vadd.xlane.f32.xlu1 %v2922_v0 }
 0x917   : > { %v2906_v6 = vpop.xlane.xlu2 %2905 }
 0x918   : > { %v2925_v9 = vmul.f32 %v2906_v6, %v5656_v42 }
 0x91a   : > { %v2932_v33 = vadd.f32 1e-05, %v2925_v9 }
 0x91c   : > { %4405 = vrsqrt.f32 %v2932_v33  ;;  %vm2945_vm1 = vweird.f32 %v2932_v33 }
 0x91f   : > { %v2909_v61 = vpop.xlane.xlu1 %2908 }
 0x920   : > { %v2926_v14 = vmul.f32 %v2909_v61, %v5656_v42 }
 0x922   : > { %v4406_v15 = vpop.eup %4405  ;;  %v2933_v10 = vadd.f32 1e-05, %v2926_v14 }
 0x923   : > { %v2940_v27 = vmul.f32 %v4406_v15, %v2932_v33  ;;  %vm2946_vm2 = vweird.f32 %v4406_v15 }
 0x924   : > { %4407 = vrsqrt.f32 %v2933_v10  ;;  %vm2947_vm5 = vmor %vm2945_vm1, %vm2946_vm2  ;;  %vm2955_vm7 = vweird.f32 %v2933_v10 }
 0x925   : > { %v2941_v19 = vmul.f32 %v4406_v15, %v2940_v27 }
 0x927   : > { %v2942_v20 = vmul.f32 0.5, %v2941_v19  ;;  %v2912_v51 = vpop.xlane.xlu2 %2911 }
 0x928   : > { %v2927_v21 = vmul.f32 %v2912_v51, %v5656_v42 }
 0x929   : > { %v2943_v23 = vsub.f32 1.5, %v2942_v20 }
 0x92a   : > { %v4408_v24 = vpop.eup %4407  ;;  %v2934_v18 = vadd.f32 1e-05, %v2927_v21 }
 0x92b   : > { %v2944_v17 = vmul.f32 %v4406_v15, %v2943_v23  ;;  %v2950_v45 = vmul.f32 %v4408_v24, %v2933_v10  ;;  %vm2956_vm6 = vweird.f32 %v4408_v24 }
 0x92c   : > { %4409 = vrsqrt.f32 %v2934_v18  ;;  %vm2957_vm8 = vmor %vm2955_vm7, %vm2956_vm6  ;;  %vm2965_vm10 = vweird.f32 %v2934_v18 }
 0x92d   : > { %v2948_v25 = vsel %vm2947_vm5, %v4406_v15, %v2944_v17  ;;  %v2951_v26 = vmul.f32 %v4408_v24, %v2950_v45 }
 0x92e   : > { %v3009_v16 = vmul.f32 %v2948_v25, %v5918_v54 }
 0x92f   : > { %v2952_v35 = vmul.f32 0.5, %v2951_v26  ;;  %v2915_v32 = vpop.xlane.xlu0 %2914 }
 0x930   : > { %v3019_v34 = vmul.f32 %v5976_v41, %v3009_v16  ;;  %v2928_v38 = vmul.f32 %v2915_v32, %v5656_v42 }
 0x931   : > { %v2953_v36 = vsub.f32 1.5, %v2952_v35 }
 0x932   : > { %v4410_v40 = vpop.eup %4409  ;;  %v2935_v43 = vadd.f32 1e-05, %v2928_v38  ;;  %v3029_v46 = vadd.f32 %v5979_v30, %v3019_v34 }
 0x933   : > { %v2954_v29 = vmul.f32 %v4408_v24, %v2953_v36  ;;  %v2960_v47 = vmul.f32 %v4410_v40, %v2934_v18  ;;  %vm2966_vm9 = vweird.f32 %v4410_v40 }
 0x934   : > { %4411 = vrsqrt.f32 %v2935_v43  ;;  %4070 = vmatmul.msk.f32.vlgmr.msra.gmra.mxu3 %vm1771_vm0, %v3029_v46  ;;  %4077 = vmatmul.msk.f32.vlgmr.msrb.gmra.mxu1 %vm1771_vm0, %v3029_v46  ;;  %vm2967_vm11 = vmor %vm2965_vm10, %vm2966_vm9  ;;  %vm2975_vm13 = vweird.f32 %v2935_v43 }
 0x935   : > { %v2958_v54 = vsel %vm2957_vm8, %v4408_v24, %v2954_v29  ;;  %v2961_v37 = vmul.f32 %v4410_v40, %v2960_v47 }
 0x936   : > { %v3010_v49 = vmul.f32 %v2958_v54, %v5924_v28 }
 0x937   : > { %v2962_v63 = vmul.f32 0.5, %v2961_v37  ;;  %v2918_v53 = vpop.xlane.xlu2 %2917 }
 0x938   : > { %v2929_v55 = vmul.f32 %v2918_v53, %v5656_v42  ;;  %v3020_v50 = vmul.f32 %v5976_v41, %v3010_v49 }
 0x939   : > { %v2963_v57 = vsub.f32 1.5, %v2962_v63 }
 0x93a   : > { %v4412_v7 = vpop.eup %4411  ;;  %v2936_v11 = vadd.f32 1e-05, %v2929_v55  ;;  %v3030_v59 = vadd.f32 %v5979_v30, %v3020_v50 }
 0x93b   : > { %v2964_v60 = vmul.f32 %v4410_v40, %v2963_v57  ;;  %v2970_v31 = vmul.f32 %v4412_v7, %v2935_v43  ;;  %vm2976_vm12 = vweird.f32 %v4412_v7 }
 0x93c   : > { %4413 = vrsqrt.f32 %v2936_v11  ;;  %4071 = vmatmul.msk.f32.gmra.mxu3 %vm1771_vm0, %v3030_v59  ;;  %4078 = vmatmul.msk.f32.gmra.mxu1 %vm1771_vm0, %v3030_v59  ;;  %vm2977_vm14 = vmor %vm2975_vm13, %vm2976_vm12  ;;  %vm2985_vm1 = vweird.f32 %v2936_v11  ;;  %v3251_v59 = vld [vmem:[%s6260_s1 + $0x10] sm:$0xff] }
 0x93d   : > { %v2968_v28 = vsel %vm2967_vm11, %v4410_v40, %v2964_v60  ;;  %v2971_v58 = vmul.f32 %v4412_v7, %v2970_v31  ;;  %v3250_v60 = vld [vmem:[%s6260_s1 + $0x8] sm:$0xff]  ;;  %v3249_v31 = vld [vmem:[%s6260_s1] sm:$0xff]  ;;  %s6264_s1 = sld [smem:[#allocation34_spill]] }
 0x93e   : > { %v3011_v62 = vmul.f32 %v2968_v28, %v5930_v13 }
 0x93f   : > { %v2972_v0 = vmul.f32 0.5, %v2971_v58  ;;  %v2921_v1 = vpop.xlane.xlu0 %2920 }
 0x940   : > { %v2930_v12 = vmul.f32 %v2921_v1, %v5656_v42  ;;  %v3021_v4 = vmul.f32 %v5976_v41, %v3011_v62 }
 0x941   : > { %v2973_v2 = vsub.f32 1.5, %v2972_v0 }
 0x942   : > { %v4414_v3 = vpop.eup %4413  ;;  %v2937_v22 = vadd.f32 1e-05, %v2930_v12  ;;  %v3031_v5 = vadd.f32 %v5979_v30, %v3021_v4 }
 0x943   : > { %v2974_v8 = vmul.f32 %v4412_v7, %v2973_v2  ;;  %v2980_v6 = vmul.f32 %v4414_v3, %v2936_v11  ;;  %vm2986_vm2 = vweird.f32 %v4414_v3 }
 0x944   : > { %4415 = vrsqrt.f32 %v2937_v22  ;;  %4072 = vmatmul.msk.f32.gmra.mxu3 %vm1771_vm0, %v3031_v5  ;;  %4079 = vmatmul.msk.f32.gmra.mxu1 %vm1771_vm0, %v3031_v5  ;;  %vm2987_vm5 = vmor %vm2985_vm1, %vm2986_vm2  ;;  %vm2995_vm7 = vweird.f32 %v2937_v22 }
 0x945   : > { %v2978_v13 = vsel %vm2977_vm14, %v4412_v7, %v2974_v8  ;;  %v2981_v9 = vmul.f32 %v4414_v3, %v2980_v6  ;;  %v3252_v7 = vld [vmem:[%s6259_s11 + $0x18] sm:$0xff]  ;;  %s6263_s11 = sld [smem:[#allocation40_spill]]  ;;  %v4333_v6 = vld [vmem:[%s6261_s7] ss:$0 sm:$0xff] }
 0x946   : > { %v3012_v33 = vmul.f32 %v2978_v13, %v5936_v44  ;;  %3272 = vmatpush.msra.mxu2 %v3252_v7  ;;  %s6267_s7 = sld [smem:[#allocation36_spill]] }
 0x947   : > { %v2982_v61 = vmul.f32 0.5, %v2981_v9 }
 0x948   : > { %v3022_v14 = vmul.f32 %v5976_v41, %v3012_v33  ;;  %3273 = vmatpush.msra.mxu2 %v3251_v59  ;;  %v4334_v33 = vld [vmem:[%s6262_s2] ss:$0 sm:$0xff]  ;;  %s6265_s2 = sld [smem:[#allocation38_spill]] }
 0x949   : > { %v2983_v15 = vsub.f32 1.5, %v2982_v61 }
 0x94a   : > { %v4416_v10 = vpop.eup %4415  ;;  %v3032_v27 = vadd.f32 %v5979_v30, %v3022_v14  ;;  %3274 = vmatpush.msra.mxu2 %v3250_v60 }
 0x94b   : > { %v2984_v19 = vmul.f32 %v4414_v3, %v2983_v15  ;;  %v2990_v20 = vmul.f32 %v4416_v10, %v2937_v22  ;;  %vm2996_vm6 = vweird.f32 %v4416_v10 }
 0x94c   : > { %4073 = vmatmul.msk.f32.gmra.mxu3 %vm1771_vm0, %v3032_v27  ;;  %4080 = vmatmul.msk.f32.gmra.mxu1 %vm1771_vm0, %v3032_v27  ;;  %vm2997_vm8 = vmor %vm2995_vm7, %vm2996_vm6  ;;  %v4336_v60 = vld [vmem:[%s6267_s7] ss:$0 sm:$0xff]  ;;  %s6271_s7 = sld [smem:[#allocation49_spill]] }
 0x94d   : > { %v2988_v51 = vsel %vm2987_vm5, %v4414_v3, %v2984_v19  ;;  %v2991_v21 = vmul.f32 %v4416_v10, %v2990_v20  ;;  %3275 = vmatpush.msra.mxu2 %v3249_v31  ;;  %v4331_v19 = vld [vmem:[%s6263_s11] ss:$0 sm:$0xff]  ;;  %s6268_s11 = sld [smem:[#allocation43_spill]] }
 0x94e   : > { %v3013_v44 = vmul.f32 %v2988_v51, %v5942_v48 }
 0x94f   : > { %v2992_v23 = vmul.f32 0.5, %v2991_v21 }
 0x950   : > { %v3023_v24 = vmul.f32 %v5976_v41, %v3013_v44  ;;  %v4332_v44 = vld [vmem:[%s6264_s1] ss:$0 sm:$0xff]  ;;  %s6266_s1 = sld [smem:[#allocation37_spill]] }
 0x951   : > { %v2993_v18 = vsub.f32 1.5, %v2992_v23 }
 0x952   : > { %v3033_v17 = vadd.f32 %v5979_v30, %v3023_v24 }
 0x953   : > { %v2994_v45 = vmul.f32 %v4416_v10, %v2993_v18 }
 0x954   : > { %4074 = vmatmul.msk.f32.gmra.mxu3 %vm1771_vm0, %v3033_v17  ;;  %4081 = vmatmul.msk.f32.gmra.mxu1 %vm1771_vm0, %v3033_v17 }
 0x955   : > { %v2998_v25 = vsel %vm2997_vm8, %v4416_v10, %v2994_v45 }
 0x956   : > { %v3014_v26 = vmul.f32 %v2998_v25, %v5948_v56 }
 0x957   : > { %v3221_v16 = vpop.xlane.xlu1 %3220 }
 0x958   : > { %v3222_v48 = vmul.f32 %v3221_v16, %v5656_v42  ;;  %v3024_v35 = vmul.f32 %v5976_v41, %v3014_v26 }
 0x95a   : > { %v3223_v32 = vsub.f32 %v5956_v39, %v3222_v48  ;;  %v3034_v34 = vadd.f32 %v5979_v30, %v3024_v35 }
 0x95c   : > { %4075 = vmatmul.msk.f32.gmra.mxu3 %vm1771_vm0, %v3034_v34  ;;  %4082 = vmatmul.msk.f32.gmra.mxu1 %vm1771_vm0, %v3034_v34  ;;  %v3224_v38 = vmul.f32 %v3223_v32, %v3223_v32 }
 0x95e   : > { %v3225_v36 = vsel %vm1771_vm0, %v3224_v38, 0.0 }
 0x95f   : > { %3226 = vadd.xlane.f32.xlu2 %v3225_v36  ;;  %v2924_v40 = vpop.xlane.xlu1 %2923  ;;  %v4335_v36 = vld [vmem:[%s6265_s2] ss:$0 sm:$0xff]  ;;  %s6269_s2 = smov %s6268_s11 }
 0x960   : > { %v2931_v56 = vmul.f32 %v2924_v40, %v5656_v42 }
 0x962   : > { %v2938_v43 = vadd.f32 1e-05, %v2931_v56 }
 0x964   : > { %4417 = vrsqrt.f32 %v2938_v43  ;;  %vm3005_vm10 = vweird.f32 %v2938_v43 }
 0x96a   : > { %v4418_v46 = vpop.eup %4417 }
 0x96b   : > { %v3000_v29 = vmul.f32 %v4418_v46, %v2938_v43  ;;  %vm3006_vm9 = vweird.f32 %v4418_v46 }
 0x96c   : > { %vm3007_vm11 = vmor %vm3005_vm10, %vm3006_vm9 }
 0x96d   : > { %v3001_v47 = vmul.f32 %v4418_v46, %v3000_v29 }
 0x96f   : > { %v3002_v39 = vmul.f32 0.5, %v3001_v47 }
 0x971   : > { %v3003_v54 = vsub.f32 1.5, %v3002_v39 }
 0x973   : > { %v3004_v37 = vmul.f32 %v4418_v46, %v3003_v54 }
 0x975   : > { %v3008_v49 = vsel %vm3007_vm11, %v4418_v46, %v3004_v37 }
 0x976   : > { %v3015_v63 = vmul.f32 %v3008_v49, %v5958_v52 }
 0x978   : > { %v3025_v53 = vmul.f32 %v5976_v41, %v3015_v63  ;;  %v3478_v63 = vld [vmem:[%s6266_s1 + $0x18] sm:$0xff] }
 0x97a   : > { %v3035_v55 = vadd.f32 %v5979_v30, %v3025_v53  ;;  %v3477_v53 = vld [vmem:[%s6266_s1 + $0x10] sm:$0xff] }
 0x97c   : > { %4076 = vmatmul.msk.f32.gmra.mxu3 %vm1771_vm0, %v3035_v55  ;;  %4083 = vmatmul.msk.f32.gmra.mxu1 %vm1771_vm0, %v3035_v55  ;;  %v3476_v55 = vld [vmem:[%s6266_s1 + $0x8] sm:$0xff] }
 0x9b1   : > { %v3372_v50 = vpop.f32.mrf.mxu1 }
 0x9b2   : > { %v3373_v16 = vadd.f32 %v4331_v19, %v3372_v50 }
 0x9b7   : > { %v6022_v57 = vpop.f32.mrf.mxu3 }
 0x9b8   : > { %v3327_v38 = vadd.f32 %v4332_v44, %v6022_v57 }
 0x9b9   : > { %v3375_v11 = vpop.f32.mrf.mxu1 }
 0x9ba   : > { %v3376_v25 = vadd.f32 %v4331_v19, %v3375_v11  ;;  %v3475_v11 = vld [vmem:[%s6266_s1] sm:$0xff]  ;;  %s6273_s1 = sld [smem:[#allocation42_spill]] }
 0x9bf   : > { %v3329_v52 = vpop.f32.mrf.mxu3 }
 0x9c0   : > { %v3330_v34 = vadd.f32 %v4332_v44, %v3329_v52 }
 0x9c1   : > { %v3378_v28 = vpop.f32.mrf.mxu1 }
 0x9c2   : > { %v3379_v45 = vadd.f32 %v4331_v19, %v3378_v28 }
 0x9c7   : > { %v3332_v62 = vpop.f32.mrf.mxu3 }
 0x9c9   : > { %v3381_v1 = vpop.f32.mrf.mxu1 }
 0x9ca   : > { %v3382_v18 = vadd.f32 %v4331_v19, %v3381_v1 }
 0x9cf   : > { %v3335_v3 = vpop.f32.mrf.mxu3 }
 0x9d0   : > { %v3336_v35 = vadd.f32 %v4332_v44, %v3335_v3  ;;  %v3539_v3 = vld [vmem:[%s6269_s2] sm:$0xff] }
 0x9d1   : > { %v3384_v8 = vpop.f32.mrf.mxu1 }
 0x9d2   : > { %v3227_v41 = vpop.xlane.xlu2 %3226  ;;  %v3385_v23 = vadd.f32 %v4331_v19, %v3384_v8  ;;  %v3576_v8 = vld [vmem:[%s6270_s3 + $0x28] sm:$0xff] }
 0x9d3   : > { %v3228_v30 = vmul.f32 %v3227_v41, %v5656_v42 }
 0x9d5   : > { %v3229_v58 = vadd.f32 1e-05, %v3228_v30 }
 0x9d7   : > { %4419 = vrsqrt.f32 %v3229_v58  ;;  %vm3236_vm13 = vweird.f32 %v3229_v58  ;;  %v3338_v14 = vpop.f32.mrf.mxu3 }
 0x9d8   : > { %v3339_v48 = vadd.f32 %v4332_v44, %v3338_v14 }
 0x9d9   : > { %v3387_v10 = vpop.f32.mrf.mxu1 }
 0x9da   : > { %v3388_v21 = vadd.f32 %v4331_v19, %v3387_v10 }
 0x9dd   : > { %v4420_v0 = vpop.eup %4419 }
 0x9de   : > { %v3231_v12 = vmul.f32 %v4420_v0, %v3229_v58  ;;  %vm3237_vm12 = vweird.f32 %v4420_v0 }
 0x9df   : > { %vm3238_vm14 = vmor %vm3236_vm13, %vm3237_vm12  ;;  %v3341_v27 = vpop.f32.mrf.mxu3 }
 0x9e0   : > { %v3232_v4 = vmul.f32 %v4420_v0, %v3231_v12  ;;  %v3342_v26 = vadd.f32 %v4332_v44, %v3341_v27  ;;  %v3542_v12 = vld [vmem:[%s6268_s11 + $0x18] sm:$0xff]  ;;  %s6272_s11 = sld [smem:[#allocation48_spill]] }
 0x9e2   : > { %v3233_v2 = vmul.f32 0.5, %v3232_v4  ;;  %v3541_v4 = vld [vmem:[%s6269_s2 + $0x10] sm:$0xff] }
 0x9e4   : > { %v3234_v22 = vsub.f32 1.5, %v3233_v2  ;;  %v3540_v2 = vld [vmem:[%s6269_s2 + $0x8] sm:$0xff]  ;;  %s6274_s2 = sld [smem:[#allocation44_spill]] }
 0x9e6   : > { %v3235_v5 = vmul.f32 %v4420_v0, %v3234_v22  ;;  %v3578_v22 = vld [vmem:[%s6270_s3 + $0x38] sm:$0xff] }
 0x9e8   : > { %v3239_v13 = vsel %vm3238_vm14, %v4420_v0, %v3235_v5  ;;  %v3577_v5 = vld [vmem:[%s6270_s3 + $0x30] sm:$0xff] }
 0x9e9   : > { %v3240_v9 = vmul.f32 %v3239_v13, %v3223_v32  ;;  %v3333_v32 = vadd.f32 %v4332_v44, %v3332_v62 }
 0x9eb   : > { %v3244_v61 = vmul.f32 %v4333_v6, %v3240_v9  ;;  %v3575_v9 = vld [vmem:[%s6270_s3 + $0x20] sm:$0xff] }
 0x9ed   : > { %v6031_v15 = vadd.f32 %v4334_v33, %v3244_v61  ;;  %v3574_v61 = vld [vmem:[%s6270_s3 + $0x18] sm:$0xff] }
 0x9ef   : > { %4069 = vmatmul.msk.f32.vlgmr.msra.gmra.mxu2 %vm1771_vm0, %v6031_v15 }
 0x9f9   : > { %v3390_v20 = vpop.f32.mrf.mxu1 }
 0x9fa   : > { %v3391_v51 = vadd.f32 %v4331_v19, %v3390_v20 }
 0x9fc   : > { %4092 = vmatpush.msk.msrb.mxu0 %vm2225_vm3, %v3391_v51  ;;  %v4337_v51 = vld [vmem:[%s6271_s7] ss:$0 sm:$0xff]  ;;  %s6275_s7 = sld [smem:[#allocation74_spill]] }
 0x9fe   : > { %3465 = vmatpush.msrb.mxu0 %v3388_v21 }
 0x9ff   : > { %v3344_v24 = vpop.f32.mrf.mxu3 }
 0xa00   : > { %v3345_v17 = vadd.f32 %v4332_v44, %v3344_v24  ;;  %3466 = vmatpush.msrb.mxu0 %v3385_v23  ;;  %v4338_v23 = vld [vmem:[%s6272_s11] ss:$0 sm:$0xff]  ;;  %s6170_s11 = sshll.u32 %s5240_s0, 3 }
 0xa02   : > { %4084 = vmatpush.xpose.msk.msrb.mxu2 %vm1771_vm0, %v3345_v17  ;;  %3467 = vmatpush.msrb.mxu0 %v3382_v18  ;;  %v3573_v17 = vld [vmem:[%s6270_s3 + $0x10] sm:$0xff]  ;;  %s6276_s4 = smov %s6275_s7 }
 0xa03   : > { %s4779_s12 = scalar_lea.hbm %s6276_s4, 16 }
 0xa04   : > { %3468 = vmatpush.msrb.mxu0 %v3379_v45  ;;  %v3572_v45 = vld [vmem:[%s6270_s3 + $0x8] sm:$0xff] }
 0xa06   : > { %4085 = vmatpush.xpose.msk.msrb.mxu2 %vm1771_vm0, %v3342_v26  ;;  %3469 = vmatpush.msrb.mxu0 %v3376_v25  ;;  %v3571_v25 = vld [vmem:[%s6270_s3] sm:$0xff]  ;;  %s3680_s3 = sshll.u32 %s5596_s23, 4  ;;  %s3681_s3 = int_to_ptr.vmem [resolvable:$true] %s3680_s3 }
 0xa07   : > { %v4339_v26 = vld [vmem:[%s6273_s1] ss:$0 sm:$0xff] }
 0xa08   : > { %3470 = vmatpush.msrb.mxu0 %v3373_v16 }
 0xa0a   : > { %4086 = vmatpush.xpose.msk.msrb.mxu2 %vm1771_vm0, %v3339_v48  ;;  %3594 = vmatpush.msra.mxu0 %v3578_v22 }
 0xa0c   : > { %3595 = vmatpush.msra.mxu0 %v3577_v5 }
 0xa0e   : > { %4087 = vmatpush.xpose.msk.msrb.mxu2 %vm1771_vm0, %v3336_v35  ;;  %3596 = vmatpush.msra.mxu0 %v3576_v8 }
 0xa10   : > { %3597 = vmatpush.msra.mxu0 %v3575_v9 }
 0xa12   : > { %4088 = vmatpush.xpose.msk.msrb.mxu2 %vm1771_vm0, %v3333_v32  ;;  %3598 = vmatpush.msra.mxu0 %v3574_v61  ;;  %v4340_v32 = vld [vmem:[%s6274_s2] ss:$0 sm:$0xff]  ;;  %s3678_s2 = scalar_lea.hbm %s6275_s7, %s6170_s11 }
 0xa13   : > { %s3682_s5 = sshll.u32 %s3678_s2, 4  ;;  %s3683_s5 = int_to_ptr.hbm [resolvable:$true] %s3682_s5 }
 0xa14   : > { %3599 = vmatpush.msra.mxu0 %v3573_v17  ;;  %s4773_s8 = sshra.s32 %s3683_s5, 4  ;;  %s4774_s8 = int_to_ptr.hbm [resolvable:$true] %s4773_s8 }
 0xa15   : > { %s4775_s9 = scalar_lea.hbm %s4774_s8, 8  ;;  %p4780_p7 = scmp.lt.s32.totalorder %s4774_s8, %s6276_s4 }
 0xa16   : > { %4089 = vmatpush.xpose.msk.msrb.mxu2 %vm1771_vm0, %v3330_v34  ;;  %3600 = vmatpush.msra.mxu0 %v3572_v45  ;;  %p4776_p9 = scmp.ne.s32.totalorder %s4774_s8, %s4775_s9  ;;  %p4781_p8 = scmp.lt.s32.totalorder %s4779_s12, %s4775_s9 }
 0xa18   : > { %3601 = vmatpush.msra.mxu0 %v3571_v25  ;;  %p4777_p12 = pnand %p4776_p9, %p5257_p5  ;;  %p4782_p11 = por %p4781_p8, %p4780_p7 }
 0xa1a   : > { %4090 = vmatpush.xpose.msk.msrb.mxu2 %vm1771_vm0, %v3327_v38  ;;  %p4778_p0 = pneg %p4777_p12 }
 0xa1c   : > { %p4783_p13 = pnand %p4782_p11, %p4778_p0 }
 0xa1e   : > { %3498 = vmatpush.msra.mxu2 %v3478_v63 }
 0xa20   : > { %3499 = vmatpush.msra.mxu2 %v3477_v53 }
 0xa22   : > { %3500 = vmatpush.msra.mxu2 %v3476_v55 }
 0xa24   : > { %3501 = vmatpush.msra.mxu2 %v3475_v11 }
 0xa72   : > { %v3277_v40 = vpop.f32.mrf.mxu2 }
 0xa73   : > { %v3278_v56 = vadd.f32 %v4335_v36, %v3277_v40 }
 0xa75   : > { %v3393_v43 = vmul.f32 0.17677669, %v3278_v56 }
 0xa77   : > { %4091 = vmatmul.msk.f32.vlgmr.msrb.gmra.mxu2 %vm1771_vm0, %v3393_v43 }
 0xa78   : > { %3562 = vmatpush.msrb.mxu2 %v3542_v12 }
 0xa7a   : > { %3563 = vmatpush.msrb.mxu2 %v3541_v4 }
 0xa7c   : > { %3564 = vmatpush.msrb.mxu2 %v3540_v2 }
 0xa7e   : > { %3565 = vmatpush.msrb.mxu2 %v3539_v3 }
 0xafa   : > { %v3435_v46 = vpop.f32.mrf.mxu2 }
 0xafb   : > { %v3438_v29 = vsel %vm2125_vm4, %v3435_v46, -inf }
 0xafc   : > { %3439 = vmax.xlane.f32.xlu0 %v3438_v29 }
 0xb6f   : > { %v3440_v47 = vpop.xlane.xlu0 %3439 }
 0xb70   : > { %v3441_v39 = vsub.f32 %v3435_v46, %v3440_v47 }
 0xb72   : > { %v3442_v54 = vmul.f32 1.442695, %v3441_v39 }
 0xb74   : > { %4421 = vpow2.f32 %v3442_v54 }
 0xb7a   : > { %v4422_v37 = vpop.eup %4421 }
 0xb7b   : > { %v3444_v49 = vsel %vm2125_vm4, %v4422_v37, 0.0 }
 0xb7c   : > { %3445 = vadd.xlane.f32.xlu1 %v3444_v49 }
 0xbef   : > { %v3446_v50 = vpop.xlane.xlu1 %3445 }
 0xbf0   : > { %4423 = vrcp.f32 %v3446_v50 }
 0xbf6   : > { %v4424_v57 = vpop.eup %4423 }
 0xbf7   : > { %v3448_v7 = vmul.f32 %v4424_v57, %v4422_v37 }
 0xbf9   : > { %4093 = vmatmul.msk.f32.vlgmr.msrb.gmra.mxu0 %vm2125_vm4, %v3448_v7 }
 0xc76   : > { %v3472_v59 = vpop.f32.mrf.mxu0 }
 0xc77   : > { %4094 = vmatmul.msk.f32.vlgmr.msra.gmra.mxu2 %vm1771_vm0, %v3472_v59 }
 0xcfa   : > { %v3503_v31 = vpop.f32.mrf.mxu2 }
 0xcfb   : > { %v3504_v52 = vadd.f32 %v4336_v60, %v3503_v31 }
 0xcfd   : > { %v3506_v41 = vadd.f32 %v3504_v52, %v6031_v15 }
 0xcff   : > { %v3509_v28 = vsel %vm1771_vm0, %v3506_v41, 0.0 }
 0xd00   : > { %3510 = vadd.xlane.f32.xlu2 %v3509_v28 }
 0xd73   : > { %v3511_v30 = vpop.xlane.xlu2 %3510 }
 0xd74   : > { %v3512_v58 = vmul.f32 %v3511_v30, %v5656_v42 }
 0xd76   : > { %v3513_v62 = vsub.f32 %v3506_v41, %v3512_v58 }
 0xd78   : > { %v3514_v0 = vmul.f32 %v3513_v62, %v3513_v62 }
 0xd7a   : > { %v3515_v1 = vsel %vm1771_vm0, %v3514_v0, 0.0 }
 0xd7b   : > { %3516 = vadd.xlane.f32.xlu0 %v3515_v1 }
 0xdee   : > { %v3517_v6 = vpop.xlane.xlu0 %3516 }
 0xdef   : > { %v3518_v13 = vmul.f32 %v3517_v6, %v5656_v42 }
 0xdf1   : > { %v3519_v33 = vadd.f32 1e-05, %v3518_v13 }
 0xdf3   : > { %4425 = vrsqrt.f32 %v3519_v33  ;;  %vm3526_vm4 = vweird.f32 %v3519_v33 }
 0xdf9   : > { %v4426_v14 = vpop.eup %4425 }
 0xdfa   : > { %v3521_v15 = vmul.f32 %v4426_v14, %v3519_v33  ;;  %vm3527_vm3 = vweird.f32 %v4426_v14 }
 0xdfb   : > { %vm3528_vm2 = vmor %vm3526_vm4, %vm3527_vm3 }
 0xdfc   : > { %v3522_v10 = vmul.f32 %v4426_v14, %v3521_v15 }
 0xdfe   : > { %v3523_v27 = vmul.f32 0.5, %v3522_v10 }
 0xe00   : > { %v3524_v19 = vsub.f32 1.5, %v3523_v27 }
 0xe02   : > { %v3525_v20 = vmul.f32 %v4426_v14, %v3524_v19 }
 0xe04   : > { %v3529_v21 = vsel %vm3528_vm2, %v4426_v14, %v3525_v20 }
 0xe05   : > { %v3530_v44 = vmul.f32 %v3529_v21, %v3513_v62 }
 0xe07   : > { %v3534_v24 = vmul.f32 %v4337_v51, %v3530_v44 }
 0xe09   : > { %v3538_v18 = vadd.f32 %v4338_v23, %v3534_v24 }
 0xe0b   : > { %4095 = vmatmul.msk.f32.vlgmr.msrb.gmra.mxu2 %vm1771_vm0, %v3538_v18 }
 0xe8e   : > { %v3567_v16 = vpop.f32.mrf.mxu2 }
 0xe8f   : > { %v3568_v48 = vadd.f32 %v4339_v26, %v3567_v16 }
 0xe91   : > { %v3570_v35 = vmax.f32 %v3568_v48, 0.0 }
 0xe93   : > { %4096 = vmatmul.msk.f32.vlgmr.msra.gmra.mxu0 %vm2793_vm15, %v3570_v35 }
 0xf10   : > { %v3603_v34 = vpop.f32.mrf.mxu0 }
 0xf11   : > { %v3604_v38 = vadd.f32 %v4340_v32, %v3603_v34 }
 0xf13   : > { %v3606_v36 = vadd.f32 %v3604_v38, %v3538_v18 }
 0xf15   : > { %v3609_v40 = vsel %vm1771_vm0, %v3606_v36, 0.0 }
 0xf16   : > { %3610 = vadd.xlane.f32.xlu1 %v3609_v40 }
 0xf89   : > { %v3611_v56 = vpop.xlane.xlu1 %3610 }
 0xf8a   : > { %v3612_v43 = vmul.f32 %v3611_v56, %v5656_v42 }
 0xf8c   : > { %v3613_v46 = vsub.f32 %v3606_v36, %v3612_v43 }
 0xf8e   : > { %v3614_v29 = vmul.f32 %v3613_v46, %v3613_v46 }
 0xf90   : > { %v3615_v47 = vsel %vm1771_vm0, %v3614_v29, 0.0 }
 0xf91   : > { %3616 = vadd.xlane.f32.xlu2 %v3615_v47 }
 0xf92   : > { %4786 = shalt.err (!%p4783_p13)
}
 0xf93   : > { %s6278_s23 = sld [smem:[#allocation51_spill]]  ;;  %s6282_s8 = sshll.u32 %s5240_s0, 3 }
 0xf94   : > { %s6279_s7 = sld [smem:[#allocation72_spill]] }
 0xf95   : > { %4149 = dma.vmem_to_hbm [thread:$0]  (%p5257_p5), %s3681_s3, 128, %s3683_s5, %s3651_s6  }
 0xf96   : > { %s6281_s11 = sld [smem:[#allocation50_spill]]  ;;  %s6283_s3 = sshll.u32 %s5591_s15, 3 }
 0xf97   : > { %s1731_s6 = scalar_lea.vmem [#allocation20], %s6283_s3 }
 0xf98   : > { %s3663_s12 = sshll.u32 %s1731_s6, 4  ;;  %s3664_s12 = int_to_ptr.vmem [resolvable:$true] %s3663_s12 }
 0xf99   : > { %v4341_v7 = vld [vmem:[%s6278_s23] ss:$0 sm:$0xff]  ;;  %s3641_s23 = scalar_lea.sflag [#allocation4], %s5591_s15 }
 0xf9a   : > { %s6280_s2 = smov %s6279_s7  ;;  %s3661_s5 = scalar_lea.hbm %s6279_s7, %s6282_s8 }
 0xf9b   : > { %s3665_s9 = sshll.u32 %s3661_s5, 4  ;;  %s3666_s9 = int_to_ptr.hbm [resolvable:$true] %s3665_s9 }
 0xf9c   : > { %v4342_v59 = vld [vmem:[%s6281_s11] ss:$0 sm:$0xff]  ;;  %s4801_s4 = sshra.s32 %s3666_s9, 4  ;;  %s4807_s11 = scalar_lea.hbm %s6280_s2, 16  ;;  %s4802_s4 = int_to_ptr.hbm [resolvable:$true] %s4801_s4 }
 0xf9d   : > { %s4803_s0 = scalar_lea.hbm %s4802_s4, 8  ;;  %p4808_p4 = scmp.lt.s32.totalorder %s4802_s4, %s6280_s2 }
 0xf9e   : > { %p4804_p1 = scmp.ne.s32.totalorder %s4802_s4, %s4803_s0  ;;  %p4809_p10 = scmp.lt.s32.totalorder %s4807_s11, %s4803_s0 }
 0xfa0   : > { %p4805_p2 = pnand %p4804_p1, %p5257_p5  ;;  %p4810_p9 = por %p4809_p10, %p4808_p4 }
 0xfa2   : > { %p4806_p3 = pneg %p4805_p2 }
 0xfa4   : > { %p4811_p12 = pnand %p4810_p9, %p4806_p3 }
0x1004   : > { %v3617_v39 = vpop.xlane.xlu2 %3616 }
0x1005   : > { %v3618_v54 = vmul.f32 %v3617_v39, %v5656_v42 }
0x1007   : > { %v3619_v37 = vadd.f32 1e-05, %v3618_v54 }
0x1009   : > { %4427 = vrsqrt.f32 %v3619_v37  ;;  %vm3626_vm1 = vweird.f32 %v3619_v37 }
0x100f   : > { %v4428_v49 = vpop.eup %4427 }
0x1010   : > { %v3621_v63 = vmul.f32 %v4428_v49, %v3619_v37  ;;  %vm3627_vm15 = vweird.f32 %v4428_v49 }
0x1011   : > { %vm3628_vm5 = vmor %vm3626_vm1, %vm3627_vm15 }
0x1012   : > { %v3622_v53 = vmul.f32 %v4428_v49, %v3621_v63 }
0x1014   : > { %v3623_v55 = vmul.f32 0.5, %v3622_v53 }
0x1016   : > { %v3624_v50 = vsub.f32 1.5, %v3623_v55 }
0x1018   : > { %v3625_v57 = vmul.f32 %v4428_v49, %v3624_v50 }
0x101a   : > { %v3629_v11 = vsel %vm3628_vm5, %v4428_v49, %v3625_v57 }
0x101b   : > { %v3630_v42 = vmul.f32 %v3629_v11, %v3613_v46 }
0x101d   : > { %v3634_v60 = vmul.f32 %v4341_v7, %v3630_v42 }
0x101f   : > { %v3638_v31 = vadd.f32 %v4342_v59, %v3634_v60 }
0x1021   : > { %3639 = vst.msk [vmem:[%s1731_s6] sm:$0xff] %vm1771_vm0, %v3638_v31 }
0x1022   : > { %4814 = shalt.err (!%p4811_p12)
}
0x1023   : > { %4148 = dma.vmem_to_hbm [thread:$0]  (%p5257_p5), %s3664_s12, 128, %s3666_s9, %s3641_s23  }
0x1024 PF: > { %s6284_s7 = sld [smem:[#allocation77_spill]] }
0x1025   : > { %s6285_s8 = sld [smem:[#allocation75_spill]] }
0x102a   : > { %p4215_p0 = scmp.ge.s32.totalorder %s6284_s7, 2 }
0x102b   : > { %s3694_s5 = sand.u32 1, %s6285_s8  }
0x102c   : > { %p4187_p7 = pnand %p4215_p0, %p5261_p6  ;;  %s3695_s3 = scalar_lea.sflag [#allocation4], %s3694_s5 }
0x102e   : > { %p4188_p8 = pneg %p4187_p7 }
0x1030   : > { %4856 = dma.done.wait (%p4188_p8), %s3695_s3, 128  }
0x1031   : > { %4858 = vsyncadd (%p4188_p8), %s3695_s3, 4294967168  ;;  %s3713_s4 = scalar_lea.sflag [#allocation22], %s3694_s5 }
0x1032   : > { %4860 = dma.done.wait (%p4188_p8), %s3713_s4, 128  }
0x1033   : > { %4862 = vsyncadd (%p4188_p8), %s3713_s4, 4294967168  ;;  %s6287_s15 = sld [smem:[#allocation78_spill]]  ;;  %s6290_s7 = smov %s4869_s10 }
0x1034   : > { %s6288_s6 = sld [smem:[#allocation76_spill]] }
0x1035   : > { %s6289_s11 = sld [smem:[#allocation79_spill]] }
0x1039   : > { %p127_p5 = scmp.ge.s32.totalorder %s6287_s15, 4  }
0x103a   : > { %s6291_s10 = smov %s6288_s6 }
0x103b   :  { %129 = sbr.rel (!%p127_p5) target bundleno = 118 (0x76), region = 386 }
0x1040   :  { %3719 = vsyncpa [#allocation3], 1 }
0x1041   :  { %3721 = vsyncpa [#allocation3 + $0x1], 1 }
0x1042   :  { %3722 = vsyncpa [#allocation6], 1 }
0x1043   :  { %3723 = vsyncpa [#allocation9], 1 }
0x1044   :  { %3724 = vsyncpa [#allocation12], 1 }
0x1045   :  { %3725 = vsyncpa [#allocation15], 1 }
0x1046   :  { %3726 = vsyncpa [#allocation18], 1 }
0x1047   :  { %3727 = vsyncpa [#allocation4], 1 }
0x1048   :  { %3729 = vsyncpa [#allocation4 + $0x1], 1 }
0x1049   :  { %3730 = vsyncpa [#allocation22], 1 }
0x104a   :  { %3732 = vsyncpa [#allocation22 + $0x1], 1 }

</bundles_post_ra>
